<compile_context>
chip_gen: v6e
topology: v6e:2x2x1
jax: 0.10.0
libtpu: 0.0.40
codegen_flags: <defaults>
</compile_context>

<pallas_src>
import functools
import math

import jax
import jax.numpy as jnp
from jax.experimental import pallas as pl
from jax.experimental.pallas import tpu as pltpu


_MASK_VALUE = -1e30  # large finite negative instead of -inf (no NaN risk)


# ----------------------------------------------------------------------------
# Fused whole-layer kernel
# ----------------------------------------------------------------------------
def _pmt_layer_kernel(v_ref, a_ref, w_ref, b_ref, vo_ref, ao_ref,
                      *, num_heads, window, shift, mask_value):
    """Whole PMT layer (8 attention units + snippet-shift rolls) for ONE batch
    element, fully resident in VMEM.

    Block shapes:
      v_ref, a_ref   : (1, T, D)      video / audio snippet features
      w_ref          : (8, 4, D, D)   per-unit packed {q, k, v, out} matrices
                       (fc pre-projection composed with MHA in-proj; attention
                       scale folded into q; pre-transposed so y = x @ w)
      b_ref          : (8, 4, 1, D)   matching biases
      vo_ref, ao_ref : (1, T, D)
    Unit order: [b1 v-self, b1 a-self, b1 v-cross, b1 a-cross,
                 b2 v-self, b2 a-self, b2 v-cross, b2 a-cross]
    """
    T, D = v_ref.shape[1], v_ref.shape[2]
    H = num_heads
    Dh = D // H

    # Additive band mask generated in-kernel (no (T,T) HBM operand), computed
    # once per grid step and shared by all 8 units / all heads.
    # TODO(synk): LFAV `create_attention_mask` is not in the provided source;
    # a symmetric band mask with window = 2**layer_num is used as a placeholder.
    row = jax.lax.broadcasted_iota(jnp.int32, (T, T), 0)
    col = jax.lax.broadcasted_iota(jnp.int32, (T, T), 1)
    mask = jnp.where(jnp.abs(row - col) <= window, 0.0, mask_value).astype(jnp.float32)

    # Snippet-shift roll (torch.roll(..., dims=2) == FEATURE-axis roll, matching
    # the PyTorch module verbatim) expressed as an exact permutation matmul:
    #   x @ p_fwd == jnp.roll(x, -shift, axis=-1),  x @ p_bwd == jnp.roll(x, +shift, axis=-1)
    sroll = shift % D
    ii = jax.lax.broadcasted_iota(jnp.int32, (D, D), 0)
    jj = jax.lax.broadcasted_iota(jnp.int32, (D, D), 1)
    dd = ii - jj
    p_fwd = ((dd == sroll) | (dd == sroll - D)).astype(jnp.float32)
    p_bwd = ((dd == -sroll) | (dd == D - sroll)).astype(jnp.float32)

    def attention_unit(u, xq, xkv):
        # Fused LFAV fc_{q,k,v} + MHA in-proj: three full-width (T,D)@(D,D)
        # matmuls (scale already folded into w_ref[u,0] / b_ref[u,0]).
        q = jnp.dot(xq, w_ref[u, 0], preferred_element_type=jnp.float32) + b_ref[u, 0]
        k = jnp.dot(xkv, w_ref[u, 1], preferred_element_type=jnp.float32) + b_ref[u, 1]
        v = jnp.dot(xkv, w_ref[u, 2], preferred_element_type=jnp.float32) + b_ref[u, 2]

        heads = []
        for h in range(H):
            lo = h * Dh
            qh = q[:, lo:lo + Dh]
            kh = k[:, lo:lo + Dh]
            vh = v[:, lo:lo + Dh]
            # q @ k^T without an explicit transpose: contract the last dims.
            s = jax.lax.dot_general(qh, kh, (((1,), (1,)), ((), ())),
                                    preferred_element_type=jnp.float32) + mask
            s = s - jnp.max(s, axis=-1, keepdims=True)
            p = jnp.exp(s)
            # approx reciprocal -> EUP slot (frees VALU bundle slots).
            p = p * pl.reciprocal(jnp.sum(p, axis=-1, keepdims=True), approx=True)
            heads.append(jnp.dot(p, vh, preferred_element_type=jnp.float32))

        o = jnp.concatenate(heads, axis=-1)                                    # (T, D)
        return jnp.dot(o, w_ref[u, 3], preferred_element_type=jnp.float32) + b_ref[u, 3]

    v_in = v_ref[0].astype(jnp.float32)                                        # (T, D)
    a_in = a_ref[0].astype(jnp.float32)

    # ---- MultimodalAttentionBlock one ----
    v_self = attention_unit(0, v_in, v_in)
    a_self = attention_unit(1, a_in, a_in)
    v_x = attention_unit(2, v_self, a_self)      # video cross: q=video, kv=audio
    a_x = attention_unit(3, a_self, v_self)      # audio cross: q=audio, kv=video

    # ---- snippet shift: torch.roll(video, -shift, dims=2) ----
    if sroll != 0:
        v_x = jnp.dot(v_x, p_fwd, preferred_element_type=jnp.float32)

    # ---- MultimodalAttentionBlock two ----
    v_self2 = attention_unit(4, v_x, v_x)
    a_self2 = attention_unit(5, a_x, a_x)
    v_out = attention_unit(6, v_self2, a_self2)
    a_out = attention_unit(7, a_self2, v_self2)

    # ---- restore order: torch.roll(video, +shift, dims=2) ----
    if sroll != 0:
        v_out = jnp.dot(v_out, p_bwd, preferred_element_type=jnp.float32)

    vo_ref[0] = v_out.astype(vo_ref.dtype)
    ao_ref[0] = a_out.astype(ao_ref.dtype)


def pmt_layer_pallas(packed, video, audio, *, num_heads, layer_num):
    """video, audio: (B, T, D) batch-first.  Returns (video_out, audio_out)."""
    B, T, D = video.shape
    window = 2 ** layer_num
    shift = (2 ** layer_num) // 2
    kernel = functools.partial(_pmt_layer_kernel, num_heads=num_heads,
                               window=window, shift=shift, mask_value=_MASK_VALUE)
    return pl.pallas_call(
        kernel,
        out_shape=(jax.ShapeDtypeStruct((B, T, D), video.dtype),
                   jax.ShapeDtypeStruct((B, T, D), audio.dtype)),
        grid=(B,),
        in_specs=[
            pl.BlockSpec((1, T, D), lambda b: (b, 0, 0)),
            pl.BlockSpec((1, T, D), lambda b: (b, 0, 0)),
            # Whole-layer weights: constant block index along the batch grid
            # axis -> fetched once, VMEM-resident across all grid steps.
            pl.BlockSpec((8, 4, D, D), lambda b: (0, 0, 0, 0)),
            pl.BlockSpec((8, 4, 1, D), lambda b: (0, 0, 0, 0)),
        ],
        out_specs=(pl.BlockSpec((1, T, D), lambda b: (b, 0, 0)),
                   pl.BlockSpec((1, T, D), lambda b: (b, 0, 0))),
        compiler_params=pltpu.CompilerParams(
            # One parallel batch axis keeps both v7x TensorCores busy at B>=2.
            dimension_semantics=("parallel",),
        ),
    )(video, audio, packed["w"], packed["b"])


# ----------------------------------------------------------------------------
# Parameter init (torch-like) and one-time packing into kernel-friendly layout
# ----------------------------------------------------------------------------
def _init_linear(key, d_out, d_in):
    k1, k2 = jax.random.split(key)
    bound = 1.0 / math.sqrt(d_in)
    w = jax.random.uniform(k1, (d_out, d_in), jnp.float32, -bound, bound)
    b = jax.random.uniform(k2, (d_out,), jnp.float32, -bound, bound)
    return {"w": w, "b": b}


def _init_mha(key, d):
    k1, k2 = jax.random.split(key)
    bound = math.sqrt(6.0 / (3 * d + d))  # xavier_uniform_ for in_proj_weight
    in_w = jax.random.uniform(k1, (3 * d, d), jnp.float32, -bound, bound)
    in_b = jnp.zeros((3 * d,), jnp.float32)
    out = _init_linear(k2, d, d)
    return {"in_w": in_w, "in_b": in_b, "out_w": out["w"],
            "out_b": jnp.zeros((d,), jnp.float32)}


def init_params(key, feature_dim):
    names_fc = [
        "video_self_fc_q", "video_self_fc_k", "video_self_fc_v",
        "audio_self_fc_q", "audio_self_fc_k", "audio_self_fc_v",
        "video_cross_fc_q", "video_cross_fc_k", "video_cross_fc_v",
        "audio_cross_fc_q", "audio_cross_fc_k", "audio_cross_fc_v",
    ]
    names_mha = [
        "video_self_attention", "audio_self_attention",
        "video_cross_attention", "audio_cross_attention",
    ]
    keys = jax.random.split(key, len(names_fc) + len(names_mha))
    params = {}
    for n, k in zip(names_fc, keys[: len(names_fc)]):
        params[n] = _init_linear(k, feature_dim, feature_dim)
    for n, k in zip(names_mha, keys[len(names_fc):]):
        params[n] = _init_mha(k, feature_dim)
    return params


def _pack_unit(fc_q, fc_k, fc_v, mha, num_heads):
    """Compose the LFAV fc pre-projection with the MHA in-projection (exact
    linear-map composition), fold the 1/sqrt(Dh) scale into the q path, and
    pre-transpose everything so that y = x @ w in the kernel."""
    D = fc_q["w"].shape[0]
    Dh = D // num_heads
    scale = 1.0 / math.sqrt(Dh)

    in_w, in_b = mha["in_w"], mha["in_b"]
    wq_in, wk_in, wv_in = in_w[:D], in_w[D:2 * D], in_w[2 * D:]
    bq_in, bk_in, bv_in = in_b[:D], in_b[D:2 * D], in_b[2 * D:]

    def compose(fc, w_in_part, b_in_part, s=1.0):
        w = (fc["w"].T @ w_in_part.T) * s              # (D, D): x -> proj
        b = (fc["b"] @ w_in_part.T + b_in_part) * s    # (D,)
        return w, b

    wq, bq = compose(fc_q, wq_in, bq_in, scale)
    wk, bk = compose(fc_k, wk_in, bk_in)
    wv, bv = compose(fc_v, wv_in, bv_in)
    wo, bo = mha["out_w"].T, mha["out_b"]

    w = jnp.stack([wq, wk, wv, wo], axis=0)                     # (4, D, D)
    b = jnp.stack([bq, bk, bv, bo], axis=0).reshape(4, 1, D)    # (4, 1, D)
    return w, b


def pack_layer_params(params1, params2, num_heads):
    """Pack both MultimodalAttentionBlocks into (8,4,D,D) / (8,4,1,D) arrays."""
    def block_units(p):
        return [
            _pack_unit(p["video_self_fc_q"], p["video_self_fc_k"],
                       p["video_self_fc_v"], p["video_self_attention"], num_heads),
            _pack_unit(p["audio_self_fc_q"], p["audio_self_fc_k"],
                       p["audio_self_fc_v"], p["audio_self_attention"], num_heads),
            _pack_unit(p["video_cross_fc_q"], p["video_cross_fc_k"],
                       p["video_cross_fc_v"], p["video_cross_attention"], num_heads),
            _pack_unit(p["audio_cross_fc_q"], p["audio_cross_fc_k"],
                       p["audio_cross_fc_v"], p["audio_cross_attention"], num_heads),
        ]
    units = block_units(params1) + block_units(params2)
    return {"w": jnp.stack([u[0] for u in units], axis=0),      # (8, 4, D, D)
            "b": jnp.stack([u[1] for u in units], axis=0)}      # (8, 4, 1, D)


# ----------------------------------------------------------------------------
# Pure-JAX reference (PyTorch-order math) for correctness checking
# ----------------------------------------------------------------------------
def _ref_band_mask(T, layer_num):
    window = 2 ** layer_num
    idx = jnp.arange(T)
    allowed = jnp.abs(idx[:, None] - idx[None, :]) <= window
    return jnp.where(allowed, 0.0, _MASK_VALUE).astype(jnp.float32)


def _ref_mha(q, k, v, p, num_heads, mask):
    T, B, D = q.shape
    H = num_heads
    Dh = D // H
    scale = 1.0 / math.sqrt(Dh)
    Wq, Wk, Wv = p["in_w"][:D], p["in_w"][D:2 * D], p["in_w"][2 * D:]
    bq, bk, bv = p["in_b"][:D], p["in_b"][D:2 * D], p["in_b"][2 * D:]

    def proj(x, W, b_):
        y = x.reshape(T * B, D) @ W.T + b_
        return y.reshape(T, B * H, Dh).transpose(1, 0, 2)       # (B*H, T, Dh)

    qh = proj(q, Wq, bq) * scale
    kh = proj(k, Wk, bk)
    vh = proj(v, Wv, bv)
    s = jnp.einsum("btd,bsd->bts", qh, kh) + mask[None]
    att = jax.nn.softmax(s, axis=-1)
    o = jnp.einsum("bts,bsd->btd", att, vh)
    o = o.transpose(1, 0, 2).reshape(T * B, D)
    o = o @ p["out_w"].T + p["out_b"]
    return o.reshape(T, B, D)


def _ref_block(params, video, audio, num_heads, layer_num):
    B, T, D = video.shape
    v = jnp.transpose(video, (1, 0, 2))
    a = jnp.transpose(audio, (1, 0, 2))
    mask = _ref_band_mask(T, layer_num)

    def fc(x, pp):
        return (x.reshape(T * B, D) @ pp["w"].T + pp["b"]).reshape(T, B, D)

    v_self = _ref_mha(fc(v, params["video_self_fc_q"]), fc(v, params["video_self_fc_k"]),
                      fc(v, params["video_self_fc_v"]), params["video_self_attention"],
                      num_heads, mask)
    a_self = _ref_mha(fc(a, params["audio_self_fc_q"]), fc(a, params["audio_self_fc_k"]),
                      fc(a, params["audio_self_fc_v"]), params["audio_self_attention"],
                      num_heads, mask)
    v_cross = _ref_mha(fc(v_self, params["video_cross_fc_q"]), fc(a_self, params["video_cross_fc_k"]),
                       fc(a_self, params["video_cross_fc_v"]), params["video_cross_attention"],
                       num_heads, mask)
    a_cross = _ref_mha(fc(a_self, params["audio_cross_fc_q"]), fc(v_self, params["audio_cross_fc_k"]),
                       fc(v_self, params["audio_cross_fc_v"]), params["audio_cross_attention"],
                       num_heads, mask)
    return jnp.transpose(v_cross, (1, 0, 2)), jnp.transpose(a_cross, (1, 0, 2))


def pmt_layer_reference(params1, params2, video, audio, *, num_heads, layer_num):
    v, a = _ref_block(params1, video, audio, num_heads, layer_num)
    shift = (2 ** layer_num) // 2
    v = jnp.roll(v, -shift, axis=2)   # torch.roll(dims=2) -> feature axis, as in the module
    v, a = _ref_block(params2, v, a, num_heads, layer_num)
    v = jnp.roll(v, shift, axis=2)
    return v, a


# ----------------------------------------------------------------------------
# main
# ----------------------------------------------------------------------------
if __name__ == "__main__":
    B, T, D, H = 2, 8, 32, 4        # batch, num_snippets, feature_dim, num_heads
    layer_num = 1                   # 1-indexed layer number (mask window / shift)

    key = jax.random.PRNGKey(0)
    kp1, kp2, kvid, kaud = jax.random.split(key, 4)
    params1 = init_params(kp1, D)   # MultimodalAttentionBlock one
    params2 = init_params(kp2, D)   # MultimodalAttentionBlock two
    video = jax.random.normal(kvid, (B, T, D), jnp.float32)
    audio = jax.random.normal(kaud, (B, T, D), jnp.float32)

    packed = pack_layer_params(params1, params2, H)   # one-time weight packing

    fwd = jax.jit(functools.partial(pmt_layer_pallas, num_heads=H, layer_num=layer_num))
    v_out, a_out = fwd(packed, video, audio)
    jax.block_until_ready((v_out, a_out))

    # Correctness check against a pure-JAX reference of the same math.
    # Tolerance accounts for the (exact-in-math) composed fc∘in-proj weights and
    # the approximate EUP reciprocal in the softmax denominator.
    v_ref, a_ref = pmt_layer_reference(params1, params2, video, audio,
                                       num_heads=H, layer_num=layer_num)
    assert v_out.shape == (B, T, D) and a_out.shape == (B, T, D)
    assert jnp.allclose(v_out, v_ref, atol=2e-3, rtol=2e-3), \
        float(jnp.max(jnp.abs(v_out - v_ref)))
    assert jnp.allclose(a_out, a_ref, atol=2e-3, rtol=2e-3), \
        float(jnp.max(jnp.abs(a_out - a_ref)))

    print("KERNEL_OK")
</pallas_src>

<mosaic_0001>
module attributes {stable_mosaic.version = 11 : i64} {
  func.func @_pmt_layer_kernel(%arg0: i32, %arg1: memref<1x8x32xf32, #tpu.memory_space<vmem>>, %arg2: memref<1x8x32xf32, #tpu.memory_space<vmem>>, %arg3: memref<8x4x32x32xf32, #tpu.memory_space<vmem>>, %arg4: memref<8x4x1x32xf32, #tpu.memory_space<vmem>>, %arg5: memref<1x8x32xf32, #tpu.memory_space<vmem>>, %arg6: memref<1x8x32xf32, #tpu.memory_space<vmem>>) attributes {dimension_semantics = [#tpu.dimension_semantics<parallel>], iteration_bounds = array<i64: 2>, scalar_prefetch = 0 : i64, scratch_operands = 0 : i64, tpu.core_type = #tpu.core_type<tc>, window_params = [{transform_indices = @transform_0, window_bounds = array<i64: 1, 8, 32>}, {transform_indices = @transform_1, window_bounds = array<i64: 1, 8, 32>}, {pipeline_mode = #tpu.pipeline_mode<synchronous>, transform_indices = @transform_2, window_bounds = array<i64: 8, 4, 32, 32>}, {pipeline_mode = #tpu.pipeline_mode<synchronous>, transform_indices = @transform_3, window_bounds = array<i64: 8, 4, 1, 32>}, {transform_indices = @transform_4, window_bounds = array<i64: 1, 8, 32>}, {transform_indices = @transform_5, window_bounds = array<i64: 1, 8, 32>}]} {
    %0 = tpu.iota {dimensions = array<i32: 0>} : vector<8x8xi32>
    %1 = tpu.iota {dimensions = array<i32: 1>} : vector<8x8xi32>
    %2 = arith.subi %0, %1 : vector<8x8xi32>
    %3 = math.absi %2 : vector<8x8xi32>
    %c2_i32 = arith.constant 2 : i32
    %4 = vector.broadcast %c2_i32 : i32 to vector<8x8xi32>
    %5 = arith.cmpi sle, %3, %4 : vector<8x8xi32>
    %cst = arith.constant 0.000000e+00 : f32
    %cst_0 = arith.constant -1.000000e+30 : f32
    %6 = vector.broadcast %cst : f32 to vector<8x8xf32>
    %7 = vector.broadcast %cst_0 : f32 to vector<8x8xf32>
    %8 = arith.select %5, %6, %7 : vector<8x8xi1>, vector<8x8xf32>
    %9 = tpu.iota {dimensions = array<i32: 0>} : vector<32x32xi32>
    %10 = tpu.iota {dimensions = array<i32: 1>} : vector<32x32xi32>
    %11 = arith.subi %9, %10 : vector<32x32xi32>
    %c1_i32 = arith.constant 1 : i32
    %12 = vector.broadcast %c1_i32 : i32 to vector<32x32xi32>
    %13 = arith.cmpi eq, %11, %12 : vector<32x32xi32>
    %c-31_i32 = arith.constant -31 : i32
    %14 = vector.broadcast %c-31_i32 : i32 to vector<32x32xi32>
    %15 = arith.cmpi eq, %11, %14 : vector<32x32xi32>
    %16 = arith.ori %13, %15 : vector<32x32xi1>
    %17 = arith.extui %16 : vector<32x32xi1> to vector<32x32xi32>
    %18 = arith.sitofp %17 : vector<32x32xi32> to vector<32x32xf32>
    %c-1_i32 = arith.constant -1 : i32
    %19 = vector.broadcast %c-1_i32 : i32 to vector<32x32xi32>
    %20 = arith.cmpi eq, %11, %19 : vector<32x32xi32>
    %c31_i32 = arith.constant 31 : i32
    %21 = vector.broadcast %c31_i32 : i32 to vector<32x32xi32>
    %22 = arith.cmpi eq, %11, %21 : vector<32x32xi32>
    %23 = arith.ori %20, %22 : vector<32x32xi1>
    %24 = arith.extui %23 : vector<32x32xi1> to vector<32x32xi32>
    %25 = arith.sitofp %24 : vector<32x32xi32> to vector<32x32xf32>
    %c0 = arith.constant 0 : index
    %c0_1 = arith.constant 0 : index
    %c0_2 = arith.constant 0 : index
    %26 = vector.load %arg1[%c0, %c0_1, %c0_2] : memref<1x8x32xf32, #tpu.memory_space<vmem>>, vector<1x8x32xf32>
    %27 = vector.shape_cast %26 : vector<1x8x32xf32> to vector<8x32xf32>
    %c0_3 = arith.constant 0 : index
    %c0_4 = arith.constant 0 : index
    %c0_5 = arith.constant 0 : index
    %28 = vector.load %arg2[%c0_3, %c0_4, %c0_5] : memref<1x8x32xf32, #tpu.memory_space<vmem>>, vector<1x8x32xf32>
    %29 = vector.shape_cast %28 : vector<1x8x32xf32> to vector<8x32xf32>
    %c0_6 = arith.constant 0 : index
    %c0_7 = arith.constant 0 : index
    %c0_8 = arith.constant 0 : index
    %c0_9 = arith.constant 0 : index
    %30 = vector.load %arg3[%c0_6, %c0_7, %c0_8, %c0_9] : memref<8x4x32x32xf32, #tpu.memory_space<vmem>>, vector<1x1x32x32xf32>
    %31 = vector.shape_cast %30 : vector<1x1x32x32xf32> to vector<32x32xf32>
    %cst_10 = arith.constant dense<0.000000e+00> : vector<8x32xf32>
    %32 = tpu.matmul %27, %31, %cst_10 {dimension_numbers = #tpu.dot_dimension_numbers<[1], [0], [0], [1], [0, 0, 1, 1], [], []>} : vector<8x32xf32>, vector<32x32xf32>, vector<8x32xf32> -> vector<8x32xf32>
    %c0_11 = arith.constant 0 : index
    %c0_12 = arith.constant 0 : index
    %c0_13 = arith.constant 0 : index
    %c0_14 = arith.constant 0 : index
    %33 = vector.load %arg4[%c0_11, %c0_12, %c0_13, %c0_14] : memref<8x4x1x32xf32, #tpu.memory_space<vmem>>, vector<1x1x1x32xf32>
    %34 = vector.shape_cast %33 : vector<1x1x1x32xf32> to vector<1x32xf32>
    %35 = vector.broadcast %34 : vector<1x32xf32> to vector<8x32xf32>
    %36 = arith.addf %32, %35 : vector<8x32xf32>
    %c0_15 = arith.constant 0 : index
    %c1 = arith.constant 1 : index
    %c0_16 = arith.constant 0 : index
    %c0_17 = arith.constant 0 : index
    %37 = vector.load %arg3[%c0_15, %c1, %c0_16, %c0_17] : memref<8x4x32x32xf32, #tpu.memory_space<vmem>>, vector<1x1x32x32xf32>
    %38 = vector.shape_cast %37 : vector<1x1x32x32xf32> to vector<32x32xf32>
    %cst_18 = arith.constant dense<0.000000e+00> : vector<8x32xf32>
    %39 = tpu.matmul %27, %38, %cst_18 {dimension_numbers = #tpu.dot_dimension_numbers<[1], [0], [0], [1], [0, 0, 1, 1], [], []>} : vector<8x32xf32>, vector<32x32xf32>, vector<8x32xf32> -> vector<8x32xf32>
    %c0_19 = arith.constant 0 : index
    %c1_20 = arith.constant 1 : index
    %c0_21 = arith.constant 0 : index
    %c0_22 = arith.constant 0 : index
    %40 = vector.load %arg4[%c0_19, %c1_20, %c0_21, %c0_22] : memref<8x4x1x32xf32, #tpu.memory_space<vmem>>, vector<1x1x1x32xf32>
    %41 = vector.shape_cast %40 : vector<1x1x1x32xf32> to vector<1x32xf32>
    %42 = vector.broadcast %41 : vector<1x32xf32> to vector<8x32xf32>
    %43 = arith.addf %39, %42 : vector<8x32xf32>
    %c0_23 = arith.constant 0 : index
    %c2 = arith.constant 2 : index
    %c0_24 = arith.constant 0 : index
    %c0_25 = arith.constant 0 : index
    %44 = vector.load %arg3[%c0_23, %c2, %c0_24, %c0_25] : memref<8x4x32x32xf32, #tpu.memory_space<vmem>>, vector<1x1x32x32xf32>
    %45 = vector.shape_cast %44 : vector<1x1x32x32xf32> to vector<32x32xf32>
    %cst_26 = arith.constant dense<0.000000e+00> : vector<8x32xf32>
    %46 = tpu.matmul %27, %45, %cst_26 {dimension_numbers = #tpu.dot_dimension_numbers<[1], [0], [0], [1], [0, 0, 1, 1], [], []>} : vector<8x32xf32>, vector<32x32xf32>, vector<8x32xf32> -> vector<8x32xf32>
    %c0_27 = arith.constant 0 : index
    %c2_28 = arith.constant 2 : index
    %c0_29 = arith.constant 0 : index
    %c0_30 = arith.constant 0 : index
    %47 = vector.load %arg4[%c0_27, %c2_28, %c0_29, %c0_30] : memref<8x4x1x32xf32, #tpu.memory_space<vmem>>, vector<1x1x1x32xf32>
    %48 = vector.shape_cast %47 : vector<1x1x1x32xf32> to vector<1x32xf32>
    %49 = vector.broadcast %48 : vector<1x32xf32> to vector<8x32xf32>
    %50 = arith.addf %46, %49 : vector<8x32xf32>
    %51 = vector.extract_strided_slice %36 {offsets = [0, 0], sizes = [8, 8], strides = [1, 1]} : vector<8x32xf32> to vector<8x8xf32>
    %52 = vector.extract_strided_slice %43 {offsets = [0, 0], sizes = [8, 8], strides = [1, 1]} : vector<8x32xf32> to vector<8x8xf32>
    %53 = vector.extract_strided_slice %50 {offsets = [0, 0], sizes = [8, 8], strides = [1, 1]} : vector<8x32xf32> to vector<8x8xf32>
    %cst_31 = arith.constant dense<0.000000e+00> : vector<8x8xf32>
    %54 = tpu.matmul %51, %52, %cst_31 {dimension_numbers = #tpu.dot_dimension_numbers<[1], [1], [0], [0], [0, 0, 1, 0], [], []>} : vector<8x8xf32>, vector<8x8xf32>, vector<8x8xf32> -> vector<8x8xf32>
    %55 = arith.addf %54, %8 : vector<8x8xf32>
    %cst_32 = arith.constant dense<0xFF800000> : vector<8xf32>
    %56 = vector.multi_reduction <maximumf>, %55, %cst_32 [1] : vector<8x8xf32> to vector<8xf32>
    %57 = vector.shape_cast %56 : vector<8xf32> to vector<8x1xf32>
    %58 = vector.broadcast %57 : vector<8x1xf32> to vector<8x8xf32>
    %59 = arith.subf %55, %58 : vector<8x8xf32>
    %60 = math.exp %59 : vector<8x8xf32>
    %cst_33 = arith.constant dense<0.000000e+00> : vector<8xf32>
    %61 = vector.multi_reduction <add>, %60, %cst_33 [1] : vector<8x8xf32> to vector<8xf32>
    %62 = vector.shape_cast %61 : vector<8xf32> to vector<8x1xf32>
    %63 = tpu.reciprocal %62 {approx = true} : vector<8x1xf32> -> vector<8x1xf32>
    %64 = vector.broadcast %63 : vector<8x1xf32> to vector<8x8xf32>
    %65 = arith.mulf %60, %64 : vector<8x8xf32>
    %cst_34 = arith.constant dense<0.000000e+00> : vector<8x8xf32>
    %66 = tpu.matmul %65, %53, %cst_34 {dimension_numbers = #tpu.dot_dimension_numbers<[1], [0], [0], [1], [0, 0, 1, 1], [], []>} : vector<8x8xf32>, vector<8x8xf32>, vector<8x8xf32> -> vector<8x8xf32>
    %67 = vector.extract_strided_slice %36 {offsets = [0, 8], sizes = [8, 8], strides = [1, 1]} : vector<8x32xf32> to vector<8x8xf32>
    %68 = vector.extract_strided_slice %43 {offsets = [0, 8], sizes = [8, 8], strides = [1, 1]} : vector<8x32xf32> to vector<8x8xf32>
    %69 = vector.extract_strided_slice %50 {offsets = [0, 8], sizes = [8, 8], strides = [1, 1]} : vector<8x32xf32> to vector<8x8xf32>
    %cst_35 = arith.constant dense<0.000000e+00> : vector<8x8xf32>
    %70 = tpu.matmul %67, %68, %cst_35 {dimension_numbers = #tpu.dot_dimension_numbers<[1], [1], [0], [0], [0, 0, 1, 0], [], []>} : vector<8x8xf32>, vector<8x8xf32>, vector<8x8xf32> -> vector<8x8xf32>
    %71 = arith.addf %70, %8 : vector<8x8xf32>
    %cst_36 = arith.constant dense<0xFF800000> : vector<8xf32>
    %72 = vector.multi_reduction <maximumf>, %71, %cst_36 [1] : vector<8x8xf32> to vector<8xf32>
    %73 = vector.shape_cast %72 : vector<8xf32> to vector<8x1xf32>
    %74 = vector.broadcast %73 : vector<8x1xf32> to vector<8x8xf32>
    %75 = arith.subf %71, %74 : vector<8x8xf32>
    %76 = math.exp %75 : vector<8x8xf32>
    %cst_37 = arith.constant dense<0.000000e+00> : vector<8xf32>
    %77 = vector.multi_reduction <add>, %76, %cst_37 [1] : vector<8x8xf32> to vector<8xf32>
    %78 = vector.shape_cast %77 : vector<8xf32> to vector<8x1xf32>
    %79 = tpu.reciprocal %78 {approx = true} : vector<8x1xf32> -> vector<8x1xf32>
    %80 = vector.broadcast %79 : vector<8x1xf32> to vector<8x8xf32>
    %81 = arith.mulf %76, %80 : vector<8x8xf32>
    %cst_38 = arith.constant dense<0.000000e+00> : vector<8x8xf32>
    %82 = tpu.matmul %81, %69, %cst_38 {dimension_numbers = #tpu.dot_dimension_numbers<[1], [0], [0], [1], [0, 0, 1, 1], [], []>} : vector<8x8xf32>, vector<8x8xf32>, vector<8x8xf32> -> vector<8x8xf32>
    %83 = vector.extract_strided_slice %36 {offsets = [0, 16], sizes = [8, 8], strides = [1, 1]} : vector<8x32xf32> to vector<8x8xf32>
    %84 = vector.extract_strided_slice %43 {offsets = [0, 16], sizes = [8, 8], strides = [1, 1]} : vector<8x32xf32> to vector<8x8xf32>
    %85 = vector.extract_strided_slice %50 {offsets = [0, 16], sizes = [8, 8], strides = [1, 1]} : vector<8x32xf32> to vector<8x8xf32>
    %cst_39 = arith.constant dense<0.000000e+00> : vector<8x8xf32>
    %86 = tpu.matmul %83, %84, %cst_39 {dimension_numbers = #tpu.dot_dimension_numbers<[1], [1], [0], [0], [0, 0, 1, 0], [], []>} : vector<8x8xf32>, vector<8x8xf32>, vector<8x8xf32> -> vector<8x8xf32>
    %87 = arith.addf %86, %8 : vector<8x8xf32>
    %cst_40 = arith.constant dense<0xFF800000> : vector<8xf32>
    %88 = vector.multi_reduction <maximumf>, %87, %cst_40 [1] : vector<8x8xf32> to vector<8xf32>
    %89 = vector.shape_cast %88 : vector<8xf32> to vector<8x1xf32>
    %90 = vector.broadcast %89 : vector<8x1xf32> to vector<8x8xf32>
    %91 = arith.subf %87, %90 : vector<8x8xf32>
    %92 = math.exp %91 : vector<8x8xf32>
    %cst_41 = arith.constant dense<0.000000e+00> : vector<8xf32>
    %93 = vector.multi_reduction <add>, %92, %cst_41 [1] : vector<8x8xf32> to vector<8xf32>
    %94 = vector.shape_cast %93 : vector<8xf32> to vector<8x1xf32>
    %95 = tpu.reciprocal %94 {approx = true} : vector<8x1xf32> -> vector<8x1xf32>
    %96 = vector.broadcast %95 : vector<8x1xf32> to vector<8x8xf32>
    %97 = arith.mulf %92, %96 : vector<8x8xf32>
    %cst_42 = arith.constant dense<0.000000e+00> : vector<8x8xf32>
    %98 = tpu.matmul %97, %85, %cst_42 {dimension_numbers = #tpu.dot_dimension_numbers<[1], [0], [0], [1], [0, 0, 1, 1], [], []>} : vector<8x8xf32>, vector<8x8xf32>, vector<8x8xf32> -> vector<8x8xf32>
    %99 = vector.extract_strided_slice %36 {offsets = [0, 24], sizes = [8, 8], strides = [1, 1]} : vector<8x32xf32> to vector<8x8xf32>
    %100 = vector.extract_strided_slice %43 {offsets = [0, 24], sizes = [8, 8], strides = [1, 1]} : vector<8x32xf32> to vector<8x8xf32>
    %101 = vector.extract_strided_slice %50 {offsets = [0, 24], sizes = [8, 8], strides = [1, 1]} : vector<8x32xf32> to vector<8x8xf32>
    %cst_43 = arith.constant dense<0.000000e+00> : vector<8x8xf32>
    %102 = tpu.matmul %99, %100, %cst_43 {dimension_numbers = #tpu.dot_dimension_numbers<[1], [1], [0], [0], [0, 0, 1, 0], [], []>} : vector<8x8xf32>, vector<8x8xf32>, vector<8x8xf32> -> vector<8x8xf32>
    %103 = arith.addf %102, %8 : vector<8x8xf32>
    %cst_44 = arith.constant dense<0xFF800000> : vector<8xf32>
    %104 = vector.multi_reduction <maximumf>, %103, %cst_44 [1] : vector<8x8xf32> to vector<8xf32>
    %105 = vector.shape_cast %104 : vector<8xf32> to vector<8x1xf32>
    %106 = vector.broadcast %105 : vector<8x1xf32> to vector<8x8xf32>
    %107 = arith.subf %103, %106 : vector<8x8xf32>
    %108 = math.exp %107 : vector<8x8xf32>
    %cst_45 = arith.constant dense<0.000000e+00> : vector<8xf32>
    %109 = vector.multi_reduction <add>, %108, %cst_45 [1] : vector<8x8xf32> to vector<8xf32>
    %110 = vector.shape_cast %109 : vector<8xf32> to vector<8x1xf32>
    %111 = tpu.reciprocal %110 {approx = true} : vector<8x1xf32> -> vector<8x1xf32>
    %112 = vector.broadcast %111 : vector<8x1xf32> to vector<8x8xf32>
    %113 = arith.mulf %108, %112 : vector<8x8xf32>
    %cst_46 = arith.constant dense<0.000000e+00> : vector<8x8xf32>
    %114 = tpu.matmul %113, %101, %cst_46 {dimension_numbers = #tpu.dot_dimension_numbers<[1], [0], [0], [1], [0, 0, 1, 1], [], []>} : vector<8x8xf32>, vector<8x8xf32>, vector<8x8xf32> -> vector<8x8xf32>
    %115 = tpu.concatenate %66, %82, %98, %114 in 1 : vector<8x8xf32>, vector<8x8xf32>, vector<8x8xf32>, vector<8x8xf32> -> vector<8x32xf32>
    %c0_47 = arith.constant 0 : index
    %c3 = arith.constant 3 : index
    %c0_48 = arith.constant 0 : index
    %c0_49 = arith.constant 0 : index
    %116 = vector.load %arg3[%c0_47, %c3, %c0_48, %c0_49] : memref<8x4x32x32xf32, #tpu.memory_space<vmem>>, vector<1x1x32x32xf32>
    %117 = vector.shape_cast %116 : vector<1x1x32x32xf32> to vector<32x32xf32>
    %cst_50 = arith.constant dense<0.000000e+00> : vector<8x32xf32>
    %118 = tpu.matmul %115, %117, %cst_50 {dimension_numbers = #tpu.dot_dimension_numbers<[1], [0], [0], [1], [0, 0, 1, 1], [], []>} : vector<8x32xf32>, vector<32x32xf32>, vector<8x32xf32> -> vector<8x32xf32>
    %c0_51 = arith.constant 0 : index
    %c3_52 = arith.constant 3 : index
    %c0_53 = arith.constant 0 : index
    %c0_54 = arith.constant 0 : index
    %119 = vector.load %arg4[%c0_51, %c3_52, %c0_53, %c0_54] : memref<8x4x1x32xf32, #tpu.memory_space<vmem>>, vector<1x1x1x32xf32>
    %120 = vector.shape_cast %119 : vector<1x1x1x32xf32> to vector<1x32xf32>
    %121 = vector.broadcast %120 : vector<1x32xf32> to vector<8x32xf32>
    %122 = arith.addf %118, %121 : vector<8x32xf32>
    %c1_55 = arith.constant 1 : index
    %c0_56 = arith.constant 0 : index
    %c0_57 = arith.constant 0 : index
    %c0_58 = arith.constant 0 : index
    %123 = vector.load %arg3[%c1_55, %c0_56, %c0_57, %c0_58] : memref<8x4x32x32xf32, #tpu.memory_space<vmem>>, vector<1x1x32x32xf32>
    %124 = vector.shape_cast %123 : vector<1x1x32x32xf32> to vector<32x32xf32>
    %cst_59 = arith.constant dense<0.000000e+00> : vector<8x32xf32>
    %125 = tpu.matmul %29, %124, %cst_59 {dimension_numbers = #tpu.dot_dimension_numbers<[1], [0], [0], [1], [0, 0, 1, 1], [], []>} : vector<8x32xf32>, vector<32x32xf32>, vector<8x32xf32> -> vector<8x32xf32>
    %c1_60 = arith.constant 1 : index
    %c0_61 = arith.constant 0 : index
    %c0_62 = arith.constant 0 : index
    %c0_63 = arith.constant 0 : index
    %126 = vector.load %arg4[%c1_60, %c0_61, %c0_62, %c0_63] : memref<8x4x1x32xf32, #tpu.memory_space<vmem>>, vector<1x1x1x32xf32>
    %127 = vector.shape_cast %126 : vector<1x1x1x32xf32> to vector<1x32xf32>
    %128 = vector.broadcast %127 : vector<1x32xf32> to vector<8x32xf32>
    %129 = arith.addf %125, %128 : vector<8x32xf32>
    %c1_64 = arith.constant 1 : index
    %c1_65 = arith.constant 1 : index
    %c0_66 = arith.constant 0 : index
    %c0_67 = arith.constant 0 : index
    %130 = vector.load %arg3[%c1_64, %c1_65, %c0_66, %c0_67] : memref<8x4x32x32xf32, #tpu.memory_space<vmem>>, vector<1x1x32x32xf32>
    %131 = vector.shape_cast %130 : vector<1x1x32x32xf32> to vector<32x32xf32>
    %cst_68 = arith.constant dense<0.000000e+00> : vector<8x32xf32>
    %132 = tpu.matmul %29, %131, %cst_68 {dimension_numbers = #tpu.dot_dimension_numbers<[1], [0], [0], [1], [0, 0, 1, 1], [], []>} : vector<8x32xf32>, vector<32x32xf32>, vector<8x32xf32> -> vector<8x32xf32>
    %c1_69 = arith.constant 1 : index
    %c1_70 = arith.constant 1 : index
    %c0_71 = arith.constant 0 : index
    %c0_72 = arith.constant 0 : index
    %133 = vector.load %arg4[%c1_69, %c1_70, %c0_71, %c0_72] : memref<8x4x1x32xf32, #tpu.memory_space<vmem>>, vector<1x1x1x32xf32>
    %134 = vector.shape_cast %133 : vector<1x1x1x32xf32> to vector<1x32xf32>
    %135 = vector.broadcast %134 : vector<1x32xf32> to vector<8x32xf32>
    %136 = arith.addf %132, %135 : vector<8x32xf32>
    %c1_73 = arith.constant 1 : index
    %c2_74 = arith.constant 2 : index
    %c0_75 = arith.constant 0 : index
    %c0_76 = arith.constant 0 : index
    %137 = vector.load %arg3[%c1_73, %c2_74, %c0_75, %c0_76] : memref<8x4x32x32xf32, #tpu.memory_space<vmem>>, vector<1x1x32x32xf32>
    %138 = vector.shape_cast %137 : vector<1x1x32x32xf32> to vector<32x32xf32>
    %cst_77 = arith.constant dense<0.000000e+00> : vector<8x32xf32>
    %139 = tpu.matmul %29, %138, %cst_77 {dimension_numbers = #tpu.dot_dimension_numbers<[1], [0], [0], [1], [0, 0, 1, 1], [], []>} : vector<8x32xf32>, vector<32x32xf32>, vector<8x32xf32> -> vector<8x32xf32>
    %c1_78 = arith.constant 1 : index
    %c2_79 = arith.constant 2 : index
    %c0_80 = arith.constant 0 : index
    %c0_81 = arith.constant 0 : index
    %140 = vector.load %arg4[%c1_78, %c2_79, %c0_80, %c0_81] : memref<8x4x1x32xf32, #tpu.memory_space<vmem>>, vector<1x1x1x32xf32>
    %141 = vector.shape_cast %140 : vector<1x1x1x32xf32> to vector<1x32xf32>
    %142 = vector.broadcast %141 : vector<1x32xf32> to vector<8x32xf32>
    %143 = arith.addf %139, %142 : vector<8x32xf32>
    %144 = vector.extract_strided_slice %129 {offsets = [0, 0], sizes = [8, 8], strides = [1, 1]} : vector<8x32xf32> to vector<8x8xf32>
    %145 = vector.extract_strided_slice %136 {offsets = [0, 0], sizes = [8, 8], strides = [1, 1]} : vector<8x32xf32> to vector<8x8xf32>
    %146 = vector.extract_strided_slice %143 {offsets = [0, 0], sizes = [8, 8], strides = [1, 1]} : vector<8x32xf32> to vector<8x8xf32>
    %cst_82 = arith.constant dense<0.000000e+00> : vector<8x8xf32>
    %147 = tpu.matmul %144, %145, %cst_82 {dimension_numbers = #tpu.dot_dimension_numbers<[1], [1], [0], [0], [0, 0, 1, 0], [], []>} : vector<8x8xf32>, vector<8x8xf32>, vector<8x8xf32> -> vector<8x8xf32>
    %148 = arith.addf %147, %8 : vector<8x8xf32>
    %cst_83 = arith.constant dense<0xFF800000> : vector<8xf32>
    %149 = vector.multi_reduction <maximumf>, %148, %cst_83 [1] : vector<8x8xf32> to vector<8xf32>
    %150 = vector.shape_cast %149 : vector<8xf32> to vector<8x1xf32>
    %151 = vector.broadcast %150 : vector<8x1xf32> to vector<8x8xf32>
    %152 = arith.subf %148, %151 : vector<8x8xf32>
    %153 = math.exp %152 : vector<8x8xf32>
    %cst_84 = arith.constant dense<0.000000e+00> : vector<8xf32>
    %154 = vector.multi_reduction <add>, %153, %cst_84 [1] : vector<8x8xf32> to vector<8xf32>
    %155 = vector.shape_cast %154 : vector<8xf32> to vector<8x1xf32>
    %156 = tpu.reciprocal %155 {approx = true} : vector<8x1xf32> -> vector<8x1xf32>
    %157 = vector.broadcast %156 : vector<8x1xf32> to vector<8x8xf32>
    %158 = arith.mulf %153, %157 : vector<8x8xf32>
    %cst_85 = arith.constant dense<0.000000e+00> : vector<8x8xf32>
    %159 = tpu.matmul %158, %146, %cst_85 {dimension_numbers = #tpu.dot_dimension_numbers<[1], [0], [0], [1], [0, 0, 1, 1], [], []>} : vector<8x8xf32>, vector<8x8xf32>, vector<8x8xf32> -> vector<8x8xf32>
    %160 = vector.extract_strided_slice %129 {offsets = [0, 8], sizes = [8, 8], strides = [1, 1]} : vector<8x32xf32> to vector<8x8xf32>
    %161 = vector.extract_strided_slice %136 {offsets = [0, 8], sizes = [8, 8], strides = [1, 1]} : vector<8x32xf32> to vector<8x8xf32>
    %162 = vector.extract_strided_slice %143 {offsets = [0, 8], sizes = [8, 8], strides = [1, 1]} : vector<8x32xf32> to vector<8x8xf32>
    %cst_86 = arith.constant dense<0.000000e+00> : vector<8x8xf32>
    %163 = tpu.matmul %160, %161, %cst_86 {dimension_numbers = #tpu.dot_dimension_numbers<[1], [1], [0], [0], [0, 0, 1, 0], [], []>} : vector<8x8xf32>, vector<8x8xf32>, vector<8x8xf32> -> vector<8x8xf32>
    %164 = arith.addf %163, %8 : vector<8x8xf32>
    %cst_87 = arith.constant dense<0xFF800000> : vector<8xf32>
    %165 = vector.multi_reduction <maximumf>, %164, %cst_87 [1] : vector<8x8xf32> to vector<8xf32>
    %166 = vector.shape_cast %165 : vector<8xf32> to vector<8x1xf32>
    %167 = vector.broadcast %166 : vector<8x1xf32> to vector<8x8xf32>
    %168 = arith.subf %164, %167 : vector<8x8xf32>
    %169 = math.exp %168 : vector<8x8xf32>
    %cst_88 = arith.constant dense<0.000000e+00> : vector<8xf32>
    %170 = vector.multi_reduction <add>, %169, %cst_88 [1] : vector<8x8xf32> to vector<8xf32>
    %171 = vector.shape_cast %170 : vector<8xf32> to vector<8x1xf32>
    %172 = tpu.reciprocal %171 {approx = true} : vector<8x1xf32> -> vector<8x1xf32>
    %173 = vector.broadcast %172 : vector<8x1xf32> to vector<8x8xf32>
    %174 = arith.mulf %169, %173 : vector<8x8xf32>
    %cst_89 = arith.constant dense<0.000000e+00> : vector<8x8xf32>
    %175 = tpu.matmul %174, %162, %cst_89 {dimension_numbers = #tpu.dot_dimension_numbers<[1], [0], [0], [1], [0, 0, 1, 1], [], []>} : vector<8x8xf32>, vector<8x8xf32>, vector<8x8xf32> -> vector<8x8xf32>
    %176 = vector.extract_strided_slice %129 {offsets = [0, 16], sizes = [8, 8], strides = [1, 1]} : vector<8x32xf32> to vector<8x8xf32>
    %177 = vector.extract_strided_slice %136 {offsets = [0, 16], sizes = [8, 8], strides = [1, 1]} : vector<8x32xf32> to vector<8x8xf32>
    %178 = vector.extract_strided_slice %143 {offsets = [0, 16], sizes = [8, 8], strides = [1, 1]} : vector<8x32xf32> to vector<8x8xf32>
    %cst_90 = arith.constant dense<0.000000e+00> : vector<8x8xf32>
    %179 = tpu.matmul %176, %177, %cst_90 {dimension_numbers = #tpu.dot_dimension_numbers<[1], [1], [0], [0], [0, 0, 1, 0], [], []>} : vector<8x8xf32>, vector<8x8xf32>, vector<8x8xf32> -> vector<8x8xf32>
    %180 = arith.addf %179, %8 : vector<8x8xf32>
    %cst_91 = arith.constant dense<0xFF800000> : vector<8xf32>
    %181 = vector.multi_reduction <maximumf>, %180, %cst_91 [1] : vector<8x8xf32> to vector<8xf32>
    %182 = vector.shape_cast %181 : vector<8xf32> to vector<8x1xf32>
    %183 = vector.broadcast %182 : vector<8x1xf32> to vector<8x8xf32>
    %184 = arith.subf %180, %183 : vector<8x8xf32>
    %185 = math.exp %184 : vector<8x8xf32>
    %cst_92 = arith.constant dense<0.000000e+00> : vector<8xf32>
    %186 = vector.multi_reduction <add>, %185, %cst_92 [1] : vector<8x8xf32> to vector<8xf32>
    %187 = vector.shape_cast %186 : vector<8xf32> to vector<8x1xf32>
    %188 = tpu.reciprocal %187 {approx = true} : vector<8x1xf32> -> vector<8x1xf32>
    %189 = vector.broadcast %188 : vector<8x1xf32> to vector<8x8xf32>
    %190 = arith.mulf %185, %189 : vector<8x8xf32>
    %cst_93 = arith.constant dense<0.000000e+00> : vector<8x8xf32>
    %191 = tpu.matmul %190, %178, %cst_93 {dimension_numbers = #tpu.dot_dimension_numbers<[1], [0], [0], [1], [0, 0, 1, 1], [], []>} : vector<8x8xf32>, vector<8x8xf32>, vector<8x8xf32> -> vector<8x8xf32>
    %192 = vector.extract_strided_slice %129 {offsets = [0, 24], sizes = [8, 8], strides = [1, 1]} : vector<8x32xf32> to vector<8x8xf32>
    %193 = vector.extract_strided_slice %136 {offsets = [0, 24], sizes = [8, 8], strides = [1, 1]} : vector<8x32xf32> to vector<8x8xf32>
    %194 = vector.extract_strided_slice %143 {offsets = [0, 24], sizes = [8, 8], strides = [1, 1]} : vector<8x32xf32> to vector<8x8xf32>
    %cst_94 = arith.constant dense<0.000000e+00> : vector<8x8xf32>
    %195 = tpu.matmul %192, %193, %cst_94 {dimension_numbers = #tpu.dot_dimension_numbers<[1], [1], [0], [0], [0, 0, 1, 0], [], []>} : vector<8x8xf32>, vector<8x8xf32>, vector<8x8xf32> -> vector<8x8xf32>
    %196 = arith.addf %195, %8 : vector<8x8xf32>
    %cst_95 = arith.constant dense<0xFF800000> : vector<8xf32>
    %197 = vector.multi_reduction <maximumf>, %196, %cst_95 [1] : vector<8x8xf32> to vector<8xf32>
    %198 = vector.shape_cast %197 : vector<8xf32> to vector<8x1xf32>
    %199 = vector.broadcast %198 : vector<8x1xf32> to vector<8x8xf32>
    %200 = arith.subf %196, %199 : vector<8x8xf32>
    %201 = math.exp %200 : vector<8x8xf32>
    %cst_96 = arith.constant dense<0.000000e+00> : vector<8xf32>
    %202 = vector.multi_reduction <add>, %201, %cst_96 [1] : vector<8x8xf32> to vector<8xf32>
    %203 = vector.shape_cast %202 : vector<8xf32> to vector<8x1xf32>
    %204 = tpu.reciprocal %203 {approx = true} : vector<8x1xf32> -> vector<8x1xf32>
    %205 = vector.broadcast %204 : vector<8x1xf32> to vector<8x8xf32>
    %206 = arith.mulf %201, %205 : vector<8x8xf32>
    %cst_97 = arith.constant dense<0.000000e+00> : vector<8x8xf32>
    %207 = tpu.matmul %206, %194, %cst_97 {dimension_numbers = #tpu.dot_dimension_numbers<[1], [0], [0], [1], [0, 0, 1, 1], [], []>} : vector<8x8xf32>, vector<8x8xf32>, vector<8x8xf32> -> vector<8x8xf32>
    %208 = tpu.concatenate %159, %175, %191, %207 in 1 : vector<8x8xf32>, vector<8x8xf32>, vector<8x8xf32>, vector<8x8xf32> -> vector<8x32xf32>
    %c1_98 = arith.constant 1 : index
    %c3_99 = arith.constant 3 : index
    %c0_100 = arith.constant 0 : index
    %c0_101 = arith.constant 0 : index
    %209 = vector.load %arg3[%c1_98, %c3_99, %c0_100, %c0_101] : memref<8x4x32x32xf32, #tpu.memory_space<vmem>>, vector<1x1x32x32xf32>
    %210 = vector.shape_cast %209 : vector<1x1x32x32xf32> to vector<32x32xf32>
    %cst_102 = arith.constant dense<0.000000e+00> : vector<8x32xf32>
    %211 = tpu.matmul %208, %210, %cst_102 {dimension_numbers = #tpu.dot_dimension_numbers<[1], [0], [0], [1], [0, 0, 1, 1], [], []>} : vector<8x32xf32>, vector<32x32xf32>, vector<8x32xf32> -> vector<8x32xf32>
    %c1_103 = arith.constant 1 : index
    %c3_104 = arith.constant 3 : index
    %c0_105 = arith.constant 0 : index
    %c0_106 = arith.constant 0 : index
    %212 = vector.load %arg4[%c1_103, %c3_104, %c0_105, %c0_106] : memref<8x4x1x32xf32, #tpu.memory_space<vmem>>, vector<1x1x1x32xf32>
    %213 = vector.shape_cast %212 : vector<1x1x1x32xf32> to vector<1x32xf32>
    %214 = vector.broadcast %213 : vector<1x32xf32> to vector<8x32xf32>
    %215 = arith.addf %211, %214 : vector<8x32xf32>
    %c2_107 = arith.constant 2 : index
    %c0_108 = arith.constant 0 : index
    %c0_109 = arith.constant 0 : index
    %c0_110 = arith.constant 0 : index
    %216 = vector.load %arg3[%c2_107, %c0_108, %c0_109, %c0_110] : memref<8x4x32x32xf32, #tpu.memory_space<vmem>>, vector<1x1x32x32xf32>
    %217 = vector.shape_cast %216 : vector<1x1x32x32xf32> to vector<32x32xf32>
    %cst_111 = arith.constant dense<0.000000e+00> : vector<8x32xf32>
    %218 = tpu.matmul %122, %217, %cst_111 {dimension_numbers = #tpu.dot_dimension_numbers<[1], [0], [0], [1], [0, 0, 1, 1], [], []>} : vector<8x32xf32>, vector<32x32xf32>, vector<8x32xf32> -> vector<8x32xf32>
    %c2_112 = arith.constant 2 : index
    %c0_113 = arith.constant 0 : index
    %c0_114 = arith.constant 0 : index
    %c0_115 = arith.constant 0 : index
    %219 = vector.load %arg4[%c2_112, %c0_113, %c0_114, %c0_115] : memref<8x4x1x32xf32, #tpu.memory_space<vmem>>, vector<1x1x1x32xf32>
    %220 = vector.shape_cast %219 : vector<1x1x1x32xf32> to vector<1x32xf32>
    %221 = vector.broadcast %220 : vector<1x32xf32> to vector<8x32xf32>
    %222 = arith.addf %218, %221 : vector<8x32xf32>
    %c2_116 = arith.constant 2 : index
    %c1_117 = arith.constant 1 : index
    %c0_118 = arith.constant 0 : index
    %c0_119 = arith.constant 0 : index
    %223 = vector.load %arg3[%c2_116, %c1_117, %c0_118, %c0_119] : memref<8x4x32x32xf32, #tpu.memory_space<vmem>>, vector<1x1x32x32xf32>
    %224 = vector.shape_cast %223 : vector<1x1x32x32xf32> to vector<32x32xf32>
    %cst_120 = arith.constant dense<0.000000e+00> : vector<8x32xf32>
    %225 = tpu.matmul %215, %224, %cst_120 {dimension_numbers = #tpu.dot_dimension_numbers<[1], [0], [0], [1], [0, 0, 1, 1], [], []>} : vector<8x32xf32>, vector<32x32xf32>, vector<8x32xf32> -> vector<8x32xf32>
    %c2_121 = arith.constant 2 : index
    %c1_122 = arith.constant 1 : index
    %c0_123 = arith.constant 0 : index
    %c0_124 = arith.constant 0 : index
    %226 = vector.load %arg4[%c2_121, %c1_122, %c0_123, %c0_124] : memref<8x4x1x32xf32, #tpu.memory_space<vmem>>, vector<1x1x1x32xf32>
    %227 = vector.shape_cast %226 : vector<1x1x1x32xf32> to vector<1x32xf32>
    %228 = vector.broadcast %227 : vector<1x32xf32> to vector<8x32xf32>
    %229 = arith.addf %225, %228 : vector<8x32xf32>
    %c2_125 = arith.constant 2 : index
    %c2_126 = arith.constant 2 : index
    %c0_127 = arith.constant 0 : index
    %c0_128 = arith.constant 0 : index
    %230 = vector.load %arg3[%c2_125, %c2_126, %c0_127, %c0_128] : memref<8x4x32x32xf32, #tpu.memory_space<vmem>>, vector<1x1x32x32xf32>
    %231 = vector.shape_cast %230 : vector<1x1x32x32xf32> to vector<32x32xf32>
    %cst_129 = arith.constant dense<0.000000e+00> : vector<8x32xf32>
    %232 = tpu.matmul %215, %231, %cst_129 {dimension_numbers = #tpu.dot_dimension_numbers<[1], [0], [0], [1], [0, 0, 1, 1], [], []>} : vector<8x32xf32>, vector<32x32xf32>, vector<8x32xf32> -> vector<8x32xf32>
    %c2_130 = arith.constant 2 : index
    %c2_131 = arith.constant 2 : index
    %c0_132 = arith.constant 0 : index
    %c0_133 = arith.constant 0 : index
    %233 = vector.load %arg4[%c2_130, %c2_131, %c0_132, %c0_133] : memref<8x4x1x32xf32, #tpu.memory_space<vmem>>, vector<1x1x1x32xf32>
    %234 = vector.shape_cast %233 : vector<1x1x1x32xf32> to vector<1x32xf32>
    %235 = vector.broadcast %234 : vector<1x32xf32> to vector<8x32xf32>
    %236 = arith.addf %232, %235 : vector<8x32xf32>
    %237 = vector.extract_strided_slice %222 {offsets = [0, 0], sizes = [8, 8], strides = [1, 1]} : vector<8x32xf32> to vector<8x8xf32>
    %238 = vector.extract_strided_slice %229 {offsets = [0, 0], sizes = [8, 8], strides = [1, 1]} : vector<8x32xf32> to vector<8x8xf32>
    %239 = vector.extract_strided_slice %236 {offsets = [0, 0], sizes = [8, 8], strides = [1, 1]} : vector<8x32xf32> to vector<8x8xf32>
    %cst_134 = arith.constant dense<0.000000e+00> : vector<8x8xf32>
    %240 = tpu.matmul %237, %238, %cst_134 {dimension_numbers = #tpu.dot_dimension_numbers<[1], [1], [0], [0], [0, 0, 1, 0], [], []>} : vector<8x8xf32>, vector<8x8xf32>, vector<8x8xf32> -> vector<8x8xf32>
    %241 = arith.addf %240, %8 : vector<8x8xf32>
    %cst_135 = arith.constant dense<0xFF800000> : vector<8xf32>
    %242 = vector.multi_reduction <maximumf>, %241, %cst_135 [1] : vector<8x8xf32> to vector<8xf32>
    %243 = vector.shape_cast %242 : vector<8xf32> to vector<8x1xf32>
    %244 = vector.broadcast %243 : vector<8x1xf32> to vector<8x8xf32>
    %245 = arith.subf %241, %244 : vector<8x8xf32>
    %246 = math.exp %245 : vector<8x8xf32>
    %cst_136 = arith.constant dense<0.000000e+00> : vector<8xf32>
    %247 = vector.multi_reduction <add>, %246, %cst_136 [1] : vector<8x8xf32> to vector<8xf32>
    %248 = vector.shape_cast %247 : vector<8xf32> to vector<8x1xf32>
    %249 = tpu.reciprocal %248 {approx = true} : vector<8x1xf32> -> vector<8x1xf32>
    %250 = vector.broadcast %249 : vector<8x1xf32> to vector<8x8xf32>
    %251 = arith.mulf %246, %250 : vector<8x8xf32>
    %cst_137 = arith.constant dense<0.000000e+00> : vector<8x8xf32>
    %252 = tpu.matmul %251, %239, %cst_137 {dimension_numbers = #tpu.dot_dimension_numbers<[1], [0], [0], [1], [0, 0, 1, 1], [], []>} : vector<8x8xf32>, vector<8x8xf32>, vector<8x8xf32> -> vector<8x8xf32>
    %253 = vector.extract_strided_slice %222 {offsets = [0, 8], sizes = [8, 8], strides = [1, 1]} : vector<8x32xf32> to vector<8x8xf32>
    %254 = vector.extract_strided_slice %229 {offsets = [0, 8], sizes = [8, 8], strides = [1, 1]} : vector<8x32xf32> to vector<8x8xf32>
    %255 = vector.extract_strided_slice %236 {offsets = [0, 8], sizes = [8, 8], strides = [1, 1]} : vector<8x32xf32> to vector<8x8xf32>
    %cst_138 = arith.constant dense<0.000000e+00> : vector<8x8xf32>
    %256 = tpu.matmul %253, %254, %cst_138 {dimension_numbers = #tpu.dot_dimension_numbers<[1], [1], [0], [0], [0, 0, 1, 0], [], []>} : vector<8x8xf32>, vector<8x8xf32>, vector<8x8xf32> -> vector<8x8xf32>
    %257 = arith.addf %256, %8 : vector<8x8xf32>
    %cst_139 = arith.constant dense<0xFF800000> : vector<8xf32>
    %258 = vector.multi_reduction <maximumf>, %257, %cst_139 [1] : vector<8x8xf32> to vector<8xf32>
    %259 = vector.shape_cast %258 : vector<8xf32> to vector<8x1xf32>
    %260 = vector.broadcast %259 : vector<8x1xf32> to vector<8x8xf32>
    %261 = arith.subf %257, %260 : vector<8x8xf32>
    %262 = math.exp %261 : vector<8x8xf32>
    %cst_140 = arith.constant dense<0.000000e+00> : vector<8xf32>
    %263 = vector.multi_reduction <add>, %262, %cst_140 [1] : vector<8x8xf32> to vector<8xf32>
    %264 = vector.shape_cast %263 : vector<8xf32> to vector<8x1xf32>
    %265 = tpu.reciprocal %264 {approx = true} : vector<8x1xf32> -> vector<8x1xf32>
    %266 = vector.broadcast %265 : vector<8x1xf32> to vector<8x8xf32>
    %267 = arith.mulf %262, %266 : vector<8x8xf32>
    %cst_141 = arith.constant dense<0.000000e+00> : vector<8x8xf32>
    %268 = tpu.matmul %267, %255, %cst_141 {dimension_numbers = #tpu.dot_dimension_numbers<[1], [0], [0], [1], [0, 0, 1, 1], [], []>} : vector<8x8xf32>, vector<8x8xf32>, vector<8x8xf32> -> vector<8x8xf32>
    %269 = vector.extract_strided_slice %222 {offsets = [0, 16], sizes = [8, 8], strides = [1, 1]} : vector<8x32xf32> to vector<8x8xf32>
    %270 = vector.extract_strided_slice %229 {offsets = [0, 16], sizes = [8, 8], strides = [1, 1]} : vector<8x32xf32> to vector<8x8xf32>
    %271 = vector.extract_strided_slice %236 {offsets = [0, 16], sizes = [8, 8], strides = [1, 1]} : vector<8x32xf32> to vector<8x8xf32>
    %cst_142 = arith.constant dense<0.000000e+00> : vector<8x8xf32>
    %272 = tpu.matmul %269, %270, %cst_142 {dimension_numbers = #tpu.dot_dimension_numbers<[1], [1], [0], [0], [0, 0, 1, 0], [], []>} : vector<8x8xf32>, vector<8x8xf32>, vector<8x8xf32> -> vector<8x8xf32>
    %273 = arith.addf %272, %8 : vector<8x8xf32>
    %cst_143 = arith.constant dense<0xFF800000> : vector<8xf32>
    %274 = vector.multi_reduction <maximumf>, %273, %cst_143 [1] : vector<8x8xf32> to vector<8xf32>
    %275 = vector.shape_cast %274 : vector<8xf32> to vector<8x1xf32>
    %276 = vector.broadcast %275 : vector<8x1xf32> to vector<8x8xf32>
    %277 = arith.subf %273, %276 : vector<8x8xf32>
    %278 = math.exp %277 : vector<8x8xf32>
    %cst_144 = arith.constant dense<0.000000e+00> : vector<8xf32>
    %279 = vector.multi_reduction <add>, %278, %cst_144 [1] : vector<8x8xf32> to vector<8xf32>
    %280 = vector.shape_cast %279 : vector<8xf32> to vector<8x1xf32>
    %281 = tpu.reciprocal %280 {approx = true} : vector<8x1xf32> -> vector<8x1xf32>
    %282 = vector.broadcast %281 : vector<8x1xf32> to vector<8x8xf32>
    %283 = arith.mulf %278, %282 : vector<8x8xf32>
    %cst_145 = arith.constant dense<0.000000e+00> : vector<8x8xf32>
    %284 = tpu.matmul %283, %271, %cst_145 {dimension_numbers = #tpu.dot_dimension_numbers<[1], [0], [0], [1], [0, 0, 1, 1], [], []>} : vector<8x8xf32>, vector<8x8xf32>, vector<8x8xf32> -> vector<8x8xf32>
    %285 = vector.extract_strided_slice %222 {offsets = [0, 24], sizes = [8, 8], strides = [1, 1]} : vector<8x32xf32> to vector<8x8xf32>
    %286 = vector.extract_strided_slice %229 {offsets = [0, 24], sizes = [8, 8], strides = [1, 1]} : vector<8x32xf32> to vector<8x8xf32>
    %287 = vector.extract_strided_slice %236 {offsets = [0, 24], sizes = [8, 8], strides = [1, 1]} : vector<8x32xf32> to vector<8x8xf32>
    %cst_146 = arith.constant dense<0.000000e+00> : vector<8x8xf32>
    %288 = tpu.matmul %285, %286, %cst_146 {dimension_numbers = #tpu.dot_dimension_numbers<[1], [1], [0], [0], [0, 0, 1, 0], [], []>} : vector<8x8xf32>, vector<8x8xf32>, vector<8x8xf32> -> vector<8x8xf32>
    %289 = arith.addf %288, %8 : vector<8x8xf32>
    %cst_147 = arith.constant dense<0xFF800000> : vector<8xf32>
    %290 = vector.multi_reduction <maximumf>, %289, %cst_147 [1] : vector<8x8xf32> to vector<8xf32>
    %291 = vector.shape_cast %290 : vector<8xf32> to vector<8x1xf32>
    %292 = vector.broadcast %291 : vector<8x1xf32> to vector<8x8xf32>
    %293 = arith.subf %289, %292 : vector<8x8xf32>
    %294 = math.exp %293 : vector<8x8xf32>
    %cst_148 = arith.constant dense<0.000000e+00> : vector<8xf32>
    %295 = vector.multi_reduction <add>, %294, %cst_148 [1] : vector<8x8xf32> to vector<8xf32>
    %296 = vector.shape_cast %295 : vector<8xf32> to vector<8x1xf32>
    %297 = tpu.reciprocal %296 {approx = true} : vector<8x1xf32> -> vector<8x1xf32>
    %298 = vector.broadcast %297 : vector<8x1xf32> to vector<8x8xf32>
    %299 = arith.mulf %294, %298 : vector<8x8xf32>
    %cst_149 = arith.constant dense<0.000000e+00> : vector<8x8xf32>
    %300 = tpu.matmul %299, %287, %cst_149 {dimension_numbers = #tpu.dot_dimension_numbers<[1], [0], [0], [1], [0, 0, 1, 1], [], []>} : vector<8x8xf32>, vector<8x8xf32>, vector<8x8xf32> -> vector<8x8xf32>
    %301 = tpu.concatenate %252, %268, %284, %300 in 1 : vector<8x8xf32>, vector<8x8xf32>, vector<8x8xf32>, vector<8x8xf32> -> vector<8x32xf32>
    %c2_150 = arith.constant 2 : index
    %c3_151 = arith.constant 3 : index
    %c0_152 = arith.constant 0 : index
    %c0_153 = arith.constant 0 : index
    %302 = vector.load %arg3[%c2_150, %c3_151, %c0_152, %c0_153] : memref<8x4x32x32xf32, #tpu.memory_space<vmem>>, vector<1x1x32x32xf32>
    %303 = vector.shape_cast %302 : vector<1x1x32x32xf32> to vector<32x32xf32>
    %cst_154 = arith.constant dense<0.000000e+00> : vector<8x32xf32>
    %304 = tpu.matmul %301, %303, %cst_154 {dimension_numbers = #tpu.dot_dimension_numbers<[1], [0], [0], [1], [0, 0, 1, 1], [], []>} : vector<8x32xf32>, vector<32x32xf32>, vector<8x32xf32> -> vector<8x32xf32>
    %c2_155 = arith.constant 2 : index
    %c3_156 = arith.constant 3 : index
    %c0_157 = arith.constant 0 : index
    %c0_158 = arith.constant 0 : index
    %305 = vector.load %arg4[%c2_155, %c3_156, %c0_157, %c0_158] : memref<8x4x1x32xf32, #tpu.memory_space<vmem>>, vector<1x1x1x32xf32>
    %306 = vector.shape_cast %305 : vector<1x1x1x32xf32> to vector<1x32xf32>
    %307 = vector.broadcast %306 : vector<1x32xf32> to vector<8x32xf32>
    %308 = arith.addf %304, %307 : vector<8x32xf32>
    %c3_159 = arith.constant 3 : index
    %c0_160 = arith.constant 0 : index
    %c0_161 = arith.constant 0 : index
    %c0_162 = arith.constant 0 : index
    %309 = vector.load %arg3[%c3_159, %c0_160, %c0_161, %c0_162] : memref<8x4x32x32xf32, #tpu.memory_space<vmem>>, vector<1x1x32x32xf32>
    %310 = vector.shape_cast %309 : vector<1x1x32x32xf32> to vector<32x32xf32>
    %cst_163 = arith.constant dense<0.000000e+00> : vector<8x32xf32>
    %311 = tpu.matmul %215, %310, %cst_163 {dimension_numbers = #tpu.dot_dimension_numbers<[1], [0], [0], [1], [0, 0, 1, 1], [], []>} : vector<8x32xf32>, vector<32x32xf32>, vector<8x32xf32> -> vector<8x32xf32>
    %c3_164 = arith.constant 3 : index
    %c0_165 = arith.constant 0 : index
    %c0_166 = arith.constant 0 : index
    %c0_167 = arith.constant 0 : index
    %312 = vector.load %arg4[%c3_164, %c0_165, %c0_166, %c0_167] : memref<8x4x1x32xf32, #tpu.memory_space<vmem>>, vector<1x1x1x32xf32>
    %313 = vector.shape_cast %312 : vector<1x1x1x32xf32> to vector<1x32xf32>
    %314 = vector.broadcast %313 : vector<1x32xf32> to vector<8x32xf32>
    %315 = arith.addf %311, %314 : vector<8x32xf32>
    %c3_168 = arith.constant 3 : index
    %c1_169 = arith.constant 1 : index
    %c0_170 = arith.constant 0 : index
    %c0_171 = arith.constant 0 : index
    %316 = vector.load %arg3[%c3_168, %c1_169, %c0_170, %c0_171] : memref<8x4x32x32xf32, #tpu.memory_space<vmem>>, vector<1x1x32x32xf32>
    %317 = vector.shape_cast %316 : vector<1x1x32x32xf32> to vector<32x32xf32>
    %cst_172 = arith.constant dense<0.000000e+00> : vector<8x32xf32>
    %318 = tpu.matmul %122, %317, %cst_172 {dimension_numbers = #tpu.dot_dimension_numbers<[1], [0], [0], [1], [0, 0, 1, 1], [], []>} : vector<8x32xf32>, vector<32x32xf32>, vector<8x32xf32> -> vector<8x32xf32>
    %c3_173 = arith.constant 3 : index
    %c1_174 = arith.constant 1 : index
    %c0_175 = arith.constant 0 : index
    %c0_176 = arith.constant 0 : index
    %319 = vector.load %arg4[%c3_173, %c1_174, %c0_175, %c0_176] : memref<8x4x1x32xf32, #tpu.memory_space<vmem>>, vector<1x1x1x32xf32>
    %320 = vector.shape_cast %319 : vector<1x1x1x32xf32> to vector<1x32xf32>
    %321 = vector.broadcast %320 : vector<1x32xf32> to vector<8x32xf32>
    %322 = arith.addf %318, %321 : vector<8x32xf32>
    %c3_177 = arith.constant 3 : index
    %c2_178 = arith.constant 2 : index
    %c0_179 = arith.constant 0 : index
    %c0_180 = arith.constant 0 : index
    %323 = vector.load %arg3[%c3_177, %c2_178, %c0_179, %c0_180] : memref<8x4x32x32xf32, #tpu.memory_space<vmem>>, vector<1x1x32x32xf32>
    %324 = vector.shape_cast %323 : vector<1x1x32x32xf32> to vector<32x32xf32>
    %cst_181 = arith.constant dense<0.000000e+00> : vector<8x32xf32>
    %325 = tpu.matmul %122, %324, %cst_181 {dimension_numbers = #tpu.dot_dimension_numbers<[1], [0], [0], [1], [0, 0, 1, 1], [], []>} : vector<8x32xf32>, vector<32x32xf32>, vector<8x32xf32> -> vector<8x32xf32>
    %c3_182 = arith.constant 3 : index
    %c2_183 = arith.constant 2 : index
    %c0_184 = arith.constant 0 : index
    %c0_185 = arith.constant 0 : index
    %326 = vector.load %arg4[%c3_182, %c2_183, %c0_184, %c0_185] : memref<8x4x1x32xf32, #tpu.memory_space<vmem>>, vector<1x1x1x32xf32>
    %327 = vector.shape_cast %326 : vector<1x1x1x32xf32> to vector<1x32xf32>
    %328 = vector.broadcast %327 : vector<1x32xf32> to vector<8x32xf32>
    %329 = arith.addf %325, %328 : vector<8x32xf32>
    %330 = vector.extract_strided_slice %315 {offsets = [0, 0], sizes = [8, 8], strides = [1, 1]} : vector<8x32xf32> to vector<8x8xf32>
    %331 = vector.extract_strided_slice %322 {offsets = [0, 0], sizes = [8, 8], strides = [1, 1]} : vector<8x32xf32> to vector<8x8xf32>
    %332 = vector.extract_strided_slice %329 {offsets = [0, 0], sizes = [8, 8], strides = [1, 1]} : vector<8x32xf32> to vector<8x8xf32>
    %cst_186 = arith.constant dense<0.000000e+00> : vector<8x8xf32>
    %333 = tpu.matmul %330, %331, %cst_186 {dimension_numbers = #tpu.dot_dimension_numbers<[1], [1], [0], [0], [0, 0, 1, 0], [], []>} : vector<8x8xf32>, vector<8x8xf32>, vector<8x8xf32> -> vector<8x8xf32>
    %334 = arith.addf %333, %8 : vector<8x8xf32>
    %cst_187 = arith.constant dense<0xFF800000> : vector<8xf32>
    %335 = vector.multi_reduction <maximumf>, %334, %cst_187 [1] : vector<8x8xf32> to vector<8xf32>
    %336 = vector.shape_cast %335 : vector<8xf32> to vector<8x1xf32>
    %337 = vector.broadcast %336 : vector<8x1xf32> to vector<8x8xf32>
    %338 = arith.subf %334, %337 : vector<8x8xf32>
    %339 = math.exp %338 : vector<8x8xf32>
    %cst_188 = arith.constant dense<0.000000e+00> : vector<8xf32>
    %340 = vector.multi_reduction <add>, %339, %cst_188 [1] : vector<8x8xf32> to vector<8xf32>
    %341 = vector.shape_cast %340 : vector<8xf32> to vector<8x1xf32>
    %342 = tpu.reciprocal %341 {approx = true} : vector<8x1xf32> -> vector<8x1xf32>
    %343 = vector.broadcast %342 : vector<8x1xf32> to vector<8x8xf32>
    %344 = arith.mulf %339, %343 : vector<8x8xf32>
    %cst_189 = arith.constant dense<0.000000e+00> : vector<8x8xf32>
    %345 = tpu.matmul %344, %332, %cst_189 {dimension_numbers = #tpu.dot_dimension_numbers<[1], [0], [0], [1], [0, 0, 1, 1], [], []>} : vector<8x8xf32>, vector<8x8xf32>, vector<8x8xf32> -> vector<8x8xf32>
    %346 = vector.extract_strided_slice %315 {offsets = [0, 8], sizes = [8, 8], strides = [1, 1]} : vector<8x32xf32> to vector<8x8xf32>
    %347 = vector.extract_strided_slice %322 {offsets = [0, 8], sizes = [8, 8], strides = [1, 1]} : vector<8x32xf32> to vector<8x8xf32>
    %348 = vector.extract_strided_slice %329 {offsets = [0, 8], sizes = [8, 8], strides = [1, 1]} : vector<8x32xf32> to vector<8x8xf32>
    %cst_190 = arith.constant dense<0.000000e+00> : vector<8x8xf32>
    %349 = tpu.matmul %346, %347, %cst_190 {dimension_numbers = #tpu.dot_dimension_numbers<[1], [1], [0], [0], [0, 0, 1, 0], [], []>} : vector<8x8xf32>, vector<8x8xf32>, vector<8x8xf32> -> vector<8x8xf32>
    %350 = arith.addf %349, %8 : vector<8x8xf32>
    %cst_191 = arith.constant dense<0xFF800000> : vector<8xf32>
    %351 = vector.multi_reduction <maximumf>, %350, %cst_191 [1] : vector<8x8xf32> to vector<8xf32>
    %352 = vector.shape_cast %351 : vector<8xf32> to vector<8x1xf32>
    %353 = vector.broadcast %352 : vector<8x1xf32> to vector<8x8xf32>
    %354 = arith.subf %350, %353 : vector<8x8xf32>
    %355 = math.exp %354 : vector<8x8xf32>
    %cst_192 = arith.constant dense<0.000000e+00> : vector<8xf32>
    %356 = vector.multi_reduction <add>, %355, %cst_192 [1] : vector<8x8xf32> to vector<8xf32>
    %357 = vector.shape_cast %356 : vector<8xf32> to vector<8x1xf32>
    %358 = tpu.reciprocal %357 {approx = true} : vector<8x1xf32> -> vector<8x1xf32>
    %359 = vector.broadcast %358 : vector<8x1xf32> to vector<8x8xf32>
    %360 = arith.mulf %355, %359 : vector<8x8xf32>
    %cst_193 = arith.constant dense<0.000000e+00> : vector<8x8xf32>
    %361 = tpu.matmul %360, %348, %cst_193 {dimension_numbers = #tpu.dot_dimension_numbers<[1], [0], [0], [1], [0, 0, 1, 1], [], []>} : vector<8x8xf32>, vector<8x8xf32>, vector<8x8xf32> -> vector<8x8xf32>
    %362 = vector.extract_strided_slice %315 {offsets = [0, 16], sizes = [8, 8], strides = [1, 1]} : vector<8x32xf32> to vector<8x8xf32>
    %363 = vector.extract_strided_slice %322 {offsets = [0, 16], sizes = [8, 8], strides = [1, 1]} : vector<8x32xf32> to vector<8x8xf32>
    %364 = vector.extract_strided_slice %329 {offsets = [0, 16], sizes = [8, 8], strides = [1, 1]} : vector<8x32xf32> to vector<8x8xf32>
    %cst_194 = arith.constant dense<0.000000e+00> : vector<8x8xf32>
    %365 = tpu.matmul %362, %363, %cst_194 {dimension_numbers = #tpu.dot_dimension_numbers<[1], [1], [0], [0], [0, 0, 1, 0], [], []>} : vector<8x8xf32>, vector<8x8xf32>, vector<8x8xf32> -> vector<8x8xf32>
    %366 = arith.addf %365, %8 : vector<8x8xf32>
    %cst_195 = arith.constant dense<0xFF800000> : vector<8xf32>
    %367 = vector.multi_reduction <maximumf>, %366, %cst_195 [1] : vector<8x8xf32> to vector<8xf32>
    %368 = vector.shape_cast %367 : vector<8xf32> to vector<8x1xf32>
    %369 = vector.broadcast %368 : vector<8x1xf32> to vector<8x8xf32>
    %370 = arith.subf %366, %369 : vector<8x8xf32>
    %371 = math.exp %370 : vector<8x8xf32>
    %cst_196 = arith.constant dense<0.000000e+00> : vector<8xf32>
    %372 = vector.multi_reduction <add>, %371, %cst_196 [1] : vector<8x8xf32> to vector<8xf32>
    %373 = vector.shape_cast %372 : vector<8xf32> to vector<8x1xf32>
    %374 = tpu.reciprocal %373 {approx = true} : vector<8x1xf32> -> vector<8x1xf32>
    %375 = vector.broadcast %374 : vector<8x1xf32> to vector<8x8xf32>
    %376 = arith.mulf %371, %375 : vector<8x8xf32>
    %cst_197 = arith.constant dense<0.000000e+00> : vector<8x8xf32>
    %377 = tpu.matmul %376, %364, %cst_197 {dimension_numbers = #tpu.dot_dimension_numbers<[1], [0], [0], [1], [0, 0, 1, 1], [], []>} : vector<8x8xf32>, vector<8x8xf32>, vector<8x8xf32> -> vector<8x8xf32>
    %378 = vector.extract_strided_slice %315 {offsets = [0, 24], sizes = [8, 8], strides = [1, 1]} : vector<8x32xf32> to vector<8x8xf32>
    %379 = vector.extract_strided_slice %322 {offsets = [0, 24], sizes = [8, 8], strides = [1, 1]} : vector<8x32xf32> to vector<8x8xf32>
    %380 = vector.extract_strided_slice %329 {offsets = [0, 24], sizes = [8, 8], strides = [1, 1]} : vector<8x32xf32> to vector<8x8xf32>
    %cst_198 = arith.constant dense<0.000000e+00> : vector<8x8xf32>
    %381 = tpu.matmul %378, %379, %cst_198 {dimension_numbers = #tpu.dot_dimension_numbers<[1], [1], [0], [0], [0, 0, 1, 0], [], []>} : vector<8x8xf32>, vector<8x8xf32>, vector<8x8xf32> -> vector<8x8xf32>
    %382 = arith.addf %381, %8 : vector<8x8xf32>
    %cst_199 = arith.constant dense<0xFF800000> : vector<8xf32>
    %383 = vector.multi_reduction <maximumf>, %382, %cst_199 [1] : vector<8x8xf32> to vector<8xf32>
    %384 = vector.shape_cast %383 : vector<8xf32> to vector<8x1xf32>
    %385 = vector.broadcast %384 : vector<8x1xf32> to vector<8x8xf32>
    %386 = arith.subf %382, %385 : vector<8x8xf32>
    %387 = math.exp %386 : vector<8x8xf32>
    %cst_200 = arith.constant dense<0.000000e+00> : vector<8xf32>
    %388 = vector.multi_reduction <add>, %387, %cst_200 [1] : vector<8x8xf32> to vector<8xf32>
    %389 = vector.shape_cast %388 : vector<8xf32> to vector<8x1xf32>
    %390 = tpu.reciprocal %389 {approx = true} : vector<8x1xf32> -> vector<8x1xf32>
    %391 = vector.broadcast %390 : vector<8x1xf32> to vector<8x8xf32>
    %392 = arith.mulf %387, %391 : vector<8x8xf32>
    %cst_201 = arith.constant dense<0.000000e+00> : vector<8x8xf32>
    %393 = tpu.matmul %392, %380, %cst_201 {dimension_numbers = #tpu.dot_dimension_numbers<[1], [0], [0], [1], [0, 0, 1, 1], [], []>} : vector<8x8xf32>, vector<8x8xf32>, vector<8x8xf32> -> vector<8x8xf32>
    %394 = tpu.concatenate %345, %361, %377, %393 in 1 : vector<8x8xf32>, vector<8x8xf32>, vector<8x8xf32>, vector<8x8xf32> -> vector<8x32xf32>
    %c3_202 = arith.constant 3 : index
    %c3_203 = arith.constant 3 : index
    %c0_204 = arith.constant 0 : index
    %c0_205 = arith.constant 0 : index
    %395 = vector.load %arg3[%c3_202, %c3_203, %c0_204, %c0_205] : memref<8x4x32x32xf32, #tpu.memory_space<vmem>>, vector<1x1x32x32xf32>
    %396 = vector.shape_cast %395 : vector<1x1x32x32xf32> to vector<32x32xf32>
    %cst_206 = arith.constant dense<0.000000e+00> : vector<8x32xf32>
    %397 = tpu.matmul %394, %396, %cst_206 {dimension_numbers = #tpu.dot_dimension_numbers<[1], [0], [0], [1], [0, 0, 1, 1], [], []>} : vector<8x32xf32>, vector<32x32xf32>, vector<8x32xf32> -> vector<8x32xf32>
    %c3_207 = arith.constant 3 : index
    %c3_208 = arith.constant 3 : index
    %c0_209 = arith.constant 0 : index
    %c0_210 = arith.constant 0 : index
    %398 = vector.load %arg4[%c3_207, %c3_208, %c0_209, %c0_210] : memref<8x4x1x32xf32, #tpu.memory_space<vmem>>, vector<1x1x1x32xf32>
    %399 = vector.shape_cast %398 : vector<1x1x1x32xf32> to vector<1x32xf32>
    %400 = vector.broadcast %399 : vector<1x32xf32> to vector<8x32xf32>
    %401 = arith.addf %397, %400 : vector<8x32xf32>
    %cst_211 = arith.constant dense<0.000000e+00> : vector<8x32xf32>
    %402 = tpu.matmul %308, %18, %cst_211 {dimension_numbers = #tpu.dot_dimension_numbers<[1], [0], [0], [1], [0, 0, 1, 1], [], []>} : vector<8x32xf32>, vector<32x32xf32>, vector<8x32xf32> -> vector<8x32xf32>
    %c4 = arith.constant 4 : index
    %c0_212 = arith.constant 0 : index
    %c0_213 = arith.constant 0 : index
    %c0_214 = arith.constant 0 : index
    %403 = vector.load %arg3[%c4, %c0_212, %c0_213, %c0_214] : memref<8x4x32x32xf32, #tpu.memory_space<vmem>>, vector<1x1x32x32xf32>
    %404 = vector.shape_cast %403 : vector<1x1x32x32xf32> to vector<32x32xf32>
    %cst_215 = arith.constant dense<0.000000e+00> : vector<8x32xf32>
    %405 = tpu.matmul %402, %404, %cst_215 {dimension_numbers = #tpu.dot_dimension_numbers<[1], [0], [0], [1], [0, 0, 1, 1], [], []>} : vector<8x32xf32>, vector<32x32xf32>, vector<8x32xf32> -> vector<8x32xf32>
    %c4_216 = arith.constant 4 : index
    %c0_217 = arith.constant 0 : index
    %c0_218 = arith.constant 0 : index
    %c0_219 = arith.constant 0 : index
    %406 = vector.load %arg4[%c4_216, %c0_217, %c0_218, %c0_219] : memref<8x4x1x32xf32, #tpu.memory_space<vmem>>, vector<1x1x1x32xf32>
    %407 = vector.shape_cast %406 : vector<1x1x1x32xf32> to vector<1x32xf32>
    %408 = vector.broadcast %407 : vector<1x32xf32> to vector<8x32xf32>
    %409 = arith.addf %405, %408 : vector<8x32xf32>
    %c4_220 = arith.constant 4 : index
    %c1_221 = arith.constant 1 : index
    %c0_222 = arith.constant 0 : index
    %c0_223 = arith.constant 0 : index
    %410 = vector.load %arg3[%c4_220, %c1_221, %c0_222, %c0_223] : memref<8x4x32x32xf32, #tpu.memory_space<vmem>>, vector<1x1x32x32xf32>
    %411 = vector.shape_cast %410 : vector<1x1x32x32xf32> to vector<32x32xf32>
    %cst_224 = arith.constant dense<0.000000e+00> : vector<8x32xf32>
    %412 = tpu.matmul %402, %411, %cst_224 {dimension_numbers = #tpu.dot_dimension_numbers<[1], [0], [0], [1], [0, 0, 1, 1], [], []>} : vector<8x32xf32>, vector<32x32xf32>, vector<8x32xf32> -> vector<8x32xf32>
    %c4_225 = arith.constant 4 : index
    %c1_226 = arith.constant 1 : index
    %c0_227 = arith.constant 0 : index
    %c0_228 = arith.constant 0 : index
    %413 = vector.load %arg4[%c4_225, %c1_226, %c0_227, %c0_228] : memref<8x4x1x32xf32, #tpu.memory_space<vmem>>, vector<1x1x1x32xf32>
    %414 = vector.shape_cast %413 : vector<1x1x1x32xf32> to vector<1x32xf32>
    %415 = vector.broadcast %414 : vector<1x32xf32> to vector<8x32xf32>
    %416 = arith.addf %412, %415 : vector<8x32xf32>
    %c4_229 = arith.constant 4 : index
    %c2_230 = arith.constant 2 : index
    %c0_231 = arith.constant 0 : index
    %c0_232 = arith.constant 0 : index
    %417 = vector.load %arg3[%c4_229, %c2_230, %c0_231, %c0_232] : memref<8x4x32x32xf32, #tpu.memory_space<vmem>>, vector<1x1x32x32xf32>
    %418 = vector.shape_cast %417 : vector<1x1x32x32xf32> to vector<32x32xf32>
    %cst_233 = arith.constant dense<0.000000e+00> : vector<8x32xf32>
    %419 = tpu.matmul %402, %418, %cst_233 {dimension_numbers = #tpu.dot_dimension_numbers<[1], [0], [0], [1], [0, 0, 1, 1], [], []>} : vector<8x32xf32>, vector<32x32xf32>, vector<8x32xf32> -> vector<8x32xf32>
    %c4_234 = arith.constant 4 : index
    %c2_235 = arith.constant 2 : index
    %c0_236 = arith.constant 0 : index
    %c0_237 = arith.constant 0 : index
    %420 = vector.load %arg4[%c4_234, %c2_235, %c0_236, %c0_237] : memref<8x4x1x32xf32, #tpu.memory_space<vmem>>, vector<1x1x1x32xf32>
    %421 = vector.shape_cast %420 : vector<1x1x1x32xf32> to vector<1x32xf32>
    %422 = vector.broadcast %421 : vector<1x32xf32> to vector<8x32xf32>
    %423 = arith.addf %419, %422 : vector<8x32xf32>
    %424 = vector.extract_strided_slice %409 {offsets = [0, 0], sizes = [8, 8], strides = [1, 1]} : vector<8x32xf32> to vector<8x8xf32>
    %425 = vector.extract_strided_slice %416 {offsets = [0, 0], sizes = [8, 8], strides = [1, 1]} : vector<8x32xf32> to vector<8x8xf32>
    %426 = vector.extract_strided_slice %423 {offsets = [0, 0], sizes = [8, 8], strides = [1, 1]} : vector<8x32xf32> to vector<8x8xf32>
    %cst_238 = arith.constant dense<0.000000e+00> : vector<8x8xf32>
    %427 = tpu.matmul %424, %425, %cst_238 {dimension_numbers = #tpu.dot_dimension_numbers<[1], [1], [0], [0], [0, 0, 1, 0], [], []>} : vector<8x8xf32>, vector<8x8xf32>, vector<8x8xf32> -> vector<8x8xf32>
    %428 = arith.addf %427, %8 : vector<8x8xf32>
    %cst_239 = arith.constant dense<0xFF800000> : vector<8xf32>
    %429 = vector.multi_reduction <maximumf>, %428, %cst_239 [1] : vector<8x8xf32> to vector<8xf32>
    %430 = vector.shape_cast %429 : vector<8xf32> to vector<8x1xf32>
    %431 = vector.broadcast %430 : vector<8x1xf32> to vector<8x8xf32>
    %432 = arith.subf %428, %431 : vector<8x8xf32>
    %433 = math.exp %432 : vector<8x8xf32>
    %cst_240 = arith.constant dense<0.000000e+00> : vector<8xf32>
    %434 = vector.multi_reduction <add>, %433, %cst_240 [1] : vector<8x8xf32> to vector<8xf32>
    %435 = vector.shape_cast %434 : vector<8xf32> to vector<8x1xf32>
    %436 = tpu.reciprocal %435 {approx = true} : vector<8x1xf32> -> vector<8x1xf32>
    %437 = vector.broadcast %436 : vector<8x1xf32> to vector<8x8xf32>
    %438 = arith.mulf %433, %437 : vector<8x8xf32>
    %cst_241 = arith.constant dense<0.000000e+00> : vector<8x8xf32>
    %439 = tpu.matmul %438, %426, %cst_241 {dimension_numbers = #tpu.dot_dimension_numbers<[1], [0], [0], [1], [0, 0, 1, 1], [], []>} : vector<8x8xf32>, vector<8x8xf32>, vector<8x8xf32> -> vector<8x8xf32>
    %440 = vector.extract_strided_slice %409 {offsets = [0, 8], sizes = [8, 8], strides = [1, 1]} : vector<8x32xf32> to vector<8x8xf32>
    %441 = vector.extract_strided_slice %416 {offsets = [0, 8], sizes = [8, 8], strides = [1, 1]} : vector<8x32xf32> to vector<8x8xf32>
    %442 = vector.extract_strided_slice %423 {offsets = [0, 8], sizes = [8, 8], strides = [1, 1]} : vector<8x32xf32> to vector<8x8xf32>
    %cst_242 = arith.constant dense<0.000000e+00> : vector<8x8xf32>
    %443 = tpu.matmul %440, %441, %cst_242 {dimension_numbers = #tpu.dot_dimension_numbers<[1], [1], [0], [0], [0, 0, 1, 0], [], []>} : vector<8x8xf32>, vector<8x8xf32>, vector<8x8xf32> -> vector<8x8xf32>
    %444 = arith.addf %443, %8 : vector<8x8xf32>
    %cst_243 = arith.constant dense<0xFF800000> : vector<8xf32>
    %445 = vector.multi_reduction <maximumf>, %444, %cst_243 [1] : vector<8x8xf32> to vector<8xf32>
    %446 = vector.shape_cast %445 : vector<8xf32> to vector<8x1xf32>
    %447 = vector.broadcast %446 : vector<8x1xf32> to vector<8x8xf32>
    %448 = arith.subf %444, %447 : vector<8x8xf32>
    %449 = math.exp %448 : vector<8x8xf32>
    %cst_244 = arith.constant dense<0.000000e+00> : vector<8xf32>
    %450 = vector.multi_reduction <add>, %449, %cst_244 [1] : vector<8x8xf32> to vector<8xf32>
    %451 = vector.shape_cast %450 : vector<8xf32> to vector<8x1xf32>
    %452 = tpu.reciprocal %451 {approx = true} : vector<8x1xf32> -> vector<8x1xf32>
    %453 = vector.broadcast %452 : vector<8x1xf32> to vector<8x8xf32>
    %454 = arith.mulf %449, %453 : vector<8x8xf32>
    %cst_245 = arith.constant dense<0.000000e+00> : vector<8x8xf32>
    %455 = tpu.matmul %454, %442, %cst_245 {dimension_numbers = #tpu.dot_dimension_numbers<[1], [0], [0], [1], [0, 0, 1, 1], [], []>} : vector<8x8xf32>, vector<8x8xf32>, vector<8x8xf32> -> vector<8x8xf32>
    %456 = vector.extract_strided_slice %409 {offsets = [0, 16], sizes = [8, 8], strides = [1, 1]} : vector<8x32xf32> to vector<8x8xf32>
    %457 = vector.extract_strided_slice %416 {offsets = [0, 16], sizes = [8, 8], strides = [1, 1]} : vector<8x32xf32> to vector<8x8xf32>
    %458 = vector.extract_strided_slice %423 {offsets = [0, 16], sizes = [8, 8], strides = [1, 1]} : vector<8x32xf32> to vector<8x8xf32>
    %cst_246 = arith.constant dense<0.000000e+00> : vector<8x8xf32>
    %459 = tpu.matmul %456, %457, %cst_246 {dimension_numbers = #tpu.dot_dimension_numbers<[1], [1], [0], [0], [0, 0, 1, 0], [], []>} : vector<8x8xf32>, vector<8x8xf32>, vector<8x8xf32> -> vector<8x8xf32>
    %460 = arith.addf %459, %8 : vector<8x8xf32>
    %cst_247 = arith.constant dense<0xFF800000> : vector<8xf32>
    %461 = vector.multi_reduction <maximumf>, %460, %cst_247 [1] : vector<8x8xf32> to vector<8xf32>
    %462 = vector.shape_cast %461 : vector<8xf32> to vector<8x1xf32>
    %463 = vector.broadcast %462 : vector<8x1xf32> to vector<8x8xf32>
    %464 = arith.subf %460, %463 : vector<8x8xf32>
    %465 = math.exp %464 : vector<8x8xf32>
    %cst_248 = arith.constant dense<0.000000e+00> : vector<8xf32>
    %466 = vector.multi_reduction <add>, %465, %cst_248 [1] : vector<8x8xf32> to vector<8xf32>
    %467 = vector.shape_cast %466 : vector<8xf32> to vector<8x1xf32>
    %468 = tpu.reciprocal %467 {approx = true} : vector<8x1xf32> -> vector<8x1xf32>
    %469 = vector.broadcast %468 : vector<8x1xf32> to vector<8x8xf32>
    %470 = arith.mulf %465, %469 : vector<8x8xf32>
    %cst_249 = arith.constant dense<0.000000e+00> : vector<8x8xf32>
    %471 = tpu.matmul %470, %458, %cst_249 {dimension_numbers = #tpu.dot_dimension_numbers<[1], [0], [0], [1], [0, 0, 1, 1], [], []>} : vector<8x8xf32>, vector<8x8xf32>, vector<8x8xf32> -> vector<8x8xf32>
    %472 = vector.extract_strided_slice %409 {offsets = [0, 24], sizes = [8, 8], strides = [1, 1]} : vector<8x32xf32> to vector<8x8xf32>
    %473 = vector.extract_strided_slice %416 {offsets = [0, 24], sizes = [8, 8], strides = [1, 1]} : vector<8x32xf32> to vector<8x8xf32>
    %474 = vector.extract_strided_slice %423 {offsets = [0, 24], sizes = [8, 8], strides = [1, 1]} : vector<8x32xf32> to vector<8x8xf32>
    %cst_250 = arith.constant dense<0.000000e+00> : vector<8x8xf32>
    %475 = tpu.matmul %472, %473, %cst_250 {dimension_numbers = #tpu.dot_dimension_numbers<[1], [1], [0], [0], [0, 0, 1, 0], [], []>} : vector<8x8xf32>, vector<8x8xf32>, vector<8x8xf32> -> vector<8x8xf32>
    %476 = arith.addf %475, %8 : vector<8x8xf32>
    %cst_251 = arith.constant dense<0xFF800000> : vector<8xf32>
    %477 = vector.multi_reduction <maximumf>, %476, %cst_251 [1] : vector<8x8xf32> to vector<8xf32>
    %478 = vector.shape_cast %477 : vector<8xf32> to vector<8x1xf32>
    %479 = vector.broadcast %478 : vector<8x1xf32> to vector<8x8xf32>
    %480 = arith.subf %476, %479 : vector<8x8xf32>
    %481 = math.exp %480 : vector<8x8xf32>
    %cst_252 = arith.constant dense<0.000000e+00> : vector<8xf32>
    %482 = vector.multi_reduction <add>, %481, %cst_252 [1] : vector<8x8xf32> to vector<8xf32>
    %483 = vector.shape_cast %482 : vector<8xf32> to vector<8x1xf32>
    %484 = tpu.reciprocal %483 {approx = true} : vector<8x1xf32> -> vector<8x1xf32>
    %485 = vector.broadcast %484 : vector<8x1xf32> to vector<8x8xf32>
    %486 = arith.mulf %481, %485 : vector<8x8xf32>
    %cst_253 = arith.constant dense<0.000000e+00> : vector<8x8xf32>
    %487 = tpu.matmul %486, %474, %cst_253 {dimension_numbers = #tpu.dot_dimension_numbers<[1], [0], [0], [1], [0, 0, 1, 1], [], []>} : vector<8x8xf32>, vector<8x8xf32>, vector<8x8xf32> -> vector<8x8xf32>
    %488 = tpu.concatenate %439, %455, %471, %487 in 1 : vector<8x8xf32>, vector<8x8xf32>, vector<8x8xf32>, vector<8x8xf32> -> vector<8x32xf32>
    %c4_254 = arith.constant 4 : index
    %c3_255 = arith.constant 3 : index
    %c0_256 = arith.constant 0 : index
    %c0_257 = arith.constant 0 : index
    %489 = vector.load %arg3[%c4_254, %c3_255, %c0_256, %c0_257] : memref<8x4x32x32xf32, #tpu.memory_space<vmem>>, vector<1x1x32x32xf32>
    %490 = vector.shape_cast %489 : vector<1x1x32x32xf32> to vector<32x32xf32>
    %cst_258 = arith.constant dense<0.000000e+00> : vector<8x32xf32>
    %491 = tpu.matmul %488, %490, %cst_258 {dimension_numbers = #tpu.dot_dimension_numbers<[1], [0], [0], [1], [0, 0, 1, 1], [], []>} : vector<8x32xf32>, vector<32x32xf32>, vector<8x32xf32> -> vector<8x32xf32>
    %c4_259 = arith.constant 4 : index
    %c3_260 = arith.constant 3 : index
    %c0_261 = arith.constant 0 : index
    %c0_262 = arith.constant 0 : index
    %492 = vector.load %arg4[%c4_259, %c3_260, %c0_261, %c0_262] : memref<8x4x1x32xf32, #tpu.memory_space<vmem>>, vector<1x1x1x32xf32>
    %493 = vector.shape_cast %492 : vector<1x1x1x32xf32> to vector<1x32xf32>
    %494 = vector.broadcast %493 : vector<1x32xf32> to vector<8x32xf32>
    %495 = arith.addf %491, %494 : vector<8x32xf32>
    %c5 = arith.constant 5 : index
    %c0_263 = arith.constant 0 : index
    %c0_264 = arith.constant 0 : index
    %c0_265 = arith.constant 0 : index
    %496 = vector.load %arg3[%c5, %c0_263, %c0_264, %c0_265] : memref<8x4x32x32xf32, #tpu.memory_space<vmem>>, vector<1x1x32x32xf32>
    %497 = vector.shape_cast %496 : vector<1x1x32x32xf32> to vector<32x32xf32>
    %cst_266 = arith.constant dense<0.000000e+00> : vector<8x32xf32>
    %498 = tpu.matmul %401, %497, %cst_266 {dimension_numbers = #tpu.dot_dimension_numbers<[1], [0], [0], [1], [0, 0, 1, 1], [], []>} : vector<8x32xf32>, vector<32x32xf32>, vector<8x32xf32> -> vector<8x32xf32>
    %c5_267 = arith.constant 5 : index
    %c0_268 = arith.constant 0 : index
    %c0_269 = arith.constant 0 : index
    %c0_270 = arith.constant 0 : index
    %499 = vector.load %arg4[%c5_267, %c0_268, %c0_269, %c0_270] : memref<8x4x1x32xf32, #tpu.memory_space<vmem>>, vector<1x1x1x32xf32>
    %500 = vector.shape_cast %499 : vector<1x1x1x32xf32> to vector<1x32xf32>
    %501 = vector.broadcast %500 : vector<1x32xf32> to vector<8x32xf32>
    %502 = arith.addf %498, %501 : vector<8x32xf32>
    %c5_271 = arith.constant 5 : index
    %c1_272 = arith.constant 1 : index
    %c0_273 = arith.constant 0 : index
    %c0_274 = arith.constant 0 : index
    %503 = vector.load %arg3[%c5_271, %c1_272, %c0_273, %c0_274] : memref<8x4x32x32xf32, #tpu.memory_space<vmem>>, vector<1x1x32x32xf32>
    %504 = vector.shape_cast %503 : vector<1x1x32x32xf32> to vector<32x32xf32>
    %cst_275 = arith.constant dense<0.000000e+00> : vector<8x32xf32>
    %505 = tpu.matmul %401, %504, %cst_275 {dimension_numbers = #tpu.dot_dimension_numbers<[1], [0], [0], [1], [0, 0, 1, 1], [], []>} : vector<8x32xf32>, vector<32x32xf32>, vector<8x32xf32> -> vector<8x32xf32>
    %c5_276 = arith.constant 5 : index
    %c1_277 = arith.constant 1 : index
    %c0_278 = arith.constant 0 : index
    %c0_279 = arith.constant 0 : index
    %506 = vector.load %arg4[%c5_276, %c1_277, %c0_278, %c0_279] : memref<8x4x1x32xf32, #tpu.memory_space<vmem>>, vector<1x1x1x32xf32>
    %507 = vector.shape_cast %506 : vector<1x1x1x32xf32> to vector<1x32xf32>
    %508 = vector.broadcast %507 : vector<1x32xf32> to vector<8x32xf32>
    %509 = arith.addf %505, %508 : vector<8x32xf32>
    %c5_280 = arith.constant 5 : index
    %c2_281 = arith.constant 2 : index
    %c0_282 = arith.constant 0 : index
    %c0_283 = arith.constant 0 : index
    %510 = vector.load %arg3[%c5_280, %c2_281, %c0_282, %c0_283] : memref<8x4x32x32xf32, #tpu.memory_space<vmem>>, vector<1x1x32x32xf32>
    %511 = vector.shape_cast %510 : vector<1x1x32x32xf32> to vector<32x32xf32>
    %cst_284 = arith.constant dense<0.000000e+00> : vector<8x32xf32>
    %512 = tpu.matmul %401, %511, %cst_284 {dimension_numbers = #tpu.dot_dimension_numbers<[1], [0], [0], [1], [0, 0, 1, 1], [], []>} : vector<8x32xf32>, vector<32x32xf32>, vector<8x32xf32> -> vector<8x32xf32>
    %c5_285 = arith.constant 5 : index
    %c2_286 = arith.constant 2 : index
    %c0_287 = arith.constant 0 : index
    %c0_288 = arith.constant 0 : index
    %513 = vector.load %arg4[%c5_285, %c2_286, %c0_287, %c0_288] : memref<8x4x1x32xf32, #tpu.memory_space<vmem>>, vector<1x1x1x32xf32>
    %514 = vector.shape_cast %513 : vector<1x1x1x32xf32> to vector<1x32xf32>
    %515 = vector.broadcast %514 : vector<1x32xf32> to vector<8x32xf32>
    %516 = arith.addf %512, %515 : vector<8x32xf32>
    %517 = vector.extract_strided_slice %502 {offsets = [0, 0], sizes = [8, 8], strides = [1, 1]} : vector<8x32xf32> to vector<8x8xf32>
    %518 = vector.extract_strided_slice %509 {offsets = [0, 0], sizes = [8, 8], strides = [1, 1]} : vector<8x32xf32> to vector<8x8xf32>
    %519 = vector.extract_strided_slice %516 {offsets = [0, 0], sizes = [8, 8], strides = [1, 1]} : vector<8x32xf32> to vector<8x8xf32>
    %cst_289 = arith.constant dense<0.000000e+00> : vector<8x8xf32>
    %520 = tpu.matmul %517, %518, %cst_289 {dimension_numbers = #tpu.dot_dimension_numbers<[1], [1], [0], [0], [0, 0, 1, 0], [], []>} : vector<8x8xf32>, vector<8x8xf32>, vector<8x8xf32> -> vector<8x8xf32>
    %521 = arith.addf %520, %8 : vector<8x8xf32>
    %cst_290 = arith.constant dense<0xFF800000> : vector<8xf32>
    %522 = vector.multi_reduction <maximumf>, %521, %cst_290 [1] : vector<8x8xf32> to vector<8xf32>
    %523 = vector.shape_cast %522 : vector<8xf32> to vector<8x1xf32>
    %524 = vector.broadcast %523 : vector<8x1xf32> to vector<8x8xf32>
    %525 = arith.subf %521, %524 : vector<8x8xf32>
    %526 = math.exp %525 : vector<8x8xf32>
    %cst_291 = arith.constant dense<0.000000e+00> : vector<8xf32>
    %527 = vector.multi_reduction <add>, %526, %cst_291 [1] : vector<8x8xf32> to vector<8xf32>
    %528 = vector.shape_cast %527 : vector<8xf32> to vector<8x1xf32>
    %529 = tpu.reciprocal %528 {approx = true} : vector<8x1xf32> -> vector<8x1xf32>
    %530 = vector.broadcast %529 : vector<8x1xf32> to vector<8x8xf32>
    %531 = arith.mulf %526, %530 : vector<8x8xf32>
    %cst_292 = arith.constant dense<0.000000e+00> : vector<8x8xf32>
    %532 = tpu.matmul %531, %519, %cst_292 {dimension_numbers = #tpu.dot_dimension_numbers<[1], [0], [0], [1], [0, 0, 1, 1], [], []>} : vector<8x8xf32>, vector<8x8xf32>, vector<8x8xf32> -> vector<8x8xf32>
    %533 = vector.extract_strided_slice %502 {offsets = [0, 8], sizes = [8, 8], strides = [1, 1]} : vector<8x32xf32> to vector<8x8xf32>
    %534 = vector.extract_strided_slice %509 {offsets = [0, 8], sizes = [8, 8], strides = [1, 1]} : vector<8x32xf32> to vector<8x8xf32>
    %535 = vector.extract_strided_slice %516 {offsets = [0, 8], sizes = [8, 8], strides = [1, 1]} : vector<8x32xf32> to vector<8x8xf32>
    %cst_293 = arith.constant dense<0.000000e+00> : vector<8x8xf32>
    %536 = tpu.matmul %533, %534, %cst_293 {dimension_numbers = #tpu.dot_dimension_numbers<[1], [1], [0], [0], [0, 0, 1, 0], [], []>} : vector<8x8xf32>, vector<8x8xf32>, vector<8x8xf32> -> vector<8x8xf32>
    %537 = arith.addf %536, %8 : vector<8x8xf32>
    %cst_294 = arith.constant dense<0xFF800000> : vector<8xf32>
    %538 = vector.multi_reduction <maximumf>, %537, %cst_294 [1] : vector<8x8xf32> to vector<8xf32>
    %539 = vector.shape_cast %538 : vector<8xf32> to vector<8x1xf32>
    %540 = vector.broadcast %539 : vector<8x1xf32> to vector<8x8xf32>
    %541 = arith.subf %537, %540 : vector<8x8xf32>
    %542 = math.exp %541 : vector<8x8xf32>
    %cst_295 = arith.constant dense<0.000000e+00> : vector<8xf32>
    %543 = vector.multi_reduction <add>, %542, %cst_295 [1] : vector<8x8xf32> to vector<8xf32>
    %544 = vector.shape_cast %543 : vector<8xf32> to vector<8x1xf32>
    %545 = tpu.reciprocal %544 {approx = true} : vector<8x1xf32> -> vector<8x1xf32>
    %546 = vector.broadcast %545 : vector<8x1xf32> to vector<8x8xf32>
    %547 = arith.mulf %542, %546 : vector<8x8xf32>
    %cst_296 = arith.constant dense<0.000000e+00> : vector<8x8xf32>
    %548 = tpu.matmul %547, %535, %cst_296 {dimension_numbers = #tpu.dot_dimension_numbers<[1], [0], [0], [1], [0, 0, 1, 1], [], []>} : vector<8x8xf32>, vector<8x8xf32>, vector<8x8xf32> -> vector<8x8xf32>
    %549 = vector.extract_strided_slice %502 {offsets = [0, 16], sizes = [8, 8], strides = [1, 1]} : vector<8x32xf32> to vector<8x8xf32>
    %550 = vector.extract_strided_slice %509 {offsets = [0, 16], sizes = [8, 8], strides = [1, 1]} : vector<8x32xf32> to vector<8x8xf32>
    %551 = vector.extract_strided_slice %516 {offsets = [0, 16], sizes = [8, 8], strides = [1, 1]} : vector<8x32xf32> to vector<8x8xf32>
    %cst_297 = arith.constant dense<0.000000e+00> : vector<8x8xf32>
    %552 = tpu.matmul %549, %550, %cst_297 {dimension_numbers = #tpu.dot_dimension_numbers<[1], [1], [0], [0], [0, 0, 1, 0], [], []>} : vector<8x8xf32>, vector<8x8xf32>, vector<8x8xf32> -> vector<8x8xf32>
    %553 = arith.addf %552, %8 : vector<8x8xf32>
    %cst_298 = arith.constant dense<0xFF800000> : vector<8xf32>
    %554 = vector.multi_reduction <maximumf>, %553, %cst_298 [1] : vector<8x8xf32> to vector<8xf32>
    %555 = vector.shape_cast %554 : vector<8xf32> to vector<8x1xf32>
    %556 = vector.broadcast %555 : vector<8x1xf32> to vector<8x8xf32>
    %557 = arith.subf %553, %556 : vector<8x8xf32>
    %558 = math.exp %557 : vector<8x8xf32>
    %cst_299 = arith.constant dense<0.000000e+00> : vector<8xf32>
    %559 = vector.multi_reduction <add>, %558, %cst_299 [1] : vector<8x8xf32> to vector<8xf32>
    %560 = vector.shape_cast %559 : vector<8xf32> to vector<8x1xf32>
    %561 = tpu.reciprocal %560 {approx = true} : vector<8x1xf32> -> vector<8x1xf32>
    %562 = vector.broadcast %561 : vector<8x1xf32> to vector<8x8xf32>
    %563 = arith.mulf %558, %562 : vector<8x8xf32>
    %cst_300 = arith.constant dense<0.000000e+00> : vector<8x8xf32>
    %564 = tpu.matmul %563, %551, %cst_300 {dimension_numbers = #tpu.dot_dimension_numbers<[1], [0], [0], [1], [0, 0, 1, 1], [], []>} : vector<8x8xf32>, vector<8x8xf32>, vector<8x8xf32> -> vector<8x8xf32>
    %565 = vector.extract_strided_slice %502 {offsets = [0, 24], sizes = [8, 8], strides = [1, 1]} : vector<8x32xf32> to vector<8x8xf32>
    %566 = vector.extract_strided_slice %509 {offsets = [0, 24], sizes = [8, 8], strides = [1, 1]} : vector<8x32xf32> to vector<8x8xf32>
    %567 = vector.extract_strided_slice %516 {offsets = [0, 24], sizes = [8, 8], strides = [1, 1]} : vector<8x32xf32> to vector<8x8xf32>
    %cst_301 = arith.constant dense<0.000000e+00> : vector<8x8xf32>
    %568 = tpu.matmul %565, %566, %cst_301 {dimension_numbers = #tpu.dot_dimension_numbers<[1], [1], [0], [0], [0, 0, 1, 0], [], []>} : vector<8x8xf32>, vector<8x8xf32>, vector<8x8xf32> -> vector<8x8xf32>
    %569 = arith.addf %568, %8 : vector<8x8xf32>
    %cst_302 = arith.constant dense<0xFF800000> : vector<8xf32>
    %570 = vector.multi_reduction <maximumf>, %569, %cst_302 [1] : vector<8x8xf32> to vector<8xf32>
    %571 = vector.shape_cast %570 : vector<8xf32> to vector<8x1xf32>
    %572 = vector.broadcast %571 : vector<8x1xf32> to vector<8x8xf32>
    %573 = arith.subf %569, %572 : vector<8x8xf32>
    %574 = math.exp %573 : vector<8x8xf32>
    %cst_303 = arith.constant dense<0.000000e+00> : vector<8xf32>
    %575 = vector.multi_reduction <add>, %574, %cst_303 [1] : vector<8x8xf32> to vector<8xf32>
    %576 = vector.shape_cast %575 : vector<8xf32> to vector<8x1xf32>
    %577 = tpu.reciprocal %576 {approx = true} : vector<8x1xf32> -> vector<8x1xf32>
    %578 = vector.broadcast %577 : vector<8x1xf32> to vector<8x8xf32>
    %579 = arith.mulf %574, %578 : vector<8x8xf32>
    %cst_304 = arith.constant dense<0.000000e+00> : vector<8x8xf32>
    %580 = tpu.matmul %579, %567, %cst_304 {dimension_numbers = #tpu.dot_dimension_numbers<[1], [0], [0], [1], [0, 0, 1, 1], [], []>} : vector<8x8xf32>, vector<8x8xf32>, vector<8x8xf32> -> vector<8x8xf32>
    %581 = tpu.concatenate %532, %548, %564, %580 in 1 : vector<8x8xf32>, vector<8x8xf32>, vector<8x8xf32>, vector<8x8xf32> -> vector<8x32xf32>
    %c5_305 = arith.constant 5 : index
    %c3_306 = arith.constant 3 : index
    %c0_307 = arith.constant 0 : index
    %c0_308 = arith.constant 0 : index
    %582 = vector.load %arg3[%c5_305, %c3_306, %c0_307, %c0_308] : memref<8x4x32x32xf32, #tpu.memory_space<vmem>>, vector<1x1x32x32xf32>
    %583 = vector.shape_cast %582 : vector<1x1x32x32xf32> to vector<32x32xf32>
    %cst_309 = arith.constant dense<0.000000e+00> : vector<8x32xf32>
    %584 = tpu.matmul %581, %583, %cst_309 {dimension_numbers = #tpu.dot_dimension_numbers<[1], [0], [0], [1], [0, 0, 1, 1], [], []>} : vector<8x32xf32>, vector<32x32xf32>, vector<8x32xf32> -> vector<8x32xf32>
    %c5_310 = arith.constant 5 : index
    %c3_311 = arith.constant 3 : index
    %c0_312 = arith.constant 0 : index
    %c0_313 = arith.constant 0 : index
    %585 = vector.load %arg4[%c5_310, %c3_311, %c0_312, %c0_313] : memref<8x4x1x32xf32, #tpu.memory_space<vmem>>, vector<1x1x1x32xf32>
    %586 = vector.shape_cast %585 : vector<1x1x1x32xf32> to vector<1x32xf32>
    %587 = vector.broadcast %586 : vector<1x32xf32> to vector<8x32xf32>
    %588 = arith.addf %584, %587 : vector<8x32xf32>
    %c6 = arith.constant 6 : index
    %c0_314 = arith.constant 0 : index
    %c0_315 = arith.constant 0 : index
    %c0_316 = arith.constant 0 : index
    %589 = vector.load %arg3[%c6, %c0_314, %c0_315, %c0_316] : memref<8x4x32x32xf32, #tpu.memory_space<vmem>>, vector<1x1x32x32xf32>
    %590 = vector.shape_cast %589 : vector<1x1x32x32xf32> to vector<32x32xf32>
    %cst_317 = arith.constant dense<0.000000e+00> : vector<8x32xf32>
    %591 = tpu.matmul %495, %590, %cst_317 {dimension_numbers = #tpu.dot_dimension_numbers<[1], [0], [0], [1], [0, 0, 1, 1], [], []>} : vector<8x32xf32>, vector<32x32xf32>, vector<8x32xf32> -> vector<8x32xf32>
    %c6_318 = arith.constant 6 : index
    %c0_319 = arith.constant 0 : index
    %c0_320 = arith.constant 0 : index
    %c0_321 = arith.constant 0 : index
    %592 = vector.load %arg4[%c6_318, %c0_319, %c0_320, %c0_321] : memref<8x4x1x32xf32, #tpu.memory_space<vmem>>, vector<1x1x1x32xf32>
    %593 = vector.shape_cast %592 : vector<1x1x1x32xf32> to vector<1x32xf32>
    %594 = vector.broadcast %593 : vector<1x32xf32> to vector<8x32xf32>
    %595 = arith.addf %591, %594 : vector<8x32xf32>
    %c6_322 = arith.constant 6 : index
    %c1_323 = arith.constant 1 : index
    %c0_324 = arith.constant 0 : index
    %c0_325 = arith.constant 0 : index
    %596 = vector.load %arg3[%c6_322, %c1_323, %c0_324, %c0_325] : memref<8x4x32x32xf32, #tpu.memory_space<vmem>>, vector<1x1x32x32xf32>
    %597 = vector.shape_cast %596 : vector<1x1x32x32xf32> to vector<32x32xf32>
    %cst_326 = arith.constant dense<0.000000e+00> : vector<8x32xf32>
    %598 = tpu.matmul %588, %597, %cst_326 {dimension_numbers = #tpu.dot_dimension_numbers<[1], [0], [0], [1], [0, 0, 1, 1], [], []>} : vector<8x32xf32>, vector<32x32xf32>, vector<8x32xf32> -> vector<8x32xf32>
    %c6_327 = arith.constant 6 : index
    %c1_328 = arith.constant 1 : index
    %c0_329 = arith.constant 0 : index
    %c0_330 = arith.constant 0 : index
    %599 = vector.load %arg4[%c6_327, %c1_328, %c0_329, %c0_330] : memref<8x4x1x32xf32, #tpu.memory_space<vmem>>, vector<1x1x1x32xf32>
    %600 = vector.shape_cast %599 : vector<1x1x1x32xf32> to vector<1x32xf32>
    %601 = vector.broadcast %600 : vector<1x32xf32> to vector<8x32xf32>
    %602 = arith.addf %598, %601 : vector<8x32xf32>
    %c6_331 = arith.constant 6 : index
    %c2_332 = arith.constant 2 : index
    %c0_333 = arith.constant 0 : index
    %c0_334 = arith.constant 0 : index
    %603 = vector.load %arg3[%c6_331, %c2_332, %c0_333, %c0_334] : memref<8x4x32x32xf32, #tpu.memory_space<vmem>>, vector<1x1x32x32xf32>
    %604 = vector.shape_cast %603 : vector<1x1x32x32xf32> to vector<32x32xf32>
    %cst_335 = arith.constant dense<0.000000e+00> : vector<8x32xf32>
    %605 = tpu.matmul %588, %604, %cst_335 {dimension_numbers = #tpu.dot_dimension_numbers<[1], [0], [0], [1], [0, 0, 1, 1], [], []>} : vector<8x32xf32>, vector<32x32xf32>, vector<8x32xf32> -> vector<8x32xf32>
    %c6_336 = arith.constant 6 : index
    %c2_337 = arith.constant 2 : index
    %c0_338 = arith.constant 0 : index
    %c0_339 = arith.constant 0 : index
    %606 = vector.load %arg4[%c6_336, %c2_337, %c0_338, %c0_339] : memref<8x4x1x32xf32, #tpu.memory_space<vmem>>, vector<1x1x1x32xf32>
    %607 = vector.shape_cast %606 : vector<1x1x1x32xf32> to vector<1x32xf32>
    %608 = vector.broadcast %607 : vector<1x32xf32> to vector<8x32xf32>
    %609 = arith.addf %605, %608 : vector<8x32xf32>
    %610 = vector.extract_strided_slice %595 {offsets = [0, 0], sizes = [8, 8], strides = [1, 1]} : vector<8x32xf32> to vector<8x8xf32>
    %611 = vector.extract_strided_slice %602 {offsets = [0, 0], sizes = [8, 8], strides = [1, 1]} : vector<8x32xf32> to vector<8x8xf32>
    %612 = vector.extract_strided_slice %609 {offsets = [0, 0], sizes = [8, 8], strides = [1, 1]} : vector<8x32xf32> to vector<8x8xf32>
    %cst_340 = arith.constant dense<0.000000e+00> : vector<8x8xf32>
    %613 = tpu.matmul %610, %611, %cst_340 {dimension_numbers = #tpu.dot_dimension_numbers<[1], [1], [0], [0], [0, 0, 1, 0], [], []>} : vector<8x8xf32>, vector<8x8xf32>, vector<8x8xf32> -> vector<8x8xf32>
    %614 = arith.addf %613, %8 : vector<8x8xf32>
    %cst_341 = arith.constant dense<0xFF800000> : vector<8xf32>
    %615 = vector.multi_reduction <maximumf>, %614, %cst_341 [1] : vector<8x8xf32> to vector<8xf32>
    %616 = vector.shape_cast %615 : vector<8xf32> to vector<8x1xf32>
    %617 = vector.broadcast %616 : vector<8x1xf32> to vector<8x8xf32>
    %618 = arith.subf %614, %617 : vector<8x8xf32>
    %619 = math.exp %618 : vector<8x8xf32>
    %cst_342 = arith.constant dense<0.000000e+00> : vector<8xf32>
    %620 = vector.multi_reduction <add>, %619, %cst_342 [1] : vector<8x8xf32> to vector<8xf32>
    %621 = vector.shape_cast %620 : vector<8xf32> to vector<8x1xf32>
    %622 = tpu.reciprocal %621 {approx = true} : vector<8x1xf32> -> vector<8x1xf32>
    %623 = vector.broadcast %622 : vector<8x1xf32> to vector<8x8xf32>
    %624 = arith.mulf %619, %623 : vector<8x8xf32>
    %cst_343 = arith.constant dense<0.000000e+00> : vector<8x8xf32>
    %625 = tpu.matmul %624, %612, %cst_343 {dimension_numbers = #tpu.dot_dimension_numbers<[1], [0], [0], [1], [0, 0, 1, 1], [], []>} : vector<8x8xf32>, vector<8x8xf32>, vector<8x8xf32> -> vector<8x8xf32>
    %626 = vector.extract_strided_slice %595 {offsets = [0, 8], sizes = [8, 8], strides = [1, 1]} : vector<8x32xf32> to vector<8x8xf32>
    %627 = vector.extract_strided_slice %602 {offsets = [0, 8], sizes = [8, 8], strides = [1, 1]} : vector<8x32xf32> to vector<8x8xf32>
    %628 = vector.extract_strided_slice %609 {offsets = [0, 8], sizes = [8, 8], strides = [1, 1]} : vector<8x32xf32> to vector<8x8xf32>
    %cst_344 = arith.constant dense<0.000000e+00> : vector<8x8xf32>
    %629 = tpu.matmul %626, %627, %cst_344 {dimension_numbers = #tpu.dot_dimension_numbers<[1], [1], [0], [0], [0, 0, 1, 0], [], []>} : vector<8x8xf32>, vector<8x8xf32>, vector<8x8xf32> -> vector<8x8xf32>
    %630 = arith.addf %629, %8 : vector<8x8xf32>
    %cst_345 = arith.constant dense<0xFF800000> : vector<8xf32>
    %631 = vector.multi_reduction <maximumf>, %630, %cst_345 [1] : vector<8x8xf32> to vector<8xf32>
    %632 = vector.shape_cast %631 : vector<8xf32> to vector<8x1xf32>
    %633 = vector.broadcast %632 : vector<8x1xf32> to vector<8x8xf32>
    %634 = arith.subf %630, %633 : vector<8x8xf32>
    %635 = math.exp %634 : vector<8x8xf32>
    %cst_346 = arith.constant dense<0.000000e+00> : vector<8xf32>
    %636 = vector.multi_reduction <add>, %635, %cst_346 [1] : vector<8x8xf32> to vector<8xf32>
    %637 = vector.shape_cast %636 : vector<8xf32> to vector<8x1xf32>
    %638 = tpu.reciprocal %637 {approx = true} : vector<8x1xf32> -> vector<8x1xf32>
    %639 = vector.broadcast %638 : vector<8x1xf32> to vector<8x8xf32>
    %640 = arith.mulf %635, %639 : vector<8x8xf32>
    %cst_347 = arith.constant dense<0.000000e+00> : vector<8x8xf32>
    %641 = tpu.matmul %640, %628, %cst_347 {dimension_numbers = #tpu.dot_dimension_numbers<[1], [0], [0], [1], [0, 0, 1, 1], [], []>} : vector<8x8xf32>, vector<8x8xf32>, vector<8x8xf32> -> vector<8x8xf32>
    %642 = vector.extract_strided_slice %595 {offsets = [0, 16], sizes = [8, 8], strides = [1, 1]} : vector<8x32xf32> to vector<8x8xf32>
    %643 = vector.extract_strided_slice %602 {offsets = [0, 16], sizes = [8, 8], strides = [1, 1]} : vector<8x32xf32> to vector<8x8xf32>
    %644 = vector.extract_strided_slice %609 {offsets = [0, 16], sizes = [8, 8], strides = [1, 1]} : vector<8x32xf32> to vector<8x8xf32>
    %cst_348 = arith.constant dense<0.000000e+00> : vector<8x8xf32>
    %645 = tpu.matmul %642, %643, %cst_348 {dimension_numbers = #tpu.dot_dimension_numbers<[1], [1], [0], [0], [0, 0, 1, 0], [], []>} : vector<8x8xf32>, vector<8x8xf32>, vector<8x8xf32> -> vector<8x8xf32>
    %646 = arith.addf %645, %8 : vector<8x8xf32>
    %cst_349 = arith.constant dense<0xFF800000> : vector<8xf32>
    %647 = vector.multi_reduction <maximumf>, %646, %cst_349 [1] : vector<8x8xf32> to vector<8xf32>
    %648 = vector.shape_cast %647 : vector<8xf32> to vector<8x1xf32>
    %649 = vector.broadcast %648 : vector<8x1xf32> to vector<8x8xf32>
    %650 = arith.subf %646, %649 : vector<8x8xf32>
    %651 = math.exp %650 : vector<8x8xf32>
    %cst_350 = arith.constant dense<0.000000e+00> : vector<8xf32>
    %652 = vector.multi_reduction <add>, %651, %cst_350 [1] : vector<8x8xf32> to vector<8xf32>
    %653 = vector.shape_cast %652 : vector<8xf32> to vector<8x1xf32>
    %654 = tpu.reciprocal %653 {approx = true} : vector<8x1xf32> -> vector<8x1xf32>
    %655 = vector.broadcast %654 : vector<8x1xf32> to vector<8x8xf32>
    %656 = arith.mulf %651, %655 : vector<8x8xf32>
    %cst_351 = arith.constant dense<0.000000e+00> : vector<8x8xf32>
    %657 = tpu.matmul %656, %644, %cst_351 {dimension_numbers = #tpu.dot_dimension_numbers<[1], [0], [0], [1], [0, 0, 1, 1], [], []>} : vector<8x8xf32>, vector<8x8xf32>, vector<8x8xf32> -> vector<8x8xf32>
    %658 = vector.extract_strided_slice %595 {offsets = [0, 24], sizes = [8, 8], strides = [1, 1]} : vector<8x32xf32> to vector<8x8xf32>
    %659 = vector.extract_strided_slice %602 {offsets = [0, 24], sizes = [8, 8], strides = [1, 1]} : vector<8x32xf32> to vector<8x8xf32>
    %660 = vector.extract_strided_slice %609 {offsets = [0, 24], sizes = [8, 8], strides = [1, 1]} : vector<8x32xf32> to vector<8x8xf32>
    %cst_352 = arith.constant dense<0.000000e+00> : vector<8x8xf32>
    %661 = tpu.matmul %658, %659, %cst_352 {dimension_numbers = #tpu.dot_dimension_numbers<[1], [1], [0], [0], [0, 0, 1, 0], [], []>} : vector<8x8xf32>, vector<8x8xf32>, vector<8x8xf32> -> vector<8x8xf32>
    %662 = arith.addf %661, %8 : vector<8x8xf32>
    %cst_353 = arith.constant dense<0xFF800000> : vector<8xf32>
    %663 = vector.multi_reduction <maximumf>, %662, %cst_353 [1] : vector<8x8xf32> to vector<8xf32>
    %664 = vector.shape_cast %663 : vector<8xf32> to vector<8x1xf32>
    %665 = vector.broadcast %664 : vector<8x1xf32> to vector<8x8xf32>
    %666 = arith.subf %662, %665 : vector<8x8xf32>
    %667 = math.exp %666 : vector<8x8xf32>
    %cst_354 = arith.constant dense<0.000000e+00> : vector<8xf32>
    %668 = vector.multi_reduction <add>, %667, %cst_354 [1] : vector<8x8xf32> to vector<8xf32>
    %669 = vector.shape_cast %668 : vector<8xf32> to vector<8x1xf32>
    %670 = tpu.reciprocal %669 {approx = true} : vector<8x1xf32> -> vector<8x1xf32>
    %671 = vector.broadcast %670 : vector<8x1xf32> to vector<8x8xf32>
    %672 = arith.mulf %667, %671 : vector<8x8xf32>
    %cst_355 = arith.constant dense<0.000000e+00> : vector<8x8xf32>
    %673 = tpu.matmul %672, %660, %cst_355 {dimension_numbers = #tpu.dot_dimension_numbers<[1], [0], [0], [1], [0, 0, 1, 1], [], []>} : vector<8x8xf32>, vector<8x8xf32>, vector<8x8xf32> -> vector<8x8xf32>
    %674 = tpu.concatenate %625, %641, %657, %673 in 1 : vector<8x8xf32>, vector<8x8xf32>, vector<8x8xf32>, vector<8x8xf32> -> vector<8x32xf32>
    %c6_356 = arith.constant 6 : index
    %c3_357 = arith.constant 3 : index
    %c0_358 = arith.constant 0 : index
    %c0_359 = arith.constant 0 : index
    %675 = vector.load %arg3[%c6_356, %c3_357, %c0_358, %c0_359] : memref<8x4x32x32xf32, #tpu.memory_space<vmem>>, vector<1x1x32x32xf32>
    %676 = vector.shape_cast %675 : vector<1x1x32x32xf32> to vector<32x32xf32>
    %cst_360 = arith.constant dense<0.000000e+00> : vector<8x32xf32>
    %677 = tpu.matmul %674, %676, %cst_360 {dimension_numbers = #tpu.dot_dimension_numbers<[1], [0], [0], [1], [0, 0, 1, 1], [], []>} : vector<8x32xf32>, vector<32x32xf32>, vector<8x32xf32> -> vector<8x32xf32>
    %c6_361 = arith.constant 6 : index
    %c3_362 = arith.constant 3 : index
    %c0_363 = arith.constant 0 : index
    %c0_364 = arith.constant 0 : index
    %678 = vector.load %arg4[%c6_361, %c3_362, %c0_363, %c0_364] : memref<8x4x1x32xf32, #tpu.memory_space<vmem>>, vector<1x1x1x32xf32>
    %679 = vector.shape_cast %678 : vector<1x1x1x32xf32> to vector<1x32xf32>
    %680 = vector.broadcast %679 : vector<1x32xf32> to vector<8x32xf32>
    %681 = arith.addf %677, %680 : vector<8x32xf32>
    %c7 = arith.constant 7 : index
    %c0_365 = arith.constant 0 : index
    %c0_366 = arith.constant 0 : index
    %c0_367 = arith.constant 0 : index
    %682 = vector.load %arg3[%c7, %c0_365, %c0_366, %c0_367] : memref<8x4x32x32xf32, #tpu.memory_space<vmem>>, vector<1x1x32x32xf32>
    %683 = vector.shape_cast %682 : vector<1x1x32x32xf32> to vector<32x32xf32>
    %cst_368 = arith.constant dense<0.000000e+00> : vector<8x32xf32>
    %684 = tpu.matmul %588, %683, %cst_368 {dimension_numbers = #tpu.dot_dimension_numbers<[1], [0], [0], [1], [0, 0, 1, 1], [], []>} : vector<8x32xf32>, vector<32x32xf32>, vector<8x32xf32> -> vector<8x32xf32>
    %c7_369 = arith.constant 7 : index
    %c0_370 = arith.constant 0 : index
    %c0_371 = arith.constant 0 : index
    %c0_372 = arith.constant 0 : index
    %685 = vector.load %arg4[%c7_369, %c0_370, %c0_371, %c0_372] : memref<8x4x1x32xf32, #tpu.memory_space<vmem>>, vector<1x1x1x32xf32>
    %686 = vector.shape_cast %685 : vector<1x1x1x32xf32> to vector<1x32xf32>
    %687 = vector.broadcast %686 : vector<1x32xf32> to vector<8x32xf32>
    %688 = arith.addf %684, %687 : vector<8x32xf32>
    %c7_373 = arith.constant 7 : index
    %c1_374 = arith.constant 1 : index
    %c0_375 = arith.constant 0 : index
    %c0_376 = arith.constant 0 : index
    %689 = vector.load %arg3[%c7_373, %c1_374, %c0_375, %c0_376] : memref<8x4x32x32xf32, #tpu.memory_space<vmem>>, vector<1x1x32x32xf32>
    %690 = vector.shape_cast %689 : vector<1x1x32x32xf32> to vector<32x32xf32>
    %cst_377 = arith.constant dense<0.000000e+00> : vector<8x32xf32>
    %691 = tpu.matmul %495, %690, %cst_377 {dimension_numbers = #tpu.dot_dimension_numbers<[1], [0], [0], [1], [0, 0, 1, 1], [], []>} : vector<8x32xf32>, vector<32x32xf32>, vector<8x32xf32> -> vector<8x32xf32>
    %c7_378 = arith.constant 7 : index
    %c1_379 = arith.constant 1 : index
    %c0_380 = arith.constant 0 : index
    %c0_381 = arith.constant 0 : index
    %692 = vector.load %arg4[%c7_378, %c1_379, %c0_380, %c0_381] : memref<8x4x1x32xf32, #tpu.memory_space<vmem>>, vector<1x1x1x32xf32>
    %693 = vector.shape_cast %692 : vector<1x1x1x32xf32> to vector<1x32xf32>
    %694 = vector.broadcast %693 : vector<1x32xf32> to vector<8x32xf32>
    %695 = arith.addf %691, %694 : vector<8x32xf32>
    %c7_382 = arith.constant 7 : index
    %c2_383 = arith.constant 2 : index
    %c0_384 = arith.constant 0 : index
    %c0_385 = arith.constant 0 : index
    %696 = vector.load %arg3[%c7_382, %c2_383, %c0_384, %c0_385] : memref<8x4x32x32xf32, #tpu.memory_space<vmem>>, vector<1x1x32x32xf32>
    %697 = vector.shape_cast %696 : vector<1x1x32x32xf32> to vector<32x32xf32>
    %cst_386 = arith.constant dense<0.000000e+00> : vector<8x32xf32>
    %698 = tpu.matmul %495, %697, %cst_386 {dimension_numbers = #tpu.dot_dimension_numbers<[1], [0], [0], [1], [0, 0, 1, 1], [], []>} : vector<8x32xf32>, vector<32x32xf32>, vector<8x32xf32> -> vector<8x32xf32>
    %c7_387 = arith.constant 7 : index
    %c2_388 = arith.constant 2 : index
    %c0_389 = arith.constant 0 : index
    %c0_390 = arith.constant 0 : index
    %699 = vector.load %arg4[%c7_387, %c2_388, %c0_389, %c0_390] : memref<8x4x1x32xf32, #tpu.memory_space<vmem>>, vector<1x1x1x32xf32>
    %700 = vector.shape_cast %699 : vector<1x1x1x32xf32> to vector<1x32xf32>
    %701 = vector.broadcast %700 : vector<1x32xf32> to vector<8x32xf32>
    %702 = arith.addf %698, %701 : vector<8x32xf32>
    %703 = vector.extract_strided_slice %688 {offsets = [0, 0], sizes = [8, 8], strides = [1, 1]} : vector<8x32xf32> to vector<8x8xf32>
    %704 = vector.extract_strided_slice %695 {offsets = [0, 0], sizes = [8, 8], strides = [1, 1]} : vector<8x32xf32> to vector<8x8xf32>
    %705 = vector.extract_strided_slice %702 {offsets = [0, 0], sizes = [8, 8], strides = [1, 1]} : vector<8x32xf32> to vector<8x8xf32>
    %cst_391 = arith.constant dense<0.000000e+00> : vector<8x8xf32>
    %706 = tpu.matmul %703, %704, %cst_391 {dimension_numbers = #tpu.dot_dimension_numbers<[1], [1], [0], [0], [0, 0, 1, 0], [], []>} : vector<8x8xf32>, vector<8x8xf32>, vector<8x8xf32> -> vector<8x8xf32>
    %707 = arith.addf %706, %8 : vector<8x8xf32>
    %cst_392 = arith.constant dense<0xFF800000> : vector<8xf32>
    %708 = vector.multi_reduction <maximumf>, %707, %cst_392 [1] : vector<8x8xf32> to vector<8xf32>
    %709 = vector.shape_cast %708 : vector<8xf32> to vector<8x1xf32>
    %710 = vector.broadcast %709 : vector<8x1xf32> to vector<8x8xf32>
    %711 = arith.subf %707, %710 : vector<8x8xf32>
    %712 = math.exp %711 : vector<8x8xf32>
    %cst_393 = arith.constant dense<0.000000e+00> : vector<8xf32>
    %713 = vector.multi_reduction <add>, %712, %cst_393 [1] : vector<8x8xf32> to vector<8xf32>
    %714 = vector.shape_cast %713 : vector<8xf32> to vector<8x1xf32>
    %715 = tpu.reciprocal %714 {approx = true} : vector<8x1xf32> -> vector<8x1xf32>
    %716 = vector.broadcast %715 : vector<8x1xf32> to vector<8x8xf32>
    %717 = arith.mulf %712, %716 : vector<8x8xf32>
    %cst_394 = arith.constant dense<0.000000e+00> : vector<8x8xf32>
    %718 = tpu.matmul %717, %705, %cst_394 {dimension_numbers = #tpu.dot_dimension_numbers<[1], [0], [0], [1], [0, 0, 1, 1], [], []>} : vector<8x8xf32>, vector<8x8xf32>, vector<8x8xf32> -> vector<8x8xf32>
    %719 = vector.extract_strided_slice %688 {offsets = [0, 8], sizes = [8, 8], strides = [1, 1]} : vector<8x32xf32> to vector<8x8xf32>
    %720 = vector.extract_strided_slice %695 {offsets = [0, 8], sizes = [8, 8], strides = [1, 1]} : vector<8x32xf32> to vector<8x8xf32>
    %721 = vector.extract_strided_slice %702 {offsets = [0, 8], sizes = [8, 8], strides = [1, 1]} : vector<8x32xf32> to vector<8x8xf32>
    %cst_395 = arith.constant dense<0.000000e+00> : vector<8x8xf32>
    %722 = tpu.matmul %719, %720, %cst_395 {dimension_numbers = #tpu.dot_dimension_numbers<[1], [1], [0], [0], [0, 0, 1, 0], [], []>} : vector<8x8xf32>, vector<8x8xf32>, vector<8x8xf32> -> vector<8x8xf32>
    %723 = arith.addf %722, %8 : vector<8x8xf32>
    %cst_396 = arith.constant dense<0xFF800000> : vector<8xf32>
    %724 = vector.multi_reduction <maximumf>, %723, %cst_396 [1] : vector<8x8xf32> to vector<8xf32>
    %725 = vector.shape_cast %724 : vector<8xf32> to vector<8x1xf32>
    %726 = vector.broadcast %725 : vector<8x1xf32> to vector<8x8xf32>
    %727 = arith.subf %723, %726 : vector<8x8xf32>
    %728 = math.exp %727 : vector<8x8xf32>
    %cst_397 = arith.constant dense<0.000000e+00> : vector<8xf32>
    %729 = vector.multi_reduction <add>, %728, %cst_397 [1] : vector<8x8xf32> to vector<8xf32>
    %730 = vector.shape_cast %729 : vector<8xf32> to vector<8x1xf32>
    %731 = tpu.reciprocal %730 {approx = true} : vector<8x1xf32> -> vector<8x1xf32>
    %732 = vector.broadcast %731 : vector<8x1xf32> to vector<8x8xf32>
    %733 = arith.mulf %728, %732 : vector<8x8xf32>
    %cst_398 = arith.constant dense<0.000000e+00> : vector<8x8xf32>
    %734 = tpu.matmul %733, %721, %cst_398 {dimension_numbers = #tpu.dot_dimension_numbers<[1], [0], [0], [1], [0, 0, 1, 1], [], []>} : vector<8x8xf32>, vector<8x8xf32>, vector<8x8xf32> -> vector<8x8xf32>
    %735 = vector.extract_strided_slice %688 {offsets = [0, 16], sizes = [8, 8], strides = [1, 1]} : vector<8x32xf32> to vector<8x8xf32>
    %736 = vector.extract_strided_slice %695 {offsets = [0, 16], sizes = [8, 8], strides = [1, 1]} : vector<8x32xf32> to vector<8x8xf32>
    %737 = vector.extract_strided_slice %702 {offsets = [0, 16], sizes = [8, 8], strides = [1, 1]} : vector<8x32xf32> to vector<8x8xf32>
    %cst_399 = arith.constant dense<0.000000e+00> : vector<8x8xf32>
    %738 = tpu.matmul %735, %736, %cst_399 {dimension_numbers = #tpu.dot_dimension_numbers<[1], [1], [0], [0], [0, 0, 1, 0], [], []>} : vector<8x8xf32>, vector<8x8xf32>, vector<8x8xf32> -> vector<8x8xf32>
    %739 = arith.addf %738, %8 : vector<8x8xf32>
    %cst_400 = arith.constant dense<0xFF800000> : vector<8xf32>
    %740 = vector.multi_reduction <maximumf>, %739, %cst_400 [1] : vector<8x8xf32> to vector<8xf32>
    %741 = vector.shape_cast %740 : vector<8xf32> to vector<8x1xf32>
    %742 = vector.broadcast %741 : vector<8x1xf32> to vector<8x8xf32>
    %743 = arith.subf %739, %742 : vector<8x8xf32>
    %744 = math.exp %743 : vector<8x8xf32>
    %cst_401 = arith.constant dense<0.000000e+00> : vector<8xf32>
    %745 = vector.multi_reduction <add>, %744, %cst_401 [1] : vector<8x8xf32> to vector<8xf32>
    %746 = vector.shape_cast %745 : vector<8xf32> to vector<8x1xf32>
    %747 = tpu.reciprocal %746 {approx = true} : vector<8x1xf32> -> vector<8x1xf32>
    %748 = vector.broadcast %747 : vector<8x1xf32> to vector<8x8xf32>
    %749 = arith.mulf %744, %748 : vector<8x8xf32>
    %cst_402 = arith.constant dense<0.000000e+00> : vector<8x8xf32>
    %750 = tpu.matmul %749, %737, %cst_402 {dimension_numbers = #tpu.dot_dimension_numbers<[1], [0], [0], [1], [0, 0, 1, 1], [], []>} : vector<8x8xf32>, vector<8x8xf32>, vector<8x8xf32> -> vector<8x8xf32>
    %751 = vector.extract_strided_slice %688 {offsets = [0, 24], sizes = [8, 8], strides = [1, 1]} : vector<8x32xf32> to vector<8x8xf32>
    %752 = vector.extract_strided_slice %695 {offsets = [0, 24], sizes = [8, 8], strides = [1, 1]} : vector<8x32xf32> to vector<8x8xf32>
    %753 = vector.extract_strided_slice %702 {offsets = [0, 24], sizes = [8, 8], strides = [1, 1]} : vector<8x32xf32> to vector<8x8xf32>
    %cst_403 = arith.constant dense<0.000000e+00> : vector<8x8xf32>
    %754 = tpu.matmul %751, %752, %cst_403 {dimension_numbers = #tpu.dot_dimension_numbers<[1], [1], [0], [0], [0, 0, 1, 0], [], []>} : vector<8x8xf32>, vector<8x8xf32>, vector<8x8xf32> -> vector<8x8xf32>
    %755 = arith.addf %754, %8 : vector<8x8xf32>
    %cst_404 = arith.constant dense<0xFF800000> : vector<8xf32>
    %756 = vector.multi_reduction <maximumf>, %755, %cst_404 [1] : vector<8x8xf32> to vector<8xf32>
    %757 = vector.shape_cast %756 : vector<8xf32> to vector<8x1xf32>
    %758 = vector.broadcast %757 : vector<8x1xf32> to vector<8x8xf32>
    %759 = arith.subf %755, %758 : vector<8x8xf32>
    %760 = math.exp %759 : vector<8x8xf32>
    %cst_405 = arith.constant dense<0.000000e+00> : vector<8xf32>
    %761 = vector.multi_reduction <add>, %760, %cst_405 [1] : vector<8x8xf32> to vector<8xf32>
    %762 = vector.shape_cast %761 : vector<8xf32> to vector<8x1xf32>
    %763 = tpu.reciprocal %762 {approx = true} : vector<8x1xf32> -> vector<8x1xf32>
    %764 = vector.broadcast %763 : vector<8x1xf32> to vector<8x8xf32>
    %765 = arith.mulf %760, %764 : vector<8x8xf32>
    %cst_406 = arith.constant dense<0.000000e+00> : vector<8x8xf32>
    %766 = tpu.matmul %765, %753, %cst_406 {dimension_numbers = #tpu.dot_dimension_numbers<[1], [0], [0], [1], [0, 0, 1, 1], [], []>} : vector<8x8xf32>, vector<8x8xf32>, vector<8x8xf32> -> vector<8x8xf32>
    %767 = tpu.concatenate %718, %734, %750, %766 in 1 : vector<8x8xf32>, vector<8x8xf32>, vector<8x8xf32>, vector<8x8xf32> -> vector<8x32xf32>
    %c7_407 = arith.constant 7 : index
    %c3_408 = arith.constant 3 : index
    %c0_409 = arith.constant 0 : index
    %c0_410 = arith.constant 0 : index
    %768 = vector.load %arg3[%c7_407, %c3_408, %c0_409, %c0_410] : memref<8x4x32x32xf32, #tpu.memory_space<vmem>>, vector<1x1x32x32xf32>
    %769 = vector.shape_cast %768 : vector<1x1x32x32xf32> to vector<32x32xf32>
    %cst_411 = arith.constant dense<0.000000e+00> : vector<8x32xf32>
    %770 = tpu.matmul %767, %769, %cst_411 {dimension_numbers = #tpu.dot_dimension_numbers<[1], [0], [0], [1], [0, 0, 1, 1], [], []>} : vector<8x32xf32>, vector<32x32xf32>, vector<8x32xf32> -> vector<8x32xf32>
    %c7_412 = arith.constant 7 : index
    %c3_413 = arith.constant 3 : index
    %c0_414 = arith.constant 0 : index
    %c0_415 = arith.constant 0 : index
    %771 = vector.load %arg4[%c7_412, %c3_413, %c0_414, %c0_415] : memref<8x4x1x32xf32, #tpu.memory_space<vmem>>, vector<1x1x1x32xf32>
    %772 = vector.shape_cast %771 : vector<1x1x1x32xf32> to vector<1x32xf32>
    %773 = vector.broadcast %772 : vector<1x32xf32> to vector<8x32xf32>
    %774 = arith.addf %770, %773 : vector<8x32xf32>
    %cst_416 = arith.constant dense<0.000000e+00> : vector<8x32xf32>
    %775 = tpu.matmul %681, %25, %cst_416 {dimension_numbers = #tpu.dot_dimension_numbers<[1], [0], [0], [1], [0, 0, 1, 1], [], []>} : vector<8x32xf32>, vector<32x32xf32>, vector<8x32xf32> -> vector<8x32xf32>
    %c0_417 = arith.constant 0 : index
    %c0_418 = arith.constant 0 : index
    %c0_419 = arith.constant 0 : index
    %776 = vector.load %arg5[%c0_417, %c0_418, %c0_419] : memref<1x8x32xf32, #tpu.memory_space<vmem>>, vector<1x8x32xf32>
    %777 = vector.shape_cast %776 : vector<1x8x32xf32> to vector<8x32xf32>
    %778 = vector.shape_cast %775 : vector<8x32xf32> to vector<1x8x32xf32>
    tpu.vector_store %arg5[%c0_417, %c0_418, %c0_419], %778 {strides = array<i32>} : memref<1x8x32xf32, #tpu.memory_space<vmem>>, vector<1x8x32xf32>,
    %c0_420 = arith.constant 0 : index
    %c0_421 = arith.constant 0 : index
    %c0_422 = arith.constant 0 : index
    %779 = vector.load %arg6[%c0_420, %c0_421, %c0_422] : memref<1x8x32xf32, #tpu.memory_space<vmem>>, vector<1x8x32xf32>
    %780 = vector.shape_cast %779 : vector<1x8x32xf32> to vector<8x32xf32>
    %781 = vector.shape_cast %774 : vector<8x32xf32> to vector<1x8x32xf32>
    tpu.vector_store %arg6[%c0_420, %c0_421, %c0_422], %781 {strides = array<i32>} : memref<1x8x32xf32, #tpu.memory_space<vmem>>, vector<1x8x32xf32>,
    return
  }
  func.func @transform_0(%arg0: i32) -> (i32, i32, i32) {
    %c0_i32 = arith.constant 0 : i32
    %c0_i32_0 = arith.constant 0 : i32
    %c0_i32_1 = arith.constant 0 : i32
    return %arg0, %c0_i32, %c0_i32_0 : i32, i32, i32
  }
  func.func @transform_1(%arg0: i32) -> (i32, i32, i32) {
    %c0_i32 = arith.constant 0 : i32
    %c0_i32_0 = arith.constant 0 : i32
    %c0_i32_1 = arith.constant 0 : i32
    return %arg0, %c0_i32, %c0_i32_0 : i32, i32, i32
  }
  func.func @transform_2(%arg0: i32) -> (i32, i32, i32, i32) {
    %c0_i32 = arith.constant 0 : i32
    %c0_i32_0 = arith.constant 0 : i32
    %c0_i32_1 = arith.constant 0 : i32
    %c0_i32_2 = arith.constant 0 : i32
    %c0_i32_3 = arith.constant 0 : i32
    return %c0_i32, %c0_i32_0, %c0_i32_1, %c0_i32_2 : i32, i32, i32, i32
  }
  func.func @transform_3(%arg0: i32) -> (i32, i32, i32, i32) {
    %c0_i32 = arith.constant 0 : i32
    %c0_i32_0 = arith.constant 0 : i32
    %c0_i32_1 = arith.constant 0 : i32
    %c0_i32_2 = arith.constant 0 : i32
    %c0_i32_3 = arith.constant 0 : i32
    return %c0_i32, %c0_i32_0, %c0_i32_1, %c0_i32_2 : i32, i32, i32, i32
  }
  func.func @transform_4(%arg0: i32) -> (i32, i32, i32) {
    %c0_i32 = arith.constant 0 : i32
    %c0_i32_0 = arith.constant 0 : i32
    %c0_i32_1 = arith.constant 0 : i32
    return %arg0, %c0_i32, %c0_i32_0 : i32, i32, i32
  }
  func.func @transform_5(%arg0: i32) -> (i32, i32, i32) {
    %c0_i32 = arith.constant 0 : i32
    %c0_i32_0 = arith.constant 0 : i32
    %c0_i32_1 = arith.constant 0 : i32
    return %arg0, %c0_i32, %c0_i32_0 : i32, i32, i32
  }
}

</mosaic_0001>

<bundles_post_ra>
// kernel: pmt_layer_pallas.1
= control target key start
LH: loop header
LB: loop body
LE: loop exit
PB: predicated region body
PF: predicated region fallthrough
CT: control target
= control target key end

     0   :  { %s11579_s0 = inlined_call_operand.hbm [shape: f32[2,8,32], index: 0, kind: input, shape index: {}]   ;;  %s11580_s1 = inlined_call_operand.hbm [shape: f32[2,8,32], index: 1, kind: input, shape index: {}]   ;;  %s11581_s2 = inlined_call_operand.hbm [shape: f32[8,4,32,32], index: 2, kind: input, shape index: {}]   ;;  %s11582_s3 = inlined_call_operand.hbm [shape: f32[8,4,1,32], index: 3, kind: input, shape index: {}]   ;;  %s11583_s4 = inlined_call_operand.hbm [shape: f32[2,8,32], index: 4, kind: output, shape index: {0}]   ;;  %s11584_s5 = inlined_call_operand.hbm [shape: f32[2,8,32], index: 5, kind: output, shape index: {1}]  }
   0x1   :  { %11589 = sst [smem:[#allocation19_spill]] %s11581_s2 }
   0x2   :  { %11590 = sst [smem:[#allocation20_spill]] %s11582_s3 }
   0x3   :  { %11 = vsyncpa [#allocation3], 0 }
   0x4   :  { %13 = vsyncpa [#allocation3 + $0x1], 0 }
   0x5   :  { %14 = vsyncpa [#allocation6], 0 }
   0x6   :  { %16 = vsyncpa [#allocation6 + $0x1], 0 }
   0x7   :  { %17 = vsyncpa [#allocation9], 0 }
   0x8   :  { %18 = vsyncpa [#allocation4], 0 }
   0x9   :  { %20 = vsyncpa [#allocation4 + $0x1], 0 }
   0xa   :  { %21 = vsyncpa [#allocation12], 0 }
   0xb   :  { %23 = vsyncpa [#allocation12 + $0x1], 0  ;;  %s10451_s18 = smov 0   ;;  %s10453_s19 = smov 0  }
   0xc   :  { %s10455_s20 = smov 0   ;;  %s10457_s21 = smov 0  }
   0xd LB: > { %s10472_s22 = sadd.s32 4294967295, %s10399_s21   ;;  %s8773_s23 = sadd.s32 4294967294, %s10399_s21   ;;  %s10399_s21 = sphi %s10457_s21, %s11612_s21   ;;  %s10395_s20 = sphi %s10455_s20, %s11611_s20   ;;  %s10391_s19 = sphi %s10453_s19, %s11610_s19   ;;  %s10387_s18 = sphi %s10451_s18, %s11609_s18  }
   0xe   : > { %p49_p0 = scmp.ne.s32.totalorder %s10391_s19, %s10387_s18  ;;  %p11585_p1 = scmp.eq.s32.totalorder %s10472_s22, 0 }
   0xf   : > { %p147_p3 = scmp.eq.s32.totalorder %s8773_s23, 1  ;;  %p8774_p5 = scmp.ge.s32.totalorder %s10399_s21, 1 }
  0x10   : > { %p10481_p4 = por %p11585_p1, %p49_p0  ;;  %p180_p7 = scmp.lt.s32.totalorder %s10399_s21, 3 }
  0x11   : > { %p10486_p6 = por %p147_p3, %p49_p0  ;;  %s10401_s27 = smov [#allocation7]  }
  0x12   : > { %s11591_s24 = scalar_select %p10481_p4, 1, 0 }
  0x13   : > { %s11592_s25 = scalar_select %p10486_p6, 1, 0 }
  0x14   : > { %p10491_p8 = pnand %p8774_p5, %p180_p7  ;;  %s192_s28 = sshll.u32 %s10401_s27, 4  ;;  %s193_s28 = int_to_ptr.vmem [resolvable:$true] %s192_s28 }
  0x15   : > { %s10402_s30 = smov [#allocation8]   ;;  %s10196_s7 = scalar_lea.vmem %s193_s28, 16384 }
  0x16   : > { %s11593_s26 = scalar_select %p10491_p8, 1, 0 }
  0x17   : > { %p9982_p9 = pneg %p10491_p8  ;;  %s205_s6 = sshll.u32 %s10402_s30, 4  ;;  %s206_s6 = int_to_ptr.vmem [resolvable:$true] %s205_s6 }
  0x18   : > { %p10197_p13 = scmp.ne.s32.totalorder %s193_s28, %s10196_s7  ;;  %p10204_p5 = scmp.lt.s32.totalorder %s193_s28, %s193_s28 }
  0x19   : > { %p10500_p11 = pnand %p9982_p9, %p11585_p1  ;;  %p10205_p7 = scmp.lt.s32.totalorder %s10196_s7, %s10196_s7 }
  0x1b   : > { %p10187_p12 = pneg %p10500_p11  ;;  %p10206_p10 = por %p10205_p7, %p10204_p5 }
  0x1d   : > { %p10199_p0 = pnand %p10197_p13, %p10187_p12 }
  0x1f   : > { %p10200_p3 = pneg %p10199_p0 }
  0x21   : > { %p10207_p9 = pnand %p10206_p10, %p10200_p3 }
  0x23   : > { %10210 = shalt.err (!%p10207_p9)
}
  0x24   : > { %s10403_s8 = smov 128   ;;  %s10404_s9 = smov 8  }
  0x25   : > { %s11595_s2 = sld [smem:[#allocation19_spill]]  ;;  %s10222_s12 = scalar_lea.vmem %s206_s6, 512 }
  0x26   : > { %p10223_p1 = scmp.ne.s32.totalorder %s206_s6, %s10222_s12  ;;  %p10230_p2 = scmp.lt.s32.totalorder %s206_s6, %s206_s6 }
  0x27   : > { %p10231_p6 = scmp.lt.s32.totalorder %s10222_s12, %s10222_s12 }
  0x28   : > { %p10225_p13 = pnand %p10223_p1, %p10187_p12 }
  0x29   : > { %p10232_p5 = por %p10231_p6, %p10230_p2 }
  0x2a   : > { %p10226_p0 = pneg %p10225_p13 }
  0x2b   : > { %9985 = dma.hbm_to_vmem [thread:$0]  (!%p10500_p11), %s11595_s2, 16384, %s193_s28, [#allocation6], %s10403_s8, %s10403_s8, %s10404_s9  }
  0x2c   : > { %p10233_p10 = pnand %p10232_p5, %p10226_p0 }
  0x2e   : > { %10236 = shalt.err (!%p10233_p10)
}
  0x2f   : > { %s10405_s13 = smov 16   ;;  %s10406_s14 = smov 1  }
  0x30   : > { %s11596_s3 = sld [smem:[#allocation20_spill]]  ;;  %s10523_s17 = sadd.s32 1, %s10399_s21  }
  0x31   : > { %s33_s23 = ssub.s32 %s10399_s21, %s10523_s17  ;;  %s36_s27 = sadd.s32 1, %s10395_s20 }
  0x32   : > { %p34_p1 = scmp.eq.s32.totalorder %s33_s23, 0  ;;  %p43_p2 = scmp.ne.s32.totalorder %s10395_s20, %s10391_s19 }
  0x33   : > { %p44_p6 = scmp.eq.s32.totalorder %s10399_s21, 0  ;;  %p11597_p3 = scmp.eq.s32.totalorder %s10472_s22, 1 }
  0x34   : > { %s10532_s28 = scalar_select %p34_p1, %s10395_s20, %s36_s27  }
  0x35   : > { %p45_p12 = por %p44_p6, %p43_p2  ;;  %p10536_p7 = por %p11597_p3, %p43_p2 }
  0x36   : > { %9988 = dma.hbm_to_vmem [thread:$0]  (!%p10500_p11), %s11596_s3, 512, %s206_s6, [#allocation9], %s10405_s13, %s10405_s13, %s10406_s14  }
  0x37   : > { %s11598_s30 = scalar_select %p10536_p7, 1, 0 }
  0x38   : > { %p10005_p9 = scmp.lt.s32.totalorder %s10399_s21, 2  ;;  %s219_s29 = sand.u32 1, %s10395_s20  }
  0x39   : > { %s10542_s6 = sshll.u32 %s219_s29, 3  ;;  %s8779_s7 = sshll.u32 %s10399_s21, 7 }
  0x3a   : > { %s10548_s10 = scalar_lea.hbm %s11579_s0, %s8779_s7  ;;  %s223_s11 = scalar_lea.vmem [#allocation2], %s10542_s6 }
  0x3b   : > { %s230_s12 = sshll.u32 %s223_s11, 4  ;;  %p10553_p11 = pnand %p10005_p9, %p45_p12  ;;  %s10551_s12 = int_to_ptr.vmem [resolvable:$true] %s230_s12 }
  0x3c   : > { %s10560_s16 = scalar_lea.hbm %s11580_s1, %s8779_s7  ;;  %s237_s23 = sand.u32 1, %s10399_s21  }
  0x3d   : > { %s220_s27 = scalar_lea.sflag [#allocation3], %s219_s29  ;;  %s10237_s8 = scalar_lea.hbm %s10548_s10, 128 }
  0x3e   : > { %p10238_p13 = scmp.ne.s32.totalorder %s10548_s10, %s10237_s8  ;;  %p10239_p0 = pneg %p10553_p11 }
  0x3f   : > { %s10242_s2 = scalar_lea.hbm %s11579_s0, 256  ;;  %p10243_p1 = scmp.lt.s32.totalorder %s10548_s10, %s11579_s0 }
  0x40   : > { %p10240_p5 = pnand %p10239_p0, %p10238_p13  ;;  %p10244_p2 = scmp.lt.s32.totalorder %s10242_s2, %s10237_s8 }
  0x42   : > { %p10241_p10 = pneg %p10240_p5  ;;  %p10245_p6 = por %p10244_p2, %p10243_p1 }
  0x44   : > { %p10246_p12 = pnand %p10245_p6, %p10241_p10 }
  0x46   : > { %10249 = shalt.err (!%p10246_p12)
}
  0x47   : > { %s10250_s29 = scalar_lea.vmem %s10551_s12, 128  ;;  %s10407_s7 = smov [#allocation2]  }
  0x48   : > { %p10251_p3 = scmp.ne.s32.totalorder %s10551_s12, %s10250_s29  ;;  %s10255_s15 = sshll.u32 %s10407_s7, 4  ;;  %s10256_s15 = int_to_ptr.vmem [resolvable:$false] %s10255_s15 }
  0x49   : > { %s10257_s9 = scalar_lea.vmem %s10256_s15, 256  ;;  %p10258_p5 = scmp.lt.s32.totalorder %s10551_s12, %s10256_s15 }
  0x4a   : > { %p10253_p9 = pnand %p10251_p3, %p10239_p0  ;;  %p10259_p7 = scmp.lt.s32.totalorder %s10257_s9, %s10250_s29 }
  0x4c   : > { %p10254_p13 = pneg %p10253_p9  ;;  %p10260_p4 = por %p10259_p7, %p10258_p5 }
  0x4e   : > { %p10261_p1 = pnand %p10260_p4, %p10254_p13 }
  0x50   : > { %10264 = shalt.err (!%p10261_p1)
}
  0x51   : > { %9992 = dma.hbm_to_vmem [thread:$0]  (!%p10553_p11), %s10548_s10, 128, %s10551_s12, %s220_s27  }
  0x52   : > { %s241_s2 = scalar_lea.vmem [#allocation5], %s10542_s6  ;;  %s238_s8 = scalar_lea.sflag [#allocation6], %s237_s23 }
  0x53   : > { %s248_s3 = sshll.u32 %s241_s2, 4  ;;  %s10265_s11 = scalar_lea.hbm %s10560_s16, 128  ;;  %s249_s3 = int_to_ptr.vmem [resolvable:$true] %s248_s3 }
  0x54   : > { %p10266_p7 = scmp.ne.s32.totalorder %s10560_s16, %s10265_s11  ;;  %s10270_s7 = scalar_lea.hbm %s11580_s1, 256 }
  0x55   : > { %p10271_p2 = scmp.lt.s32.totalorder %s10560_s16, %s11580_s1  ;;  %p10272_p6 = scmp.lt.s32.totalorder %s10270_s7, %s10265_s11 }
  0x56   : > { %p10268_p4 = pnand %p10266_p7, %p10239_p0 }
  0x57   : > { %p10273_p12 = por %p10272_p6, %p10271_p2 }
  0x58   : > { %p10269_p10 = pneg %p10268_p4 }
  0x5a   : > { %p10274_p3 = pnand %p10273_p12, %p10269_p10 }
  0x5c   : > { %10277 = shalt.err (!%p10274_p3)
}
  0x5d   : > { %s10278_s6 = scalar_lea.vmem %s249_s3, 128  ;;  %s10408_s10 = smov [#allocation5]  }
  0x5e   : > { %p10279_p9 = scmp.ne.s32.totalorder %s249_s3, %s10278_s6  ;;  %s10283_s12 = sshll.u32 %s10408_s10, 4  ;;  %s10284_s12 = int_to_ptr.vmem [resolvable:$false] %s10283_s12 }
  0x5f   : > { %s10285_s23 = scalar_lea.vmem %s10284_s12, 256  ;;  %p10286_p1 = scmp.lt.s32.totalorder %s249_s3, %s10284_s12 }
  0x60   : > { %p10281_p13 = pnand %p10279_p9, %p10239_p0  ;;  %p10287_p7 = scmp.lt.s32.totalorder %s10285_s23, %s10278_s6 }
  0x62   : > { %p10282_p5 = pneg %p10281_p13  ;;  %p10288_p4 = por %p10287_p7, %p10286_p1 }
  0x64   : > { %p10289_p8 = pnand %p10288_p4, %p10282_p5 }
  0x66   : > { %10292 = shalt.err (!%p10289_p8)
}
  0x67   : > { %9995 = dma.hbm_to_vmem [thread:$0]  (!%p10553_p11), %s10560_s16, 128, %s249_s3, %s238_s8  }
  0x68   : > { %p11600_p10 = scmp.ne.s32.totalorder %s11593_s26, 0 }
  0x69   : > { %s10611_s27 = sand.u32 (!%p11600_p10), 1, %s10391_s19   ;;  %p11601_p0 = scmp.ne.s32.totalorder (!%p11600_p10), %s11591_s24, 0 }
  0x6a   : > { %257 = sbr.rel (%p11600_p10) target bundleno = 9864 (0x2688), region = 36  ;;  %s10614_s2 = sshll.u32 (!%p11600_p10), %s10611_s27, 3 }
  0x6b   : > { %s260_s11 = scalar_lea.sflag (!%p11600_p10), [#allocation3], %s10611_s27  ;;  %s263_s14 = scalar_lea.vmem (!%p11600_p10), [#allocation2], %s10614_s2 }
  0x6f   : > { %10362 = dma.done.wait (%p11601_p0), %s260_s11, 128  }
  0x70   : > { %10364 = vsyncadd (%p11601_p0), %s260_s11, 4294967168  ;;  %s268_s26 = sand.u32 1, %s10472_s22   ;;  %s272_s16 = scalar_lea.vmem [#allocation5], %s10614_s2 }
  0x71   : > { %s269_s13 = scalar_lea.sflag [#allocation6], %s268_s26 }
  0x72   : > { %10366 = dma.done.wait (%p11601_p0), %s269_s13, 128  }
  0x73   : > { %10368 = vsyncadd (%p11601_p0), %s269_s13, 4294967168  ;;  %p11602_p8 = scmp.eq.s32.totalorder %s10472_s22, 0 }
  0x75   : > { %10370 = dma.done.wait (%p11602_p8), [#allocation6], 16384   ;;  %p11603_p11 = pmov %p11602_p8 }
  0x76   : > { %p11604_p2 = pmov %p11602_p8 }
  0x77   : > { %10372 = vsyncadd (%p11603_p11), [#allocation6], 4294950912 }
  0x78   : > { %10374 = dma.done.wait (%p11604_p2), [#allocation9], 512   ;;  %p11605_p6 = pmov %p11604_p2 }
  0x79   : > { %v10409_v0 = vmov 0.0   ;;  %vm10410_vm0 = vmmov 0   ;;  %v464_v1 = vld [vmem:[#allocation7 + $0x38] sm:$0xff]  ;;  %v463_v3 = vld [vmem:[#allocation7 + $0x30] sm:$0xff]  ;;  %v462_v5 = vld [vmem:[#allocation7 + $0x28] sm:$0xff]  ;;  %vm386_vm1 = vcmask 261120   ;;  %v317_v32 = vlaneseq }
  0x7a   : > { %10376 = vsyncadd (%p11605_p6), [#allocation9], 4294966784  ;;  %9283 = vmatprep.subr.mxu1 %v10409_v0  ;;  %9272 = vmatprep.subr.mxu0 %v10409_v0  ;;  %v378_v2 = vld [vmem:[#allocation7 + $0x18] sm:$0xff]  ;;  %v377_v4 = vld [vmem:[#allocation7 + $0x10] sm:$0xff]  ;;  %vm626_vm2 = vcmask 64512   ;;  %s10411_s24 = smov 112  }
  0x7b   : > { %9291 = vmatprep.mubr.msk.f32.mxu1 %vm10410_vm0, %v10409_v0  ;;  %9280 = vmatprep.mubr.msk.f32.mxu0 %vm10410_vm0, %v10409_v0  ;;  %v376_v6 = vld [vmem:[#allocation7 + $0x8] sm:$0xff]  ;;  %v461_v7 = vld [vmem:[#allocation7 + $0x20] sm:$0xff]  ;;  %v547_v10 = vld [vmem:[#allocation7 + $0x58] sm:$0xff]  ;;  %s10412_s3 = smov 120   ;;  %s10413_s8 = smov 104   ;;  %v10695_v33 = vshrl.u32 %v317_v32, 7 }
  0x7c   : > { %9284 = vmatpush3.msra.mxu1 %v464_v1  ;;  %9273 = vmatpush3.msra.mxu0 %v378_v2  ;;  %v375_v8 = vld [vmem:[#allocation7] sm:$0xff]  ;;  %v546_v11 = vld [vmem:[#allocation7 + $0x50] sm:$0xff]  ;;  %v545_v12 = vld [vmem:[#allocation7 + $0x48] sm:$0xff]  ;;  %v10697_v34 = vand.u32 127, %v317_v32  ;;  %v10414_v38 = vmov -1e+30  }
  0x7d   : > { %9285 = vmatprep.subr.mxu1 %v10409_v0  ;;  %9274 = vmatprep.subr.mxu0 %v10409_v0  ;;  %v373_v9 = vld [vmem:[%s263_s14] sm:$0xff]  ;;  %v1390_v32 = vld [vmem:[#allocation7 + $0x98] sm:$0xff]  ;;  %s10415_s29 = smov 8   ;;  %s10416_s7 = smov 16   ;;  %vm1296_vm4 = vcmask 130048   ;;  %vm1298_vm5 = vcmask 195584  }
  0x7e   : > { %9286 = vmatpush3.msra.mxu1 %v463_v3  ;;  %9275 = vmatpush3.msra.mxu0 %v377_v4  ;;  %v544_v13 = vld [vmem:[#allocation7 + $0x40] sm:$0xff]  ;;  %v10701_v35 = vsub.s32 %v10695_v33, %v10697_v34  ;;  %s10417_s15 = smov 24   ;;  %s309_s9 = scalar_lea.vmem [#allocation10], %s10614_s2 }
  0x7f   : > { %9287 = vmatprep.subr.mxu1 %v10409_v0  ;;  %9276 = vmatprep.subr.mxu0 %v10409_v0  ;;  %v8800_v14 = vld [vmem:[#allocation8 + $0x1] ss:$0 sm:$0xff]  ;;  %v8798_v16 = vld [vmem:[#allocation8] ss:$0 sm:$0xff]  ;;  %v8802_v22 = vld [vmem:[#allocation8 + $0x2] ss:$0 sm:$0xff] }
  0x80   : > { %9288 = vmatpush3.msra.mxu1 %v462_v5  ;;  %9277 = vmatpush3.msra.mxu0 %v376_v6  ;;  %v323_v36 = vsub.s32 0, %v10701_v35  ;;  %vm333_vm14 = vcmp.eq.s32.totalorder %v10701_v35, 1  ;;  %vm337_vm15 = vcmp.eq.s32.totalorder %v10701_v35, 4294967265  ;;  %s8970_s6 = sshll.u32 %s10472_s22, 7  ;;  %s8616_s11 = sshll.u32 %s309_s9, 4  ;;  %s8617_s11 = int_to_ptr.vmem [resolvable:$true] %s8616_s11 }
  0x81   : > { %9289 = vmatprep.subr.mxu1 %v10409_v0  ;;  %9278 = vmatprep.subr.mxu0 %v10409_v0  ;;  %s8614_s23 = scalar_lea.hbm %s11583_s4, %s8970_s6  ;;  %s8598_s14 = scalar_lea.sflag [#allocation4], %s10611_s27 }
  0x82   : > { %9290 = vmatpush3.msra.mxu1 %v461_v7  ;;  %9279 = vmatpush3.msra.mxu0 %v375_v8  ;;  %v8789_v37 = vmin.u32 %v323_v36, %v10701_v35  ;;  %v1302_v36 = vld [vmem:[#allocation7 + $0x68] sm:$0xff]  ;;  %s10293_s26 = scalar_lea.vmem %s8617_s11, 128  ;;  %p11606_p3 = scmp.ne.s32.totalorder %s11598_s30, 0 }
  0x83   : > { %9292 = vmatmul.mubr.msk.f32.vlgmr.msra.gmra.mxu1 %vm386_vm1, %v373_v9  ;;  %9281 = vmatmul.mubr.msk.f32.vlgmr.msra.gmra.mxu0 %vm386_vm1, %v373_v9  ;;  %p10294_p12 = scmp.ne.s32.totalorder %s8617_s11, %s10293_s26  ;;  %s10419_s13 = smov [#allocation10]  }
  0x84   : > { %9305 = vmatprep.subr.mxu1 %v10409_v0  ;;  %9307 = vmatprep.mubr.msk.f32.mxu1 %vm10410_vm0, %v10409_v0  ;;  %vm325_vm3 = vcmp.le.s32.totalorder %v8789_v37, 2  ;;  %v1389_v37 = vld [vmem:[#allocation7 + $0x90] sm:$0xff] }
  0x85   : > { %9294 = vmatprep.subr.mxu0 %v10409_v0  ;;  %9302 = vmatprep.mubr.msk.f32.mxu0 %vm10410_vm0, %v10409_v0  ;;  %v10705_v39 = vsel %vm325_vm3, 0.0, %v10414_v38  ;;  %v1301_v38 = vld [vmem:[#allocation7 + $0x60] sm:$0xff]  ;;  %p10295_p9 = pnand %p10294_p12, %p11606_p3 }
  0x86   : > { %9295 = vmatpush3.msra.mxu0 %v547_v10 }
  0x87   : > { %9296 = vmatprep.subr.mxu0 %v10409_v0  ;;  %p10296_p13 = pneg %p10295_p9 }
  0x88   : > { %9297 = vmatpush3.msra.mxu0 %v546_v11 }
  0x89   : > { %9298 = vmatprep.subr.mxu0 %v10409_v0 }
  0x8a   : > { %9299 = vmatpush3.msra.mxu0 %v545_v12 }
  0x8b   : > { %9300 = vmatprep.subr.mxu0 %v10409_v0 }
  0x8c   : > { %9301 = vmatpush3.msra.mxu0 %v544_v13 }
  0x8d   : > { %9303 = vmatmul.mubr.msk.f32.vlgmr.msra.gmra.mxu0 %vm386_vm1, %v373_v9  ;;  %9315 = vmatprep.subr.mxu0 %v10409_v0 }
  0x8e   : > { %9317 = vmatprep.mubr.msk.f32.mxu0 %vm10410_vm0, %v10409_v0 }
 0x143   : > { %v539_v15 = vpop.f32.mrf.mxu1  ;;  %v456_v17 = vpop.f32.mrf.mxu0 }
 0x144   : > { %v540_v18 = vadd.f32 %v8800_v14, %v539_v15  ;;  %v457_v21 = vadd.f32 %v8798_v16, %v456_v17 }
 0x145   : > { %v9293_v19 = vpop.f32.mrf.mxu1  ;;  %v9282_v20 = vpop.f32.mrf.mxu0 }
 0x146   : > { %955 = vrot.lane.b32.xlu1 %v540_v18, %s10411_s24  ;;  %789 = vrot.lane.b32.xlu0 %v540_v18, %s10412_s3 }
 0x147   : > { %9306 = vmatpush3.xpose.msk.msra.mxu1 %vm626_vm2, %v540_v18 }
 0x148   : > { %9310 = vmatprep.subr.mxu1 %v10409_v0 }
 0x14a   : > { %9308 = vmatmul.mubr.msk.f32.vlgmr.msra.gmra.mxu1 %vm626_vm2, %v457_v21  ;;  %953 = vrot.lane.b32.xlu1 %v457_v21, %s10411_s24 }
 0x14b   : > { %787 = vrot.lane.b32.xlu0 %v457_v21, %s10412_s3  ;;  %9312 = vmatprep.mubr.msk.f32.mxu1 %vm10410_vm0, %v10409_v0 }
 0x14d   : > { %v622_v23 = vpop.f32.mrf.mxu0 }
 0x14e   : > { %1118 = vrot.lane.b32.xlu1 %v457_v21, %s10413_s8  ;;  %v10676_v24 = vadd.f32 %v8802_v22, %v622_v23 }
 0x14f   : > { %1120 = vrot.lane.b32.xlu0 %v540_v18, %s10413_s8  ;;  %v9304_v25 = vpop.f32.mrf.mxu0 }
 0x150   : > { %9311 = vmatpush3.msra.mxu1 %v10676_v24 }
 0x151   : > { %9320 = vmatprep.subr.mxu1 %v10409_v0 }
 0x1b8   : > { %v790_v26 = vpop.permute.xlu0 %789  ;;  %v956_v27 = vpop.permute.xlu1 %955 }
 0x1b9   : > { %9316 = vmatpush3.xpose.msk.msra.mxu0 %vm626_vm2, %v790_v26 }
 0x1ba   : > { %9325 = vmatprep.subr.mxu0 %v10409_v0 }
 0x1bc   : > { %v954_v29 = vpop.permute.xlu1 %953 }
 0x1bd   : > { %v788_v28 = vpop.permute.xlu0 %787 }
 0x1be   : > { %9318 = vmatmul.mubr.msk.f32.vlgmr.msra.gmra.mxu0 %vm626_vm2, %v788_v28 }
 0x1bf   : > { %9326 = vmatpush3.xpose.msk.msra.mxu0 %vm626_vm2, %v956_v27  ;;  %9327 = vmatprep.mubr.msk.f32.mxu0 %vm10410_vm0, %v10409_v0 }
 0x1c0   : > { %9335 = vmatprep.subr.mxu0 %v10409_v0  ;;  %v1119_v31 = vpop.permute.xlu1 %1118 }
 0x1c1   : > { %v1121_v30 = vpop.permute.xlu0 %1120 }
 0x1c2   : > { %9328 = vmatmul.mubr.msk.f32.vlgmr.msra.gmra.mxu0 %vm626_vm2, %v954_v29 }
 0x1c3   : > { %9336 = vmatpush3.xpose.msk.msra.mxu0 %vm626_vm2, %v1121_v30  ;;  %9337 = vmatprep.mubr.msk.f32.mxu0 %vm10410_vm0, %v10409_v0  ;;  %v1304_v30 = vld [vmem:[#allocation7 + $0x78] sm:$0xff] }
 0x1c4   : > { %9345 = vmatprep.subr.mxu0 %v10409_v0 }
 0x1c6   : > { %9338 = vmatmul.mubr.msk.f32.vlgmr.msra.gmra.mxu0 %vm626_vm2, %v1119_v31  ;;  %v1303_v31 = vld [vmem:[#allocation7 + $0x70] sm:$0xff] }
 0x1c7   : > { %9353 = vmatprep.mubr.msk.f32.mxu0 %vm10410_vm0, %v10409_v0  ;;  %9346 = vmatpush3.msra.mxu0 %v1304_v30 }
 0x1c8   : > { %9347 = vmatprep.subr.mxu0 %v10409_v0 }
 0x1c9   : > { %9348 = vmatpush3.msra.mxu0 %v1303_v31 }
 0x1ca   : > { %9349 = vmatprep.subr.mxu0 %v10409_v0 }
 0x1cb   : > { %9350 = vmatpush3.msra.mxu0 %v1302_v36 }
 0x1cc   : > { %9351 = vmatprep.subr.mxu0 %v10409_v0 }
 0x1cd   : > { %9352 = vmatpush3.msra.mxu0 %v1301_v38 }
 0x1ce   : > { %9367 = vmatprep.subr.mxu0 %v10409_v0 }
 0x20a   : > { %v699_v40 = vpop.f32.mrf.mxu1 }
 0x20b   : > { %v700_v41 = vadd.f32 %v699_v40, %v10705_v39  ;;  %v1388_v40 = vld [vmem:[#allocation7 + $0x88] sm:$0xff] }
 0x20c   : > { %v9309_v42 = vpop.f32.mrf.mxu1 }
 0x20d   : > { %v703_v43 = vsel %vm626_vm2, %v700_v41, -inf  ;;  %v10749_v42 = vld [vmem:[%s272_s16] sm:$0xff]  ;;  %s10297_s16 = sshll.u32 %s10419_s13, 4  ;;  %s10298_s16 = int_to_ptr.vmem [resolvable:$false] %s10297_s16 }
 0x20e   : > { %704 = vmax.xlane.f32.xlu0 %v703_v43  ;;  %p10300_p5 = scmp.lt.s32.totalorder %s8617_s11, %s10298_s16 }
 0x27e   : > { %v861_v44 = vpop.f32.mrf.mxu0 }
 0x27f   : > { %v862_v45 = vadd.f32 %v861_v44, %v10705_v39 }
 0x280   : > { %v9319_v46 = vpop.f32.mrf.mxu0 }
 0x281   : > { %v865_v47 = vsel %vm626_vm2, %v862_v45, -inf }
 0x282   : > { %866 = vmax.xlane.f32.xlu1 %v865_v47  ;;  %v1027_v48 = vpop.f32.mrf.mxu0 }
 0x283   : > { %v1028_v49 = vadd.f32 %v1027_v48, %v10705_v39 }
 0x284   : > { %v9329_v50 = vpop.f32.mrf.mxu0 }
 0x285   : > { %v1031_v51 = vsel %vm626_vm2, %v1028_v49, -inf }
 0x286   : > { %1032 = vmax.xlane.f32.xlu0 %v1031_v51  ;;  %v1192_v52 = vpop.f32.mrf.mxu0 }
 0x287   : > { %v1193_v53 = vadd.f32 %v1192_v52, %v10705_v39 }
 0x288   : > { %v9339_v54 = vpop.f32.mrf.mxu0 }
 0x289   : > { %v1196_v55 = vsel %vm626_vm2, %v1193_v53, -inf  ;;  %v1476_v54 = vld [vmem:[#allocation7 + $0xb8] sm:$0xff] }
 0x28a   : > { %1197 = vmax.xlane.f32.xlu0 %v1196_v55 }
 0x293   : > { %877 = vrot.lane.b32.xlu1 %v10676_v24, %s10412_s3 }
 0x297   : > { %v705_v56 = vpop.xlane.xlu0 %704 }
 0x298   : > { %v706_v57 = vsub.f32 %v700_v41, %v705_v56  ;;  %v1387_v41 = vld [vmem:[#allocation7 + $0x80] sm:$0xff]  ;;  %v1475_v56 = vld [vmem:[#allocation7 + $0xb0] sm:$0xff] }
 0x29a   : > { %v707_v58 = vmul.f32 1.442695, %v706_v57  ;;  %v1474_v57 = vld [vmem:[#allocation7 + $0xa8] sm:$0xff] }
 0x29c   : > { %10057 = vpow2.f32 %v707_v58  ;;  %v1473_v58 = vld [vmem:[#allocation7 + $0xa0] sm:$0xff] }
 0x2a9   : > { %v10058_v59 = vpop.eup %10057 }
 0x2aa   : > { %v709_v60 = vsel %vm626_vm2, %v10058_v59, 0.0 }
 0x2b7   : > { %710 = vadd.xlane.f32.xlu1 %v709_v60 }
 0x30b   : > { %v867_v61 = vpop.xlane.xlu1 %866 }
 0x30c   : > { %v868_v62 = vsub.f32 %v862_v45, %v867_v61 }
 0x30e   : > { %v869_v63 = vmul.f32 1.442695, %v868_v62 }
 0x30f   : > { %v1033_v1 = vpop.xlane.xlu0 %1032  ;;  %v878_v13 = vpop.permute.xlu1 %877 }
 0x310   : > { %10059 = vpow2.f32 %v869_v63  ;;  %v1034_v2 = vsub.f32 %v1028_v49, %v1033_v1 }
 0x312   : > { %v1035_v3 = vmul.f32 1.442695, %v1034_v2  ;;  %v8820_v2 = vld [vmem:[#allocation8 + $0x5] ss:$0 sm:$0xff] }
 0x313   : > { %v1198_v4 = vpop.xlane.xlu0 %1197 }
 0x314   : > { %10061 = vpow2.f32 %v1035_v3  ;;  %v1199_v5 = vsub.f32 %v1193_v53, %v1198_v4 }
 0x316   : > { %v1200_v6 = vmul.f32 1.442695, %v1199_v5  ;;  %v1559_v5 = vld [vmem:[#allocation7 + $0xd8] sm:$0xff] }
 0x318   : > { %10063 = vpow2.f32 %v1200_v6 }
 0x31d   : > { %v10060_v7 = vpop.eup %10059 }
 0x31e   : > { %v871_v8 = vsel %vm626_vm2, %v10060_v7, 0.0 }
 0x31f   : > { %872 = vadd.xlane.f32.xlu0 %v871_v8  ;;  %v1557_v8 = vld [vmem:[#allocation7 + $0xc8] sm:$0xff] }
 0x321   : > { %v10062_v9 = vpop.eup %10061 }
 0x322   : > { %v1037_v10 = vsel %vm626_vm2, %v10062_v9, 0.0 }
 0x323   : > { %1038 = vadd.xlane.f32.xlu1 %v1037_v10 }
 0x325   : > { %v10064_v11 = vpop.eup %10063 }
 0x326   : > { %v1202_v12 = vsel %vm626_vm2, %v10064_v11, 0.0 }
 0x327   : > { %1203 = vadd.xlane.f32.xlu0 %v1202_v12 }
 0x334   : > { %1207 = vrot.lane.b32.xlu1 %v10676_v24, %s10413_s8 }
 0x33d   : > { %1042 = vrot.lane.b32.xlu0 %v10676_v24, %s10411_s24 }
 0x340   : > { %v711_v14 = vpop.xlane.xlu1 %710 }
 0x341   : > { %10065 = vrcp.f32 %v711_v14 }
 0x34e   : > { %v10066_v15 = vpop.eup %10065 }
 0x34f   : > { %v713_v16 = vmul.f32 %v10066_v15, %v10058_v59  ;;  %v8818_v59 = vld [vmem:[#allocation8 + $0x4] ss:$0 sm:$0xff] }
 0x351   : > { %9313 = vmatmul.mubr.msk.f32.vlgmr.msra.gmra.mxu1 %vm626_vm2, %v713_v16 }
 0x352   : > { %9321 = vmatpush3.msra.mxu1 %v878_v13  ;;  %9322 = vmatprep.mubr.msk.f32.mxu1 %vm10410_vm0, %v10409_v0 }
 0x353   : > { %9330 = vmatprep.subr.mxu1 %v10409_v0 }
 0x3a8   : > { %v873_v17 = vpop.xlane.xlu0 %872 }
 0x3a9   : > { %10067 = vrcp.f32 %v873_v17 }
 0x3ac   : > { %v1039_v18 = vpop.xlane.xlu1 %1038 }
 0x3ad   : > { %10069 = vrcp.f32 %v1039_v18 }
 0x3b0   : > { %v1204_v19 = vpop.xlane.xlu0 %1203  ;;  %v1208_v25 = vpop.permute.xlu1 %1207 }
 0x3b1   : > { %10071 = vrcp.f32 %v1204_v19 }
 0x3b4   : > { %v1043_v22 = vpop.permute.xlu0 %1042 }
 0x3b6   : > { %v10068_v20 = vpop.eup %10067 }
 0x3b7   : > { %v875_v21 = vmul.f32 %v10068_v20, %v10060_v7  ;;  %v1558_v7 = vld [vmem:[#allocation7 + $0xd0] sm:$0xff]  ;;  %v8822_v20 = vld [vmem:[#allocation8 + $0x6] ss:$0 sm:$0xff] }
 0x3b9   : > { %9323 = vmatmul.mubr.msk.f32.vlgmr.msra.gmra.mxu1 %vm626_vm2, %v875_v21 }
 0x3ba   : > { %v10070_v23 = vpop.eup %10069  ;;  %9331 = vmatpush3.msra.mxu1 %v1043_v22  ;;  %9332 = vmatprep.mubr.msk.f32.mxu1 %vm10410_vm0, %v10409_v0 }
 0x3bb   : > { %9340 = vmatprep.subr.mxu1 %v10409_v0  ;;  %v1041_v24 = vmul.f32 %v10070_v23, %v10062_v9  ;;  %v1556_v9 = vld [vmem:[#allocation7 + $0xc0] sm:$0xff] }
 0x3bd   : > { %9333 = vmatmul.mubr.msk.f32.vlgmr.msra.gmra.mxu1 %vm626_vm2, %v1041_v24 }
 0x3be   : > { %v10072_v26 = vpop.eup %10071  ;;  %9341 = vmatpush3.msra.mxu1 %v1208_v25  ;;  %9342 = vmatprep.mubr.msk.f32.mxu1 %vm10410_vm0, %v10409_v0 }
 0x3bf   : > { %v1206_v27 = vmul.f32 %v10072_v26, %v10064_v11  ;;  %9356 = vmatprep.subr.mxu1 %v10409_v0 }
 0x3c1   : > { %9343 = vmatmul.mubr.msk.f32.vlgmr.msra.gmra.mxu1 %vm626_vm2, %v1206_v27 }
 0x3c2   : > { %9364 = vmatprep.mubr.msk.f32.mxu1 %vm10410_vm0, %v10409_v0  ;;  %9357 = vmatpush3.msra.mxu1 %v1390_v32 }
 0x3c3   : > { %9358 = vmatprep.subr.mxu1 %v10409_v0 }
 0x3c4   : > { %9359 = vmatpush3.msra.mxu1 %v1389_v37 }
 0x3c5   : > { %9360 = vmatprep.subr.mxu1 %v10409_v0 }
 0x3c6   : > { %9361 = vmatpush3.msra.mxu1 %v1388_v40 }
 0x3c7   : > { %9362 = vmatprep.subr.mxu1 %v10409_v0 }
 0x3c8   : > { %9363 = vmatpush3.msra.mxu1 %v1387_v41 }
 0x3c9   : > { %9365 = vmatmul.mubr.msk.f32.vlgmr.msra.gmra.mxu1 %vm386_vm1, %v10749_v42  ;;  %9378 = vmatprep.subr.mxu1 %v10409_v0 }
 0x3ca   : > { %9386 = vmatprep.mubr.msk.f32.mxu1 %vm10410_vm0, %v10409_v0  ;;  %9379 = vmatpush3.msra.mxu1 %v1559_v5 }
 0x3cb   : > { %9380 = vmatprep.subr.mxu1 %v10409_v0 }
 0x3cc   : > { %9381 = vmatpush3.msra.mxu1 %v1558_v7 }
 0x3cd   : > { %9382 = vmatprep.subr.mxu1 %v10409_v0 }
 0x3ce   : > { %9383 = vmatpush3.msra.mxu1 %v1557_v8 }
 0x3cf   : > { %9384 = vmatprep.subr.mxu1 %v10409_v0 }
 0x3d0   : > { %9385 = vmatpush3.msra.mxu1 %v1556_v9 }
 0x3d1   : > { %9387 = vmatmul.mubr.msk.f32.vlgmr.msra.gmra.mxu1 %vm386_vm1, %v10749_v42  ;;  %9394 = vmatprep.subr.mxu1 %v10409_v0 }
 0x3d2   : > { %9396 = vmatprep.mubr.msk.f32.mxu1 %vm10410_vm0, %v10409_v0 }
 0x411   : > { %v783_v28 = vpop.f32.mrf.mxu1 }
 0x413   : > { %v9314_v29 = vpop.f32.mrf.mxu1 }
 0x479   : > { %v949_v43 = vpop.f32.mrf.mxu1 }
 0x47a   : > { %1284 = vrot.lane.b32.xlu1 %v949_v43, %s10415_s29 }
 0x47b   : > { %v9324_v44 = vpop.f32.mrf.mxu1 }
 0x47d   : > { %v1114_v45 = vpop.f32.mrf.mxu1 }
 0x47e   : > { %1288 = vrot.lane.b32.xlu0 %v1114_v45, %s10416_s7 }
 0x47f   : > { %v9334_v46 = vpop.f32.mrf.mxu1 }
 0x481   : > { %v1279_v47 = vpop.f32.mrf.mxu1 }
 0x482   : > { %1292 = vrot.lane.b32.xlu1 %v1279_v47, %s10417_s15 }
 0x483   : > { %v9344_v48 = vpop.f32.mrf.mxu1 }
 0x489   : > { %v1468_v60 = vpop.f32.mrf.mxu1 }
 0x48a   : > { %v1469_v61 = vadd.f32 %v8818_v59, %v1468_v60 }
 0x48b   : > { %v9366_v62 = vpop.f32.mrf.mxu1 }
 0x48c   : > { %1798 = vrot.lane.b32.xlu1 %v1469_v61, %s10412_s3 }
 0x490   : > { %1964 = vrot.lane.b32.xlu1 %v1469_v61, %s10411_s24 }
 0x491   : > { %v1634_v21 = vpop.f32.mrf.mxu1 }
 0x492   : > { %v1635_v22 = vadd.f32 %v8822_v20, %v1634_v21  ;;  %v2313_v21 = vld [vmem:[#allocation7 + $0xf8] sm:$0xff] }
 0x493   : > { %v9388_v23 = vpop.f32.mrf.mxu1 }
 0x494   : > { %2129 = vrot.lane.b32.xlu1 %v1469_v61, %s10413_s8  ;;  %9395 = vmatpush3.msra.mxu1 %v1635_v22  ;;  %v2310_v23 = vld [vmem:[#allocation7 + $0xe0] sm:$0xff] }
 0x495   : > { %9404 = vmatprep.subr.mxu1 %v10409_v0 }
 0x4ec   : > { %v1285_v49 = vpop.permute.xlu1 %1284 }
 0x4ed   : > { %v1295_v51 = vsel %vm626_vm2, %v783_v28, %v1285_v49 }
 0x4f0   : > { %v1289_v50 = vpop.permute.xlu0 %1288 }
 0x4f1   : > { %v1297_v52 = vsel %vm1296_vm4, %v1295_v51, %v1289_v50 }
 0x4f4   : > { %v1293_v53 = vpop.permute.xlu1 %1292 }
 0x4f5   : > { %v1299_v55 = vsel %vm1298_vm5, %v1297_v52, %v1293_v53 }
 0x4f6   : > { %9354 = vmatmul.mubr.msk.f32.vlgmr.msra.gmra.mxu0 %vm386_vm1, %v1299_v55 }
 0x4f7   : > { %9368 = vmatpush3.msra.mxu0 %v1476_v54  ;;  %9375 = vmatprep.mubr.msk.f32.mxu0 %vm10410_vm0, %v10409_v0 }
 0x4f8   : > { %9369 = vmatprep.subr.mxu0 %v10409_v0 }
 0x4f9   : > { %9370 = vmatpush3.msra.mxu0 %v1475_v56 }
 0x4fa   : > { %9371 = vmatprep.subr.mxu0 %v10409_v0 }
 0x4fb   : > { %9372 = vmatpush3.msra.mxu0 %v1474_v57 }
 0x4fc   : > { %9373 = vmatprep.subr.mxu0 %v10409_v0 }
 0x4fd   : > { %9374 = vmatpush3.msra.mxu0 %v1473_v58 }
 0x4fe   : > { %9376 = vmatmul.mubr.msk.f32.vlgmr.msra.gmra.mxu0 %vm386_vm1, %v10749_v42  ;;  %9389 = vmatprep.subr.mxu0 %v10409_v0  ;;  %v1799_v10 = vpop.permute.xlu1 %1798 }
 0x4ff   : > { %9391 = vmatprep.mubr.msk.f32.mxu0 %vm10410_vm0, %v10409_v0 }
 0x502   : > { %v1965_v13 = vpop.permute.xlu1 %1964 }
 0x506   : > { %v2130_v15 = vpop.permute.xlu1 %2129 }
 0x5b6   : > { %v10776_v63 = vpop.f32.mrf.mxu0 }
 0x5b8   : > { %v9355_v1 = vpop.f32.mrf.mxu0 }
 0x5be   : > { %v1551_v3 = vpop.f32.mrf.mxu0 }
 0x5bf   : > { %v1552_v4 = vadd.f32 %v8820_v2, %v1551_v3 }
 0x5c0   : > { %v9377_v6 = vpop.f32.mrf.mxu0 }
 0x5c1   : > { %1800 = vrot.lane.b32.xlu0 %v1552_v4, %s10412_s3  ;;  %9390 = vmatpush3.xpose.msk.msra.mxu0 %vm626_vm2, %v1552_v4 }
 0x5c2   : > { %9399 = vmatprep.subr.mxu0 %v10409_v0 }
 0x5c4   : > { %9392 = vmatmul.mubr.msk.f32.vlgmr.msra.gmra.mxu0 %vm626_vm2, %v1469_v61 }
 0x5c5   : > { %1966 = vrot.lane.b32.xlu0 %v1552_v4, %s10411_s24  ;;  %9401 = vmatprep.mubr.msk.f32.mxu0 %vm10410_vm0, %v10409_v0 }
 0x5c9   : > { %2131 = vrot.lane.b32.xlu0 %v1552_v4, %s10413_s8 }
 0x633   : > { %v1801_v11 = vpop.permute.xlu0 %1800 }
 0x634   : > { %9400 = vmatpush3.xpose.msk.msra.mxu0 %vm626_vm2, %v1801_v11 }
 0x635   : > { %9409 = vmatprep.subr.mxu0 %v10409_v0 }
 0x637   : > { %v1967_v12 = vpop.permute.xlu0 %1966  ;;  %9402 = vmatmul.mubr.msk.f32.vlgmr.msra.gmra.mxu0 %vm626_vm2, %v1799_v10 }
 0x638   : > { %9410 = vmatpush3.xpose.msk.msra.mxu0 %vm626_vm2, %v1967_v12  ;;  %9411 = vmatprep.mubr.msk.f32.mxu0 %vm10410_vm0, %v10409_v0 }
 0x639   : > { %9419 = vmatprep.subr.mxu0 %v10409_v0 }
 0x63b   : > { %v2132_v14 = vpop.permute.xlu0 %2131  ;;  %9412 = vmatmul.mubr.msk.f32.vlgmr.msra.gmra.mxu0 %vm626_vm2, %v1965_v13  ;;  %v2399_v13 = vld [vmem:[#allocation7 + $0x118] sm:$0xff] }
 0x63c   : > { %9420 = vmatpush3.xpose.msk.msra.mxu0 %vm626_vm2, %v2132_v14  ;;  %9421 = vmatprep.mubr.msk.f32.mxu0 %vm10410_vm0, %v10409_v0  ;;  %v2398_v14 = vld [vmem:[#allocation7 + $0x110] sm:$0xff] }
 0x63d   : > { %9429 = vmatprep.subr.mxu0 %v10409_v0 }
 0x63f   : > { %9422 = vmatmul.mubr.msk.f32.vlgmr.msra.gmra.mxu0 %vm626_vm2, %v2130_v15  ;;  %v2397_v15 = vld [vmem:[#allocation7 + $0x108] sm:$0xff] }
 0x640   : > { %9437 = vmatprep.mubr.msk.f32.mxu0 %vm10410_vm0, %v10409_v0  ;;  %9430 = vmatpush3.msra.mxu0 %v2313_v21 }
 0x641   : > { %9431 = vmatprep.subr.mxu0 %v10409_v0 }
 0x684   : > { %v1710_v16 = vpop.f32.mrf.mxu0 }
 0x685   : > { %v1711_v17 = vadd.f32 %v1710_v16, %v10705_v39  ;;  %v8816_v16 = vld [vmem:[#allocation8 + $0x3] ss:$0 sm:$0xff] }
 0x686   : > { %v9393_v18 = vpop.f32.mrf.mxu0 }
 0x687   : > { %v1714_v19 = vsel %vm626_vm2, %v1711_v17, -inf  ;;  %v10843_v18 = vadd.f32 %v8816_v16, %v10776_v63  ;;  %v2311_v63 = vld [vmem:[#allocation7 + $0xe8] sm:$0xff] }
 0x688   : > { %1715 = vmax.xlane.f32.xlu0 %v1714_v19 }
 0x6f7   : > { %v1872_v24 = vpop.f32.mrf.mxu0 }
 0x6f8   : > { %v1873_v25 = vadd.f32 %v1872_v24, %v10705_v39 }
 0x6f9   : > { %v9403_v26 = vpop.f32.mrf.mxu0 }
 0x6fa   : > { %v1876_v27 = vsel %vm626_vm2, %v1873_v25, -inf }
 0x6fb   : > { %1877 = vmax.xlane.f32.xlu1 %v1876_v27  ;;  %v2038_v28 = vpop.f32.mrf.mxu0 }
 0x6fc   : > { %v2039_v29 = vadd.f32 %v2038_v28, %v10705_v39 }
 0x6fd   : > { %v9413_v30 = vpop.f32.mrf.mxu0 }
 0x6fe   : > { %v2042_v31 = vsel %vm626_vm2, %v2039_v29, -inf  ;;  %v2571_v30 = vld [vmem:[#allocation7 + $0x158] sm:$0xff] }
 0x6ff   : > { %2043 = vmax.xlane.f32.xlu0 %v2042_v31  ;;  %v2203_v32 = vpop.f32.mrf.mxu0  ;;  %v8838_v31 = vld [vmem:[#allocation8 + $0x8] ss:$0 sm:$0xff] }
 0x700   : > { %v2204_v36 = vadd.f32 %v2203_v32, %v10705_v39  ;;  %v2570_v32 = vld [vmem:[#allocation7 + $0x150] sm:$0xff] }
 0x701   : > { %v9423_v37 = vpop.f32.mrf.mxu0 }
 0x702   : > { %v2207_v38 = vsel %vm626_vm2, %v2204_v36, -inf }
 0x703   : > { %2208 = vmax.xlane.f32.xlu0 %v2207_v38 }
 0x70c   : > { %1888 = vrot.lane.b32.xlu1 %v1635_v22, %s10412_s3 }
 0x711   : > { %v1716_v40 = vpop.xlane.xlu0 %1715 }
 0x712   : > { %v1717_v41 = vsub.f32 %v1711_v17, %v1716_v40  ;;  %v2396_v17 = vld [vmem:[#allocation7 + $0x100] sm:$0xff] }
 0x714   : > { %v1718_v42 = vmul.f32 1.442695, %v1717_v41 }
 0x716   : > { %10073 = vpow2.f32 %v1718_v42 }
 0x723   : > { %v10074_v43 = vpop.eup %10073 }
 0x724   : > { %v1720_v44 = vsel %vm626_vm2, %v10074_v43, 0.0 }
 0x730   : > { %1721 = vadd.xlane.f32.xlu1 %v1720_v44 }
 0x784   : > { %v1878_v45 = vpop.xlane.xlu1 %1877 }
 0x785   : > { %v1879_v46 = vsub.f32 %v1873_v25, %v1878_v45  ;;  %v2485_v45 = vld [vmem:[#allocation7 + $0x138] sm:$0xff] }
 0x787   : > { %v1880_v47 = vmul.f32 1.442695, %v1879_v46 }
 0x788   : > { %v2044_v48 = vpop.xlane.xlu0 %2043  ;;  %v1889_v60 = vpop.permute.xlu1 %1888 }
 0x789   : > { %10075 = vpow2.f32 %v1880_v47  ;;  %v2045_v49 = vsub.f32 %v2039_v29, %v2044_v48  ;;  %v2484_v47 = vld [vmem:[#allocation7 + $0x130] sm:$0xff]  ;;  %v2483_v48 = vld [vmem:[#allocation7 + $0x128] sm:$0xff] }
 0x78b   : > { %v2046_v50 = vmul.f32 1.442695, %v2045_v49  ;;  %v2569_v49 = vld [vmem:[#allocation7 + $0x148] sm:$0xff] }
 0x78c   : > { %v2209_v51 = vpop.xlane.xlu0 %2208 }
 0x78d   : > { %10077 = vpow2.f32 %v2046_v50  ;;  %v2210_v52 = vsub.f32 %v2204_v36, %v2209_v51  ;;  %v2482_v50 = vld [vmem:[#allocation7 + $0x120] sm:$0xff] }
 0x78e   : > { %v2568_v51 = vld [vmem:[#allocation7 + $0x140] sm:$0xff] }
 0x78f   : > { %v2211_v53 = vmul.f32 1.442695, %v2210_v52  ;;  %v8836_v52 = vld [vmem:[#allocation8 + $0x7] ss:$0 sm:$0xff] }
 0x791   : > { %10079 = vpow2.f32 %v2211_v53 }
 0x796   : > { %v10076_v54 = vpop.eup %10075 }
 0x797   : > { %v1882_v55 = vsel %vm626_vm2, %v10076_v54, 0.0 }
 0x798   : > { %1883 = vadd.xlane.f32.xlu0 %v1882_v55 }
 0x79a   : > { %v10078_v56 = vpop.eup %10077 }
 0x79b   : > { %v2048_v57 = vsel %vm626_vm2, %v10078_v56, 0.0 }
 0x79c   : > { %2049 = vadd.xlane.f32.xlu1 %v2048_v57  ;;  %v8842_v57 = vld [vmem:[#allocation8 + $0xa] ss:$0 sm:$0xff] }
 0x79e   : > { %v10080_v58 = vpop.eup %10079 }
 0x79f   : > { %v2213_v59 = vsel %vm626_vm2, %v10080_v58, 0.0 }
 0x7a0   : > { %2214 = vadd.xlane.f32.xlu0 %v2213_v59 }
 0x7ad   : > { %2218 = vrot.lane.b32.xlu1 %v1635_v22, %s10413_s8 }
 0x7b6   : > { %2053 = vrot.lane.b32.xlu0 %v1635_v22, %s10411_s24  ;;  %v2312_v22 = vld [vmem:[#allocation7 + $0xf0] sm:$0xff] }
 0x7b7   : > { %9432 = vmatpush3.msra.mxu0 %v2312_v22 }
 0x7b8   : > { %9433 = vmatprep.subr.mxu0 %v10409_v0 }
 0x7b9   : > { %v1722_v61 = vpop.xlane.xlu1 %1721  ;;  %9434 = vmatpush3.msra.mxu0 %v2311_v63 }
 0x7ba   : > { %10081 = vrcp.f32 %v1722_v61  ;;  %9435 = vmatprep.subr.mxu0 %v10409_v0 }
 0x7bb   : > { %9436 = vmatpush3.msra.mxu0 %v2310_v23 }
 0x7bc   : > { %9451 = vmatprep.subr.mxu0 %v10409_v0 }
 0x7c7   : > { %v10082_v62 = vpop.eup %10081 }
 0x7c8   : > { %v1724_v1 = vmul.f32 %v10082_v62, %v10074_v43 }
 0x7ca   : > { %9397 = vmatmul.mubr.msk.f32.vlgmr.msra.gmra.mxu1 %vm626_vm2, %v1724_v1 }
 0x7cb   : > { %9405 = vmatpush3.msra.mxu1 %v1889_v60  ;;  %9406 = vmatprep.mubr.msk.f32.mxu1 %vm10410_vm0, %v10409_v0 }
 0x7cc   : > { %9414 = vmatprep.subr.mxu1 %v10409_v0 }
 0x821   : > { %v1884_v2 = vpop.xlane.xlu0 %1883 }
 0x822   : > { %10083 = vrcp.f32 %v1884_v2 }
 0x825   : > { %v2050_v3 = vpop.xlane.xlu1 %2049 }
 0x826   : > { %10085 = vrcp.f32 %v2050_v3 }
 0x829   : > { %v2215_v4 = vpop.xlane.xlu0 %2214  ;;  %v2219_v10 = vpop.permute.xlu1 %2218 }
 0x82a   : > { %10087 = vrcp.f32 %v2215_v4 }
 0x82d   : > { %v2054_v7 = vpop.permute.xlu0 %2053 }
 0x82f   : > { %v10084_v5 = vpop.eup %10083 }
 0x830   : > { %v1886_v6 = vmul.f32 %v10084_v5, %v10076_v54 }
 0x832   : > { %9407 = vmatmul.mubr.msk.f32.vlgmr.msra.gmra.mxu1 %vm626_vm2, %v1886_v6 }
 0x833   : > { %v10086_v8 = vpop.eup %10085  ;;  %9415 = vmatpush3.msra.mxu1 %v2054_v7  ;;  %9416 = vmatprep.mubr.msk.f32.mxu1 %vm10410_vm0, %v10409_v0 }
 0x834   : > { %9424 = vmatprep.subr.mxu1 %v10409_v0  ;;  %v2052_v9 = vmul.f32 %v10086_v8, %v10078_v56  ;;  %v8840_v56 = vld [vmem:[#allocation8 + $0x9] ss:$0 sm:$0xff] }
 0x836   : > { %9417 = vmatmul.mubr.msk.f32.vlgmr.msra.gmra.mxu1 %vm626_vm2, %v2052_v9 }
 0x837   : > { %v10088_v11 = vpop.eup %10087  ;;  %9425 = vmatpush3.msra.mxu1 %v2219_v10  ;;  %9426 = vmatprep.mubr.msk.f32.mxu1 %vm10410_vm0, %v10409_v0 }
 0x838   : > { %9440 = vmatprep.subr.mxu1 %v10409_v0  ;;  %v2217_v12 = vmul.f32 %v10088_v11, %v10080_v58 }
 0x83a   : > { %9427 = vmatmul.mubr.msk.f32.vlgmr.msra.gmra.mxu1 %vm626_vm2, %v2217_v12 }
 0x83b   : > { %9441 = vmatpush3.msra.mxu1 %v2399_v13  ;;  %9448 = vmatprep.mubr.msk.f32.mxu1 %vm10410_vm0, %v10409_v0 }
 0x83c   : > { %9442 = vmatprep.subr.mxu1 %v10409_v0 }
 0x83d   : > { %9443 = vmatpush3.msra.mxu1 %v2398_v14 }
 0x83e   : > { %9444 = vmatprep.subr.mxu1 %v10409_v0 }
 0x83f   : > { %9445 = vmatpush3.msra.mxu1 %v2397_v15 }
 0x840   : > { %9446 = vmatprep.subr.mxu1 %v10409_v0 }
 0x841   : > { %9447 = vmatpush3.msra.mxu1 %v2396_v17 }
 0x842   : > { %9449 = vmatmul.mubr.msk.f32.vlgmr.msra.gmra.mxu1 %vm386_vm1, %v10843_v18  ;;  %9462 = vmatprep.subr.mxu1 %v10409_v0 }
 0x843   : > { %9470 = vmatprep.mubr.msk.f32.mxu1 %vm10410_vm0, %v10409_v0  ;;  %9463 = vmatpush3.msra.mxu1 %v2571_v30 }
 0x844   : > { %9464 = vmatprep.subr.mxu1 %v10409_v0 }
 0x845   : > { %9465 = vmatpush3.msra.mxu1 %v2570_v32 }
 0x846   : > { %9466 = vmatprep.subr.mxu1 %v10409_v0 }
 0x847   : > { %9467 = vmatpush3.msra.mxu1 %v2569_v49 }
 0x848   : > { %9468 = vmatprep.subr.mxu1 %v10409_v0 }
 0x849   : > { %9469 = vmatpush3.msra.mxu1 %v2568_v51 }
 0x84a   : > { %9478 = vmatprep.subr.mxu1 %v10409_v0 }
 0x88a   : > { %v1794_v19 = vpop.f32.mrf.mxu1 }
 0x88c   : > { %v9398_v20 = vpop.f32.mrf.mxu1 }
 0x8f2   : > { %v1960_v24 = vpop.f32.mrf.mxu1 }
 0x8f3   : > { %2295 = vrot.lane.b32.xlu1 %v1960_v24, %s10415_s29 }
 0x8f4   : > { %v9408_v25 = vpop.f32.mrf.mxu1 }
 0x8f6   : > { %v2125_v26 = vpop.f32.mrf.mxu1 }
 0x8f7   : > { %2299 = vrot.lane.b32.xlu0 %v2125_v26, %s10416_s7 }
 0x8f8   : > { %v9418_v27 = vpop.f32.mrf.mxu1 }
 0x8fa   : > { %v2290_v28 = vpop.f32.mrf.mxu1 }
 0x8fb   : > { %2303 = vrot.lane.b32.xlu1 %v2290_v28, %s10417_s15 }
 0x8fc   : > { %v9428_v29 = vpop.f32.mrf.mxu1 }
 0x902   : > { %v2477_v36 = vpop.f32.mrf.mxu1 }
 0x903   : > { %v2478_v37 = vadd.f32 %v8838_v31, %v2477_v36 }
 0x904   : > { %v9450_v38 = vpop.f32.mrf.mxu1 }
 0x905   : > { %2810 = vrot.lane.b32.xlu1 %v2478_v37, %s10412_s3 }
 0x909   : > { %2976 = vrot.lane.b32.xlu1 %v2478_v37, %s10411_s24 }
 0x90d   : > { %3141 = vrot.lane.b32.xlu1 %v2478_v37, %s10413_s8 }
 0x965   : > { %v2296_v40 = vpop.permute.xlu1 %2295 }
 0x966   : > { %v2306_v42 = vsel %vm626_vm2, %v1794_v19, %v2296_v40 }
 0x969   : > { %v2300_v41 = vpop.permute.xlu0 %2299 }
 0x96a   : > { %v2307_v43 = vsel %vm1296_vm4, %v2306_v42, %v2300_v41 }
 0x96d   : > { %v2304_v44 = vpop.permute.xlu1 %2303 }
 0x96e   : > { %v2308_v46 = vsel %vm1298_vm5, %v2307_v43, %v2304_v44 }
 0x96f   : > { %9438 = vmatmul.mubr.msk.f32.vlgmr.msra.gmra.mxu0 %vm386_vm1, %v2308_v46 }
 0x970   : > { %9452 = vmatpush3.msra.mxu0 %v2485_v45  ;;  %9459 = vmatprep.mubr.msk.f32.mxu0 %vm10410_vm0, %v10409_v0 }
 0x971   : > { %9453 = vmatprep.subr.mxu0 %v10409_v0 }
 0x972   : > { %9454 = vmatpush3.msra.mxu0 %v2484_v47 }
 0x973   : > { %9455 = vmatprep.subr.mxu0 %v10409_v0 }
 0x974   : > { %9456 = vmatpush3.msra.mxu0 %v2483_v48 }
 0x975   : > { %9457 = vmatprep.subr.mxu0 %v10409_v0 }
 0x976   : > { %9458 = vmatpush3.msra.mxu0 %v2482_v50 }
 0x977   : > { %9473 = vmatprep.subr.mxu0 %v10409_v0  ;;  %v2811_v2 = vpop.permute.xlu1 %2810 }
 0x97b   : > { %v2977_v5 = vpop.permute.xlu1 %2976 }
 0x97f   : > { %v3142_v7 = vpop.permute.xlu1 %3141 }
 0xa2f   : > { %v2391_v53 = vpop.f32.mrf.mxu0 }
 0xa30   : > { %v10875_v54 = vadd.f32 %v8836_v52, %v2391_v53 }
 0xa31   : > { %v9439_v55 = vpop.f32.mrf.mxu0 }
 0xa32   : > { %9460 = vmatmul.mubr.msk.f32.vlgmr.msra.gmra.mxu0 %vm386_vm1, %v10875_v54  ;;  %9471 = vmatmul.mubr.msk.f32.vlgmr.msra.gmra.mxu1 %vm386_vm1, %v10875_v54 }
 0xa33   : > { %9475 = vmatprep.mubr.msk.f32.mxu0 %vm10410_vm0, %v10409_v0  ;;  %9480 = vmatprep.mubr.msk.f32.mxu1 %vm10410_vm0, %v10409_v0 }
 0xaf2   : > { %v2563_v58 = vpop.f32.mrf.mxu0  ;;  %v2646_v59 = vpop.f32.mrf.mxu1 }
 0xaf3   : > { %v2564_v60 = vadd.f32 %v8840_v56, %v2563_v58  ;;  %v10885_v61 = vadd.f32 %v8842_v57, %v2646_v59 }
 0xaf4   : > { %v9461_v62 = vpop.f32.mrf.mxu0  ;;  %v9472_v1 = vpop.f32.mrf.mxu1 }
 0xaf5   : > { %9479 = vmatpush3.msra.mxu1 %v10885_v61  ;;  %2812 = vrot.lane.b32.xlu0 %v2564_v60, %s10412_s3 }
 0xaf6   : > { %9474 = vmatpush3.xpose.msk.msra.mxu0 %vm626_vm2, %v2564_v60  ;;  %9488 = vmatprep.subr.mxu1 %v10409_v0 }
 0xaf7   : > { %9483 = vmatprep.subr.mxu0 %v10409_v0 }
 0xaf9   : > { %9476 = vmatmul.mubr.msk.f32.vlgmr.msra.gmra.mxu0 %vm626_vm2, %v2478_v37  ;;  %2978 = vrot.lane.b32.xlu0 %v2564_v60, %s10411_s24 }
 0xafa   : > { %9485 = vmatprep.mubr.msk.f32.mxu0 %vm10410_vm0, %v10409_v0 }
 0xafd   : > { %3143 = vrot.lane.b32.xlu0 %v2564_v60, %s10413_s8 }
 0xb67   : > { %v2813_v3 = vpop.permute.xlu0 %2812 }
 0xb68   : > { %9484 = vmatpush3.xpose.msk.msra.mxu0 %vm626_vm2, %v2813_v3  ;;  %v3410_v3 = vld [vmem:[#allocation7 + $0x190] sm:$0xff] }
 0xb69   : > { %9493 = vmatprep.subr.mxu0 %v10409_v0 }
 0xb6b   : > { %v2979_v4 = vpop.permute.xlu0 %2978  ;;  %9486 = vmatmul.mubr.msk.f32.vlgmr.msra.gmra.mxu0 %vm626_vm2, %v2811_v2  ;;  %v3411_v2 = vld [vmem:[#allocation7 + $0x198] sm:$0xff] }
 0xb6c   : > { %9494 = vmatpush3.xpose.msk.msra.mxu0 %vm626_vm2, %v2979_v4  ;;  %9495 = vmatprep.mubr.msk.f32.mxu0 %vm10410_vm0, %v10409_v0  ;;  %v3409_v4 = vld [vmem:[#allocation7 + $0x188] sm:$0xff] }
 0xb6d   : > { %9503 = vmatprep.subr.mxu0 %v10409_v0 }
 0xb6f   : > { %v3144_v6 = vpop.permute.xlu0 %3143  ;;  %9496 = vmatmul.mubr.msk.f32.vlgmr.msra.gmra.mxu0 %vm626_vm2, %v2977_v5  ;;  %v3408_v5 = vld [vmem:[#allocation7 + $0x180] sm:$0xff] }
 0xb70   : > { %9504 = vmatpush3.xpose.msk.msra.mxu0 %vm626_vm2, %v3144_v6  ;;  %9505 = vmatprep.mubr.msk.f32.mxu0 %vm10410_vm0, %v10409_v0  ;;  %v3577_v6 = vld [vmem:[#allocation7 + $0x1d8] sm:$0xff] }
 0xb71   : > { %9513 = vmatprep.subr.mxu0 %v10409_v0 }
 0xb73   : > { %9506 = vmatmul.mubr.msk.f32.vlgmr.msra.gmra.mxu0 %vm626_vm2, %v3142_v7  ;;  %v3576_v7 = vld [vmem:[#allocation7 + $0x1d0] sm:$0xff] }
 0xb74   : > { %9521 = vmatprep.mubr.msk.f32.mxu0 %vm10410_vm0, %v10409_v0 }
 0xbb9   : > { %v2722_v8 = vpop.f32.mrf.mxu0 }
 0xbba   : > { %v2723_v9 = vadd.f32 %v2722_v8, %v10705_v39  ;;  %v3575_v8 = vld [vmem:[#allocation7 + $0x1c8] sm:$0xff] }
 0xbbb   : > { %v9477_v10 = vpop.f32.mrf.mxu0 }
 0xbbc   : > { %v2726_v11 = vsel %vm626_vm2, %v2723_v9, -inf }
 0xbbd   : > { %2727 = vmax.xlane.f32.xlu0 %v2726_v11  ;;  %v3325_v11 = vld [vmem:[#allocation7 + $0x178] sm:$0xff] }
 0xbbe   : > { %9514 = vmatpush3.msra.mxu0 %v3325_v11 }
 0xbbf   : > { %9515 = vmatprep.subr.mxu0 %v10409_v0 }
 0xc2b   : > { %v2884_v12 = vpop.f32.mrf.mxu0 }
 0xc2c   : > { %v2885_v13 = vadd.f32 %v2884_v12, %v10705_v39  ;;  %v3324_v12 = vld [vmem:[#allocation7 + $0x170] sm:$0xff] }
 0xc2d   : > { %v9487_v14 = vpop.f32.mrf.mxu0  ;;  %9516 = vmatpush3.msra.mxu0 %v3324_v12 }
 0xc2e   : > { %v2888_v15 = vsel %vm626_vm2, %v2885_v13, -inf  ;;  %9517 = vmatprep.subr.mxu0 %v10409_v0  ;;  %v3322_v14 = vld [vmem:[#allocation7 + $0x160] sm:$0xff] }
 0xc2f   : > { %2889 = vmax.xlane.f32.xlu1 %v2888_v15  ;;  %v3050_v16 = vpop.f32.mrf.mxu0 }
 0xc30   : > { %v3051_v17 = vadd.f32 %v3050_v16, %v10705_v39 }
 0xc31   : > { %v9497_v19 = vpop.f32.mrf.mxu0 }
 0xc32   : > { %v3054_v20 = vsel %vm626_vm2, %v3051_v17, -inf }
 0xc33   : > { %3055 = vmax.xlane.f32.xlu0 %v3054_v20  ;;  %v3215_v21 = vpop.f32.mrf.mxu0 }
 0xc34   : > { %v3216_v22 = vadd.f32 %v3215_v21, %v10705_v39 }
 0xc35   : > { %v9507_v63 = vpop.f32.mrf.mxu0 }
 0xc36   : > { %v3219_v23 = vsel %vm626_vm2, %v3216_v22, -inf }
 0xc37   : > { %3220 = vmax.xlane.f32.xlu0 %v3219_v23 }
 0xc40   : > { %2900 = vrot.lane.b32.xlu1 %v10885_v61, %s10412_s3 }
 0xc46   : > { %v2728_v24 = vpop.xlane.xlu0 %2727 }
 0xc47   : > { %v2729_v25 = vsub.f32 %v2723_v9, %v2728_v24  ;;  %v3574_v9 = vld [vmem:[#allocation7 + $0x1c0] sm:$0xff] }
 0xc49   : > { %v2730_v26 = vmul.f32 1.442695, %v2729_v25  ;;  %v8862_v25 = vld [vmem:[#allocation8 + $0xe] ss:$0 sm:$0xff] }
 0xc4b   : > { %10089 = vpow2.f32 %v2730_v26 }
 0xc58   : > { %v10090_v27 = vpop.eup %10089 }
 0xc59   : > { %v2732_v28 = vsel %vm626_vm2, %v10090_v27, 0.0 }
 0xc64   : > { %2733 = vadd.xlane.f32.xlu1 %v2732_v28 }
 0xcb8   : > { %v2890_v29 = vpop.xlane.xlu1 %2889 }
 0xcb9   : > { %v2891_v30 = vsub.f32 %v2885_v13, %v2890_v29  ;;  %v3323_v13 = vld [vmem:[#allocation7 + $0x168] sm:$0xff] }
 0xcba   : > { %9518 = vmatpush3.msra.mxu0 %v3323_v13 }
 0xcbb   : > { %v2892_v31 = vmul.f32 1.442695, %v2891_v30  ;;  %9519 = vmatprep.subr.mxu0 %v10409_v0 }
 0xcbc   : > { %v3056_v32 = vpop.xlane.xlu0 %3055  ;;  %v2901_v48 = vpop.permute.xlu1 %2900  ;;  %9520 = vmatpush3.msra.mxu0 %v3322_v14 }
 0xcbd   : > { %10091 = vpow2.f32 %v2892_v31  ;;  %v3057_v36 = vsub.f32 %v3051_v17, %v3056_v32  ;;  %9535 = vmatprep.subr.mxu0 %v10409_v0 }
 0xcbf   : > { %v3058_v37 = vmul.f32 1.442695, %v3057_v36 }
 0xcc0   : > { %v3221_v38 = vpop.xlane.xlu0 %3220 }
 0xcc1   : > { %10093 = vpow2.f32 %v3058_v37  ;;  %v3222_v40 = vsub.f32 %v3216_v22, %v3221_v38  ;;  %v8858_v22 = vld [vmem:[#allocation8 + $0xc] ss:$0 sm:$0xff]  ;;  %v3494_v37 = vld [vmem:[#allocation7 + $0x1b8] sm:$0xff] }
 0xcc3   : > { %v3223_v41 = vmul.f32 1.442695, %v3222_v40  ;;  %v3493_v40 = vld [vmem:[#allocation7 + $0x1b0] sm:$0xff] }
 0xcc5   : > { %10095 = vpow2.f32 %v3223_v41  ;;  %v3492_v41 = vld [vmem:[#allocation7 + $0x1a8] sm:$0xff] }
 0xcca   : > { %v10092_v42 = vpop.eup %10091 }
 0xccb   : > { %v2894_v43 = vsel %vm626_vm2, %v10092_v42, 0.0 }
 0xccc   : > { %2895 = vadd.xlane.f32.xlu0 %v2894_v43 }
 0xcce   : > { %v10094_v44 = vpop.eup %10093 }
 0xccf   : > { %v3060_v45 = vsel %vm626_vm2, %v10094_v44, 0.0 }
 0xcd0   : > { %3061 = vadd.xlane.f32.xlu1 %v3060_v45  ;;  %v8860_v45 = vld [vmem:[#allocation8 + $0xd] ss:$0 sm:$0xff] }
 0xcd2   : > { %v10096_v46 = vpop.eup %10095 }
 0xcd3   : > { %v3225_v47 = vsel %vm626_vm2, %v10096_v46, 0.0 }
 0xcd4   : > { %3226 = vadd.xlane.f32.xlu0 %v3225_v47 }
 0xce1   : > { %3230 = vrot.lane.b32.xlu1 %v10885_v61, %s10413_s8 }
 0xcea   : > { %3065 = vrot.lane.b32.xlu0 %v10885_v61, %s10411_s24 }
 0xced   : > { %v2734_v49 = vpop.xlane.xlu1 %2733 }
 0xcee   : > { %10097 = vrcp.f32 %v2734_v49 }
 0xcfb   : > { %v10098_v50 = vpop.eup %10097 }
 0xcfc   : > { %v2736_v51 = vmul.f32 %v10098_v50, %v10090_v27 }
 0xcfe   : > { %9481 = vmatmul.mubr.msk.f32.vlgmr.msra.gmra.mxu1 %vm626_vm2, %v2736_v51 }
 0xcff   : > { %9489 = vmatpush3.msra.mxu1 %v2901_v48  ;;  %9490 = vmatprep.mubr.msk.f32.mxu1 %vm10410_vm0, %v10409_v0 }
 0xd00   : > { %9498 = vmatprep.subr.mxu1 %v10409_v0 }
 0xd55   : > { %v2896_v52 = vpop.xlane.xlu0 %2895 }
 0xd56   : > { %10099 = vrcp.f32 %v2896_v52 }
 0xd59   : > { %v3062_v53 = vpop.xlane.xlu1 %3061 }
 0xd5a   : > { %10101 = vrcp.f32 %v3062_v53 }
 0xd5d   : > { %v3227_v55 = vpop.xlane.xlu0 %3226  ;;  %v3231_v61 = vpop.permute.xlu1 %3230 }
 0xd5e   : > { %10103 = vrcp.f32 %v3227_v55 }
 0xd61   : > { %v3066_v58 = vpop.permute.xlu0 %3065 }
 0xd63   : > { %v10100_v56 = vpop.eup %10099 }
 0xd64   : > { %v2898_v57 = vmul.f32 %v10100_v56, %v10092_v42  ;;  %v3491_v42 = vld [vmem:[#allocation7 + $0x1a0] sm:$0xff] }
 0xd66   : > { %9491 = vmatmul.mubr.msk.f32.vlgmr.msra.gmra.mxu1 %vm626_vm2, %v2898_v57 }
 0xd67   : > { %v10102_v59 = vpop.eup %10101  ;;  %9499 = vmatpush3.msra.mxu1 %v3066_v58  ;;  %9500 = vmatprep.mubr.msk.f32.mxu1 %vm10410_vm0, %v10409_v0 }
 0xd68   : > { %9508 = vmatprep.subr.mxu1 %v10409_v0  ;;  %v3064_v60 = vmul.f32 %v10102_v59, %v10094_v44 }
 0xd6a   : > { %9501 = vmatmul.mubr.msk.f32.vlgmr.msra.gmra.mxu1 %vm626_vm2, %v3064_v60 }
 0xd6b   : > { %v10104_v62 = vpop.eup %10103  ;;  %9509 = vmatpush3.msra.mxu1 %v3231_v61  ;;  %9510 = vmatprep.mubr.msk.f32.mxu1 %vm10410_vm0, %v10409_v0 }
 0xd6c   : > { %9524 = vmatprep.subr.mxu1 %v10409_v0  ;;  %v3229_v1 = vmul.f32 %v10104_v62, %v10096_v46 }
 0xd6e   : > { %9511 = vmatmul.mubr.msk.f32.vlgmr.msra.gmra.mxu1 %vm626_vm2, %v3229_v1 }
 0xd6f   : > { %9525 = vmatpush3.msra.mxu1 %v3411_v2  ;;  %9532 = vmatprep.mubr.msk.f32.mxu1 %vm10410_vm0, %v10409_v0 }
 0xd70   : > { %9526 = vmatprep.subr.mxu1 %v10409_v0 }
 0xd71   : > { %9527 = vmatpush3.msra.mxu1 %v3410_v3 }
 0xd72   : > { %9528 = vmatprep.subr.mxu1 %v10409_v0 }
 0xd73   : > { %9529 = vmatpush3.msra.mxu1 %v3409_v4 }
 0xd74   : > { %9530 = vmatprep.subr.mxu1 %v10409_v0 }
 0xd75   : > { %9531 = vmatpush3.msra.mxu1 %v3408_v5 }
 0xd76   : > { %9533 = vmatmul.mubr.msk.f32.vlgmr.msra.gmra.mxu1 %vm386_vm1, %v10875_v54  ;;  %9546 = vmatprep.subr.mxu1 %v10409_v0 }
 0xd77   : > { %9547 = vmatpush3.msra.mxu1 %v3577_v6  ;;  %9554 = vmatprep.mubr.msk.f32.mxu1 %vm10410_vm0, %v10409_v0 }
 0xd78   : > { %9548 = vmatprep.subr.mxu1 %v10409_v0 }
 0xd79   : > { %9549 = vmatpush3.msra.mxu1 %v3576_v7 }
 0xd7a   : > { %9550 = vmatprep.subr.mxu1 %v10409_v0 }
 0xd7b   : > { %9551 = vmatpush3.msra.mxu1 %v3575_v8 }
 0xd7c   : > { %9552 = vmatprep.subr.mxu1 %v10409_v0 }
 0xd7d   : > { %9553 = vmatpush3.msra.mxu1 %v3574_v9 }
 0xd7e   : > { %9555 = vmatmul.mubr.msk.f32.vlgmr.msra.gmra.mxu1 %vm386_vm1, %v10843_v18  ;;  %9562 = vmatprep.subr.mxu1 %v10409_v0 }
 0xd7f   : > { %9564 = vmatprep.mubr.msk.f32.mxu1 %vm10410_vm0, %v10409_v0 }
 0xdbe   : > { %v2806_v54 = vpop.f32.mrf.mxu1 }
 0xdc0   : > { %v9482_v10 = vpop.f32.mrf.mxu1 }
 0xe26   : > { %v2972_v15 = vpop.f32.mrf.mxu1 }
 0xe27   : > { %3307 = vrot.lane.b32.xlu1 %v2972_v15, %s10415_s29 }
 0xe28   : > { %v9492_v16 = vpop.f32.mrf.mxu1 }
 0xe2a   : > { %v3137_v17 = vpop.f32.mrf.mxu1 }
 0xe2b   : > { %3311 = vrot.lane.b32.xlu0 %v3137_v17, %s10416_s7 }
 0xe2c   : > { %v9502_v19 = vpop.f32.mrf.mxu1 }
 0xe2e   : > { %v3302_v20 = vpop.f32.mrf.mxu1 }
 0xe2f   : > { %3315 = vrot.lane.b32.xlu1 %v3302_v20, %s10417_s15 }
 0xe30   : > { %v9512_v21 = vpop.f32.mrf.mxu1 }
 0xe36   : > { %v3486_v63 = vpop.f32.mrf.mxu1 }
 0xe37   : > { %v3487_v23 = vadd.f32 %v8858_v22, %v3486_v63 }
 0xe38   : > { %v9534_v24 = vpop.f32.mrf.mxu1 }
 0xe39   : > { %3816 = vrot.lane.b32.xlu1 %v3487_v23, %s10412_s3 }
 0xe3d   : > { %3982 = vrot.lane.b32.xlu1 %v3487_v23, %s10411_s24 }
 0xe3e   : > { %v3652_v26 = vpop.f32.mrf.mxu1 }
 0xe3f   : > { %v10970_v27 = vadd.f32 %v8862_v25, %v3652_v26 }
 0xe40   : > { %v9556_v28 = vpop.f32.mrf.mxu1 }
 0xe41   : > { %4147 = vrot.lane.b32.xlu1 %v3487_v23, %s10413_s8  ;;  %9563 = vmatpush3.msra.mxu1 %v10970_v27 }
 0xe42   : > { %9572 = vmatprep.subr.mxu1 %v10409_v0 }
 0xe99   : > { %v3308_v29 = vpop.permute.xlu1 %3307 }
 0xe9a   : > { %v3318_v31 = vsel %vm626_vm2, %v2806_v54, %v3308_v29 }
 0xe9d   : > { %v3312_v30 = vpop.permute.xlu0 %3311 }
 0xe9e   : > { %v3319_v32 = vsel %vm1296_vm4, %v3318_v31, %v3312_v30 }
 0xea1   : > { %v3316_v36 = vpop.permute.xlu1 %3315 }
 0xea2   : > { %v3320_v38 = vsel %vm1298_vm5, %v3319_v32, %v3316_v36 }
 0xea3   : > { %9522 = vmatmul.mubr.msk.f32.vlgmr.msra.gmra.mxu0 %vm386_vm1, %v3320_v38 }
 0xea4   : > { %9536 = vmatpush3.msra.mxu0 %v3494_v37  ;;  %9543 = vmatprep.mubr.msk.f32.mxu0 %vm10410_vm0, %v10409_v0 }
 0xea5   : > { %9537 = vmatprep.subr.mxu0 %v10409_v0 }
 0xea6   : > { %9538 = vmatpush3.msra.mxu0 %v3493_v40 }
 0xea7   : > { %9539 = vmatprep.subr.mxu0 %v10409_v0 }
 0xea8   : > { %9540 = vmatpush3.msra.mxu0 %v3492_v41  ;;  %v328_v41 = vadd.s32 16, %v10695_v33 }
 0xea9   : > { %9541 = vmatprep.subr.mxu0 %v10409_v0 }
 0xeaa   : > { %9542 = vmatpush3.msra.mxu0 %v3491_v42 }
 0xeab   : > { %9544 = vmatmul.mubr.msk.f32.vlgmr.msra.gmra.mxu0 %vm386_vm1, %v10843_v18  ;;  %9557 = vmatprep.subr.mxu0 %v10409_v0  ;;  %v3817_v18 = vpop.permute.xlu1 %3816 }
 0xeac   : > { %9559 = vmatprep.mubr.msk.f32.mxu0 %vm10410_vm0, %v10409_v0 }
 0xeaf   : > { %v3983_v51 = vpop.permute.xlu1 %3982 }
 0xeb3   : > { %v4148_v53 = vpop.permute.xlu1 %4147 }
 0xf63   : > { %v10989_v43 = vpop.f32.mrf.mxu0 }
 0xf65   : > { %v9523_v44 = vpop.f32.mrf.mxu0 }
 0xf6b   : > { %v3569_v46 = vpop.f32.mrf.mxu0 }
 0xf6c   : > { %v3570_v47 = vadd.f32 %v8860_v45, %v3569_v46  ;;  %v327_v45 = vadd.s32 8, %v10695_v33 }
 0xf6d   : > { %v9545_v48 = vpop.f32.mrf.mxu0 }
 0xf6e   : > { %3818 = vrot.lane.b32.xlu0 %v3570_v47, %s10412_s3  ;;  %9558 = vmatpush3.xpose.msk.msra.mxu0 %vm626_vm2, %v3570_v47  ;;  %v11046_v48 = vsub.s32 %v328_v41, %v10697_v34 }
 0xf6f   : > { %9567 = vmatprep.subr.mxu0 %v10409_v0 }
 0xf70   : > { %vm335_vm8 = vcmp.eq.s32.totalorder %v11046_v48, 1  ;;  %vm339_vm9 = vcmp.eq.s32.totalorder %v11046_v48, 4294967265 }
 0xf71   : > { %9560 = vmatmul.mubr.msk.f32.vlgmr.msra.gmra.mxu0 %vm626_vm2, %v3487_v23  ;;  %vm343_vm13 = vmor %vm335_vm8, %vm339_vm9 }
 0xf72   : > { %3984 = vrot.lane.b32.xlu0 %v3570_v47, %s10411_s24  ;;  %9569 = vmatprep.mubr.msk.f32.mxu0 %vm10410_vm0, %v10409_v0 }
 0xf76   : > { %4149 = vrot.lane.b32.xlu0 %v3570_v47, %s10413_s8 }
 0xfe0   : > { %v3819_v49 = vpop.permute.xlu0 %3818 }
 0xfe1   : > { %9568 = vmatpush3.xpose.msk.msra.mxu0 %vm626_vm2, %v3819_v49 }
 0xfe2   : > { %9577 = vmatprep.subr.mxu0 %v10409_v0 }
 0xfe4   : > { %v3985_v50 = vpop.permute.xlu0 %3984  ;;  %9570 = vmatmul.mubr.msk.f32.vlgmr.msra.gmra.mxu0 %vm626_vm2, %v3817_v18 }
 0xfe5   : > { %9578 = vmatpush3.xpose.msk.msra.mxu0 %vm626_vm2, %v3985_v50  ;;  %9579 = vmatprep.mubr.msk.f32.mxu0 %vm10410_vm0, %v10409_v0 }
 0xfe6   : > { %9587 = vmatprep.subr.mxu0 %v10409_v0 }
 0xfe8   : > { %v4150_v52 = vpop.permute.xlu0 %4149  ;;  %9580 = vmatmul.mubr.msk.f32.vlgmr.msra.gmra.mxu0 %vm626_vm2, %v3983_v51 }
 0xfe9   : > { %9588 = vmatpush3.xpose.msk.msra.mxu0 %vm626_vm2, %v4150_v52  ;;  %9589 = vmatprep.mubr.msk.f32.mxu0 %vm10410_vm0, %v10409_v0  ;;  %v8856_v52 = vld [vmem:[#allocation8 + $0xb] ss:$0 sm:$0xff] }
 0xfea   : > { %9597 = vmatprep.subr.mxu0 %v10409_v0 }
 0xfec   : > { %9590 = vmatmul.mubr.msk.f32.vlgmr.msra.gmra.mxu0 %vm626_vm2, %v4148_v53  ;;  %v3404_v53 = vadd.f32 %v8856_v52, %v10989_v43  ;;  %v4573_v43 = vld [vmem:[#allocation7 + $0x220] sm:$0xff] }
 0xfed   : > { %9605 = vmatprep.mubr.msk.f32.mxu0 %vm10410_vm0, %v10409_v0 }
0x1031   : > { %v3728_v55 = vpop.f32.mrf.mxu0 }
0x1032   : > { %v3729_v56 = vadd.f32 %v3728_v55, %v10705_v39  ;;  %v4576_v55 = vld [vmem:[#allocation7 + $0x238] sm:$0xff] }
0x1033   : > { %v9561_v57 = vpop.f32.mrf.mxu0 }
0x1034   : > { %v3732_v58 = vsel %vm626_vm2, %v3729_v56, -inf  ;;  %v4574_v57 = vld [vmem:[#allocation7 + $0x228] sm:$0xff] }
0x1035   : > { %3733 = vmax.xlane.f32.xlu0 %v3732_v58 }
0x10a4   : > { %v3890_v59 = vpop.f32.mrf.mxu0 }
0x10a5   : > { %v3891_v60 = vadd.f32 %v3890_v59, %v10705_v39 }
0x10a6   : > { %v9571_v61 = vpop.f32.mrf.mxu0 }
0x10a7   : > { %v3894_v62 = vsel %vm626_vm2, %v3891_v60, -inf  ;;  %v4330_v61 = vld [vmem:[#allocation7 + $0x1f0] sm:$0xff] }
0x10a8   : > { %3895 = vmax.xlane.f32.xlu1 %v3894_v62  ;;  %v4056_v1 = vpop.f32.mrf.mxu0  ;;  %v4329_v62 = vld [vmem:[#allocation7 + $0x1e8] sm:$0xff] }
0x10a9   : > { %v4057_v2 = vadd.f32 %v4056_v1, %v10705_v39  ;;  %v4328_v1 = vld [vmem:[#allocation7 + $0x1e0] sm:$0xff] }
0x10aa   : > { %v9581_v3 = vpop.f32.mrf.mxu0 }
0x10ab   : > { %v4060_v4 = vsel %vm626_vm2, %v4057_v2, -inf }
0x10ac   : > { %4061 = vmax.xlane.f32.xlu0 %v4060_v4  ;;  %v4221_v5 = vpop.f32.mrf.mxu0 }
0x10ad   : > { %v4222_v6 = vadd.f32 %v4221_v5, %v10705_v39 }
0x10ae   : > { %v9591_v7 = vpop.f32.mrf.mxu0 }
0x10af   : > { %v4225_v8 = vsel %vm626_vm2, %v4222_v6, -inf }
0x10b0   : > { %4226 = vmax.xlane.f32.xlu0 %v4225_v8 }
0x10b9   : > { %3906 = vrot.lane.b32.xlu1 %v10970_v27, %s10412_s3 }
0x10be   : > { %v3734_v9 = vpop.xlane.xlu0 %3733 }
0x10bf   : > { %v3735_v54 = vsub.f32 %v3729_v56, %v3734_v9  ;;  %v4575_v56 = vld [vmem:[#allocation7 + $0x230] sm:$0xff] }
0x10c1   : > { %v3736_v10 = vmul.f32 1.442695, %v3735_v54 }
0x10c3   : > { %10105 = vpow2.f32 %v3736_v10 }
0x10d0   : > { %v10106_v11 = vpop.eup %10105 }
0x10d1   : > { %v3738_v12 = vsel %vm626_vm2, %v10106_v11, 0.0 }
0x10dd   : > { %3739 = vadd.xlane.f32.xlu1 %v3738_v12 }
0x1131   : > { %v3896_v13 = vpop.xlane.xlu1 %3895 }
0x1132   : > { %v3897_v14 = vsub.f32 %v3891_v60, %v3896_v13  ;;  %v4331_v60 = vld [vmem:[#allocation7 + $0x1f8] sm:$0xff] }
0x1133   : > { %9598 = vmatpush3.msra.mxu0 %v4331_v60 }
0x1134   : > { %v3898_v15 = vmul.f32 1.442695, %v3897_v14  ;;  %9599 = vmatprep.subr.mxu0 %v10409_v0  ;;  %v4490_v14 = vld [vmem:[#allocation7 + $0x218] sm:$0xff] }
0x1135   : > { %v4062_v16 = vpop.xlane.xlu0 %4061  ;;  %v3907_v29 = vpop.permute.xlu1 %3906  ;;  %9600 = vmatpush3.msra.mxu0 %v4330_v61 }
0x1136   : > { %10107 = vpow2.f32 %v3898_v15  ;;  %v4063_v17 = vsub.f32 %v4057_v2, %v4062_v16  ;;  %9601 = vmatprep.subr.mxu0 %v10409_v0  ;;  %v4489_v16 = vld [vmem:[#allocation7 + $0x210] sm:$0xff] }
0x1137   : > { %9602 = vmatpush3.msra.mxu0 %v4329_v62 }
0x1138   : > { %v4064_v19 = vmul.f32 1.442695, %v4063_v17  ;;  %9603 = vmatprep.subr.mxu0 %v10409_v0  ;;  %v4488_v17 = vld [vmem:[#allocation7 + $0x208] sm:$0xff] }
0x1139   : > { %v4227_v20 = vpop.xlane.xlu0 %4226  ;;  %9604 = vmatpush3.msra.mxu0 %v4328_v1 }
0x113a   : > { %10109 = vpow2.f32 %v4064_v19  ;;  %v4228_v21 = vsub.f32 %v4222_v6, %v4227_v20  ;;  %9619 = vmatprep.subr.mxu0 %v10409_v0  ;;  %v4487_v19 = vld [vmem:[#allocation7 + $0x200] sm:$0xff]  ;;  %v4659_v20 = vld [vmem:[#allocation7 + $0x258] sm:$0xff] }
0x113c   : > { %v4229_v22 = vmul.f32 1.442695, %v4228_v21  ;;  %v4658_v21 = vld [vmem:[#allocation7 + $0x250] sm:$0xff] }
0x113e   : > { %10111 = vpow2.f32 %v4229_v22  ;;  %v4657_v22 = vld [vmem:[#allocation7 + $0x248] sm:$0xff] }
0x1143   : > { %v10108_v63 = vpop.eup %10107 }
0x1144   : > { %v3900_v23 = vsel %vm626_vm2, %v10108_v63, 0.0 }
0x1145   : > { %3901 = vadd.xlane.f32.xlu0 %v3900_v23  ;;  %v8885_v23 = vld [vmem:[#allocation8 + $0x11] ss:$0 sm:$0xff] }
0x1147   : > { %v10110_v24 = vpop.eup %10109 }
0x1148   : > { %v4066_v25 = vsel %vm626_vm2, %v10110_v24, 0.0 }
0x1149   : > { %4067 = vadd.xlane.f32.xlu1 %v4066_v25 }
0x114b   : > { %v10112_v26 = vpop.eup %10111 }
0x114c   : > { %v4231_v28 = vsel %vm626_vm2, %v10112_v26, 0.0 }
0x114d   : > { %4232 = vadd.xlane.f32.xlu0 %v4231_v28 }
0x115a   : > { %4236 = vrot.lane.b32.xlu1 %v10970_v27, %s10413_s8 }
0x1163   : > { %4071 = vrot.lane.b32.xlu0 %v10970_v27, %s10411_s24  ;;  %v329_v27 = vadd.s32 24, %v10695_v33  ;;  %v11052_v33 = vsub.s32 %v327_v45, %v10697_v34 }
0x1165   : > { %v11039_v44 = vsub.s32 %v329_v27, %v10697_v34  ;;  %vm334_vm11 = vcmp.eq.s32.totalorder %v11052_v33, 1  ;;  %vm338_vm12 = vcmp.eq.s32.totalorder %v11052_v33, 4294967265  ;;  %v10418_v34 = vmov 1.0  }
0x1166   : > { %v3740_v30 = vpop.xlane.xlu1 %3739  ;;  %vm342_vm3 = vmor %vm334_vm11, %vm338_vm12  ;;  %vm354_vm11 = vcmp.eq.s32.totalorder %v11052_v33, 4294967295  ;;  %vm353_vm12 = vcmp.eq.s32.totalorder %v10701_v35, 4294967295  ;;  %v8440_v33 = vld [vmem:[#allocation7 + $0x3f8] sm:$0xff]  ;;  %v8437_v35 = vld [vmem:[#allocation7 + $0x3e0] sm:$0xff] }
0x1167   : > { %10113 = vrcp.f32 %v3740_v30  ;;  %vm336_vm6 = vcmp.eq.s32.totalorder %v11039_v44, 1  ;;  %vm340_vm7 = vcmp.eq.s32.totalorder %v11039_v44, 4294967265  ;;  %v8883_v30 = vld [vmem:[#allocation8 + $0x10] ss:$0 sm:$0xff]  ;;  %vm360_vm8 = vcmp.eq.s32.totalorder %v11039_v44, 31 }
0x1168   : > { %vm344_vm10 = vmor %vm336_vm6, %vm340_vm7  ;;  %vm356_vm7 = vcmp.eq.s32.totalorder %v11039_v44, 4294967295  ;;  %v8941_v44 = vld [vmem:[#allocation8 + $0x1b] ss:$0 sm:$0xff] }
0x1169   : > { %vm341_vm6 = vmor %vm333_vm14, %vm337_vm15 }
0x116a   : > { %vm364_vm9 = vmor %vm356_vm7, %vm360_vm8 }
0x1174   : > { %v10114_v31 = vpop.eup %10113 }
0x1175   : > { %v3742_v32 = vmul.f32 %v10114_v31, %v10106_v11 }
0x1177   : > { %9565 = vmatmul.mubr.msk.f32.vlgmr.msra.gmra.mxu1 %vm626_vm2, %v3742_v32 }
0x1178   : > { %9573 = vmatpush3.msra.mxu1 %v3907_v29  ;;  %9574 = vmatprep.mubr.msk.f32.mxu1 %vm10410_vm0, %v10409_v0 }
0x1179   : > { %9582 = vmatprep.subr.mxu1 %v10409_v0 }
0x11ce   : > { %v3902_v36 = vpop.xlane.xlu0 %3901 }
0x11cf   : > { %10115 = vrcp.f32 %v3902_v36 }
0x11d2   : > { %v4068_v37 = vpop.xlane.xlu1 %4067 }
0x11d3   : > { %10117 = vrcp.f32 %v4068_v37 }
0x11d6   : > { %v4233_v38 = vpop.xlane.xlu0 %4232  ;;  %v4237_v49 = vpop.permute.xlu1 %4236 }
0x11d7   : > { %10119 = vrcp.f32 %v4233_v38  ;;  %v8887_v38 = vld [vmem:[#allocation8 + $0x12] ss:$0 sm:$0xff] }
0x11da   : > { %v4072_v46 = vpop.permute.xlu0 %4071 }
0x11dc   : > { %v10116_v40 = vpop.eup %10115 }
0x11dd   : > { %v3904_v42 = vmul.f32 %v10116_v40, %v10108_v63  ;;  %v4656_v63 = vld [vmem:[#allocation7 + $0x240] sm:$0xff] }
0x11df   : > { %9575 = vmatmul.mubr.msk.f32.vlgmr.msra.gmra.mxu1 %vm626_vm2, %v3904_v42 }
0x11e0   : > { %v10118_v47 = vpop.eup %10117  ;;  %9583 = vmatpush3.msra.mxu1 %v4072_v46  ;;  %9584 = vmatprep.mubr.msk.f32.mxu1 %vm10410_vm0, %v10409_v0 }
0x11e1   : > { %9592 = vmatprep.subr.mxu1 %v10409_v0  ;;  %v4070_v18 = vmul.f32 %v10118_v47, %v10110_v24 }
0x11e3   : > { %9585 = vmatmul.mubr.msk.f32.vlgmr.msra.gmra.mxu1 %vm626_vm2, %v4070_v18 }
0x11e4   : > { %v10120_v50 = vpop.eup %10119  ;;  %9593 = vmatpush3.msra.mxu1 %v4237_v49  ;;  %9594 = vmatprep.mubr.msk.f32.mxu1 %vm10410_vm0, %v10409_v0 }
0x11e5   : > { %9608 = vmatprep.subr.mxu1 %v10409_v0  ;;  %v4235_v51 = vmul.f32 %v10120_v50, %v10112_v26 }
0x11e7   : > { %9595 = vmatmul.mubr.msk.f32.vlgmr.msra.gmra.mxu1 %vm626_vm2, %v4235_v51 }
0x11e8   : > { %9609 = vmatpush3.msk.msra.mxu1 %vm344_vm10, %v10418_v34  ;;  %9616 = vmatprep.mubr.msk.f32.mxu1 %vm10410_vm0, %v10409_v0  ;;  %vm355_vm10 = vcmp.eq.s32.totalorder %v11046_v48, 4294967295 }
0x11e9   : > { %9610 = vmatprep.subr.mxu1 %v10409_v0 }
0x11ea   : > { %9611 = vmatpush3.msk.msra.mxu1 %vm343_vm13, %v10418_v34 }
0x11eb   : > { %9612 = vmatprep.subr.mxu1 %v10409_v0 }
0x11ec   : > { %9613 = vmatpush3.msk.msra.mxu1 %vm342_vm3, %v10418_v34 }
0x11ed   : > { %9614 = vmatprep.subr.mxu1 %v10409_v0 }
0x11ee   : > { %9615 = vmatpush3.msk.msra.mxu1 %vm341_vm6, %v10418_v34 }
0x11ef   : > { %9617 = vmatmul.mubr.msk.f32.vlgmr.msra.gmra.mxu1 %vm386_vm1, %v3404_v53  ;;  %9630 = vmatprep.subr.mxu1 %v10409_v0 }
0x11f0   : > { %9638 = vmatprep.mubr.msk.f32.mxu1 %vm10410_vm0, %v10409_v0  ;;  %9631 = vmatpush3.msra.mxu1 %v4576_v55 }
0x11f1   : > { %9632 = vmatprep.subr.mxu1 %v10409_v0 }
0x11f2   : > { %9633 = vmatpush3.msra.mxu1 %v4575_v56 }
0x11f3   : > { %9634 = vmatprep.subr.mxu1 %v10409_v0 }
0x11f4   : > { %9635 = vmatpush3.msra.mxu1 %v4574_v57 }
0x11f5   : > { %9636 = vmatprep.subr.mxu1 %v10409_v0 }
0x11f6   : > { %9637 = vmatpush3.msra.mxu1 %v4573_v43 }
0x11f7   : > { %9652 = vmatprep.subr.mxu1 %v10409_v0 }
0x1237   : > { %v3812_v58 = vpop.f32.mrf.mxu1 }
0x1239   : > { %v9566_v59 = vpop.f32.mrf.mxu1 }
0x129f   : > { %v3978_v2 = vpop.f32.mrf.mxu1 }
0x12a0   : > { %4313 = vrot.lane.b32.xlu1 %v3978_v2, %s10415_s29 }
0x12a1   : > { %v9576_v3 = vpop.f32.mrf.mxu1 }
0x12a3   : > { %v4143_v4 = vpop.f32.mrf.mxu1 }
0x12a4   : > { %4317 = vrot.lane.b32.xlu0 %v4143_v4, %s10416_s7 }
0x12a5   : > { %v9586_v5 = vpop.f32.mrf.mxu1 }
0x12a7   : > { %v4308_v6 = vpop.f32.mrf.mxu1 }
0x12a8   : > { %4321 = vrot.lane.b32.xlu1 %v4308_v6, %s10417_s15 }
0x12a9   : > { %v9596_v7 = vpop.f32.mrf.mxu1 }
0x12af   : > { %v4482_v8 = vpop.f32.mrf.mxu1 }
0x12b0   : > { %9639 = vmatmul.mubr.msk.f32.vlgmr.msra.gmra.mxu1 %vm386_vm1, %v4482_v8 }
0x12b1   : > { %v9618_v9 = vpop.f32.mrf.mxu1  ;;  %9654 = vmatprep.mubr.msk.f32.mxu1 %vm10410_vm0, %v10409_v0 }
0x1312   : > { %v4314_v54 = vpop.permute.xlu1 %4313 }
0x1313   : > { %v4324_v11 = vsel %vm626_vm2, %v3812_v58, %v4314_v54 }
0x1316   : > { %v4318_v10 = vpop.permute.xlu0 %4317 }
0x1317   : > { %v4325_v12 = vsel %vm1296_vm4, %v4324_v11, %v4318_v10 }
0x131a   : > { %v4322_v13 = vpop.permute.xlu1 %4321 }
0x131b   : > { %v4326_v15 = vsel %vm1298_vm5, %v4325_v12, %v4322_v13 }
0x131c   : > { %9606 = vmatmul.mubr.msk.f32.vlgmr.msra.gmra.mxu0 %vm386_vm1, %v4326_v15 }
0x131d   : > { %9620 = vmatpush3.msra.mxu0 %v4490_v14  ;;  %9627 = vmatprep.mubr.msk.f32.mxu0 %vm10410_vm0, %v10409_v0 }
0x131e   : > { %9621 = vmatprep.subr.mxu0 %v10409_v0 }
0x131f   : > { %9622 = vmatpush3.msra.mxu0 %v4489_v16 }
0x1320   : > { %9623 = vmatprep.subr.mxu0 %v10409_v0 }
0x1321   : > { %9624 = vmatpush3.msra.mxu0 %v4488_v17 }
0x1322   : > { %9625 = vmatprep.subr.mxu0 %v10409_v0 }
0x1323   : > { %9626 = vmatpush3.msra.mxu0 %v4487_v19 }
0x1324   : > { %9628 = vmatmul.mubr.msk.f32.vlgmr.msra.gmra.mxu0 %vm386_vm1, %v4482_v8  ;;  %9641 = vmatprep.subr.mxu0 %v10409_v0 }
0x1325   : > { %9642 = vmatpush3.msra.mxu0 %v4659_v20  ;;  %9649 = vmatprep.mubr.msk.f32.mxu0 %vm10410_vm0, %v10409_v0 }
0x1326   : > { %9643 = vmatprep.subr.mxu0 %v10409_v0 }
0x1327   : > { %9644 = vmatpush3.msra.mxu0 %v4658_v21 }
0x1328   : > { %9645 = vmatprep.subr.mxu0 %v10409_v0 }
0x1329   : > { %9646 = vmatpush3.msra.mxu0 %v4657_v22 }
0x132a   : > { %9647 = vmatprep.subr.mxu0 %v10409_v0 }
0x132b   : > { %9648 = vmatpush3.msra.mxu0 %v4656_v63 }
0x132c   : > { %9650 = vmatmul.mubr.msk.f32.vlgmr.msra.gmra.mxu0 %vm386_vm1, %v4482_v8  ;;  %9662 = vmatprep.subr.mxu0 %v10409_v0 }
0x132d   : > { %9664 = vmatprep.mubr.msk.f32.mxu0 %vm10410_vm0, %v10409_v0 }
0x1370   : > { %v4651_v24 = vpop.f32.mrf.mxu1 }
0x1371   : > { %v4652_v25 = vadd.f32 %v8885_v23, %v4651_v24 }
0x1372   : > { %v9640_v26 = vpop.f32.mrf.mxu1 }
0x1373   : > { %4900 = vrot.lane.b32.xlu0 %v4652_v25, %s10412_s3  ;;  %9653 = vmatpush3.xpose.msk.msra.mxu1 %vm626_vm2, %v4652_v25 }
0x1374   : > { %9657 = vmatprep.subr.mxu1 %v10409_v0 }
0x1377   : > { %5066 = vrot.lane.b32.xlu0 %v4652_v25, %s10411_s24 }
0x137b   : > { %5231 = vrot.lane.b32.xlu0 %v4652_v25, %s10413_s8 }
0x13dc   : > { %v11118_v28 = vpop.f32.mrf.mxu0 }
0x13de   : > { %v9607_v29 = vpop.f32.mrf.mxu0 }
0x13e4   : > { %v4568_v31 = vpop.f32.mrf.mxu0 }
0x13e5   : > { %v4569_v32 = vadd.f32 %v8883_v30, %v4568_v31  ;;  %v4901_v36 = vpop.permute.xlu0 %4900 }
0x13e6   : > { %v9629_v37 = vpop.f32.mrf.mxu0  ;;  %9663 = vmatpush3.xpose.msk.msra.mxu0 %vm626_vm2, %v4901_v36 }
0x13e7   : > { %4898 = vrot.lane.b32.xlu1 %v4569_v32, %s10412_s3  ;;  %9655 = vmatmul.mubr.msk.f32.vlgmr.msra.gmra.mxu1 %vm626_vm2, %v4569_v32 }
0x13e8   : > { %9672 = vmatprep.subr.mxu0 %v10409_v0  ;;  %9659 = vmatprep.mubr.msk.f32.mxu1 %vm10410_vm0, %v10409_v0 }
0x13e9   : > { %v5067_v42 = vpop.permute.xlu0 %5066 }
0x13eb   : > { %5064 = vrot.lane.b32.xlu1 %v4569_v32, %s10411_s24 }
0x13ec   : > { %v4734_v27 = vpop.f32.mrf.mxu0 }
0x13ed   : > { %v11127_v40 = vadd.f32 %v8887_v38, %v4734_v27  ;;  %v5232_v47 = vpop.permute.xlu0 %5231 }
0x13ee   : > { %v9651_v41 = vpop.f32.mrf.mxu0 }
0x13ef   : > { %5229 = vrot.lane.b32.xlu1 %v4569_v32, %s10413_s8  ;;  %9658 = vmatpush3.msra.mxu1 %v11127_v40 }
0x13f0   : > { %9667 = vmatprep.subr.mxu1 %v10409_v0 }
0x1459   : > { %v4899_v45 = vpop.permute.xlu1 %4898 }
0x145a   : > { %9665 = vmatmul.mubr.msk.f32.vlgmr.msra.gmra.mxu0 %vm626_vm2, %v4899_v45  ;;  %v5498_v45 = vld [vmem:[#allocation7 + $0x290] sm:$0xff] }
0x145b   : > { %9673 = vmatpush3.xpose.msk.msra.mxu0 %vm626_vm2, %v5067_v42  ;;  %9674 = vmatprep.mubr.msk.f32.mxu0 %vm10410_vm0, %v10409_v0  ;;  %v5499_v42 = vld [vmem:[#allocation7 + $0x298] sm:$0xff] }
0x145c   : > { %9682 = vmatprep.subr.mxu0 %v10409_v0 }
0x145d   : > { %v5065_v46 = vpop.permute.xlu1 %5064 }
0x145e   : > { %9675 = vmatmul.mubr.msk.f32.vlgmr.msra.gmra.mxu0 %vm626_vm2, %v5065_v46  ;;  %v5497_v46 = vld [vmem:[#allocation7 + $0x288] sm:$0xff] }
0x145f   : > { %9683 = vmatpush3.xpose.msk.msra.mxu0 %vm626_vm2, %v5232_v47  ;;  %9684 = vmatprep.mubr.msk.f32.mxu0 %vm10410_vm0, %v10409_v0  ;;  %v8876_v47 = vld [vmem:[#allocation8 + $0xf] ss:$0 sm:$0xff] }
0x1460   : > { %9692 = vmatprep.subr.mxu0 %v10409_v0 }
0x1461   : > { %v5230_v18 = vpop.permute.xlu1 %5229 }
0x1462   : > { %9685 = vmatmul.mubr.msk.f32.vlgmr.msra.gmra.mxu0 %vm626_vm2, %v5230_v18  ;;  %v5496_v18 = vld [vmem:[#allocation7 + $0x280] sm:$0xff] }
0x1463   : > { %9700 = vmatprep.mubr.msk.f32.mxu0 %vm10410_vm0, %v10409_v0 }
0x14a7   : > { %v4810_v49 = vpop.f32.mrf.mxu1 }
0x14a8   : > { %v4811_v50 = vadd.f32 %v4810_v49, %v10705_v39  ;;  %v11181_v49 = vadd.f32 %v8876_v47, %v11118_v28  ;;  %v5665_v28 = vld [vmem:[#allocation7 + $0x2c0] sm:$0xff] }
0x14a9   : > { %v9656_v51 = vpop.f32.mrf.mxu1 }
0x14aa   : > { %v4814_v52 = vsel %vm626_vm2, %v4811_v50, -inf  ;;  %v5667_v51 = vld [vmem:[#allocation7 + $0x2d0] sm:$0xff] }
0x14ab   : > { %4815 = vmax.xlane.f32.xlu0 %v4814_v52  ;;  %v5666_v52 = vld [vmem:[#allocation7 + $0x2c8] sm:$0xff] }
0x151a   : > { %v4972_v53 = vpop.f32.mrf.mxu0 }
0x151b   : > { %v4973_v55 = vadd.f32 %v4972_v53, %v10705_v39 }
0x151c   : > { %v9666_v56 = vpop.f32.mrf.mxu0 }
0x151d   : > { %v4976_v57 = vsel %vm626_vm2, %v4973_v55, -inf  ;;  %v5413_v56 = vld [vmem:[#allocation7 + $0x278] sm:$0xff] }
0x151e   : > { %4977 = vmax.xlane.f32.xlu1 %v4976_v57  ;;  %v5138_v43 = vpop.f32.mrf.mxu0  ;;  %v5412_v57 = vld [vmem:[#allocation7 + $0x270] sm:$0xff]  ;;  %9693 = vmatpush3.msra.mxu0 %v5413_v56 }
0x151f   : > { %v5139_v58 = vadd.f32 %v5138_v43, %v10705_v39  ;;  %9694 = vmatprep.subr.mxu0 %v10409_v0  ;;  %v5411_v43 = vld [vmem:[#allocation7 + $0x268] sm:$0xff] }
0x1520   : > { %v9676_v59 = vpop.f32.mrf.mxu0  ;;  %9695 = vmatpush3.msra.mxu0 %v5412_v57 }
0x1521   : > { %v5142_v60 = vsel %vm626_vm2, %v5139_v58, -inf  ;;  %9696 = vmatprep.subr.mxu0 %v10409_v0 }
0x1522   : > { %5143 = vmax.xlane.f32.xlu0 %v5142_v60  ;;  %v5303_v61 = vpop.f32.mrf.mxu0  ;;  %9697 = vmatpush3.msra.mxu0 %v5411_v43 }
0x1523   : > { %v5304_v62 = vadd.f32 %v5303_v61, %v10705_v39  ;;  %9698 = vmatprep.subr.mxu0 %v10409_v0 }
0x1524   : > { %v9686_v1 = vpop.f32.mrf.mxu0 }
0x1525   : > { %v5307_v2 = vsel %vm626_vm2, %v5304_v62, -inf }
0x1526   : > { %5308 = vmax.xlane.f32.xlu0 %v5307_v2 }
0x152f   : > { %4988 = vrot.lane.b32.xlu1 %v11127_v40, %s10412_s3 }
0x1534   : > { %v4816_v3 = vpop.xlane.xlu0 %4815 }
0x1535   : > { %v4817_v4 = vsub.f32 %v4811_v50, %v4816_v3  ;;  %v5668_v50 = vld [vmem:[#allocation7 + $0x2d8] sm:$0xff]  ;;  %v8903_v3 = vld [vmem:[#allocation8 + $0x14] ss:$0 sm:$0xff] }
0x1537   : > { %v4818_v5 = vmul.f32 1.442695, %v4817_v4 }
0x1539   : > { %10121 = vpow2.f32 %v4818_v5 }
0x1546   : > { %v10122_v6 = vpop.eup %10121 }
0x1547   : > { %v4820_v7 = vsel %vm626_vm2, %v10122_v6, 0.0 }
0x1553   : > { %4821 = vadd.xlane.f32.xlu1 %v4820_v7  ;;  %v8907_v7 = vld [vmem:[#allocation8 + $0x16] ss:$0 sm:$0xff] }
0x15a7   : > { %v4978_v8 = vpop.xlane.xlu1 %4977 }
0x15a8   : > { %v4979_v9 = vsub.f32 %v4973_v55, %v4978_v8 }
0x15aa   : > { %v4980_v54 = vmul.f32 1.442695, %v4979_v9 }
0x15ab   : > { %v5144_v10 = vpop.xlane.xlu0 %5143  ;;  %v4989_v63 = vpop.permute.xlu1 %4988 }
0x15ac   : > { %10123 = vpow2.f32 %v4980_v54  ;;  %v5145_v11 = vsub.f32 %v5139_v58, %v5144_v10  ;;  %v5410_v58 = vld [vmem:[#allocation7 + $0x260] sm:$0xff] }
0x15ad   : > { %9699 = vmatpush3.msra.mxu0 %v5410_v58 }
0x15ae   : > { %v5146_v12 = vmul.f32 1.442695, %v5145_v11  ;;  %9714 = vmatprep.subr.mxu0 %v10409_v0 }
0x15af   : > { %v5309_v13 = vpop.xlane.xlu0 %5308 }
0x15b0   : > { %10125 = vpow2.f32 %v5146_v12  ;;  %v5310_v14 = vsub.f32 %v5304_v62, %v5309_v13 }
0x15b2   : > { %v5311_v15 = vmul.f32 1.442695, %v5310_v14 }
0x15b4   : > { %10127 = vpow2.f32 %v5311_v15  ;;  %v5585_v15 = vld [vmem:[#allocation7 + $0x2b8] sm:$0xff] }
0x15b9   : > { %v10124_v16 = vpop.eup %10123 }
0x15ba   : > { %v4982_v17 = vsel %vm626_vm2, %v10124_v16, 0.0 }
0x15bb   : > { %4983 = vadd.xlane.f32.xlu0 %v4982_v17  ;;  %v5584_v17 = vld [vmem:[#allocation7 + $0x2b0] sm:$0xff] }
0x15bd   : > { %v10126_v19 = vpop.eup %10125 }
0x15be   : > { %v5148_v20 = vsel %vm626_vm2, %v10126_v19, 0.0 }
0x15bf   : > { %5149 = vadd.xlane.f32.xlu1 %v5148_v20  ;;  %v5582_v20 = vld [vmem:[#allocation7 + $0x2a0] sm:$0xff] }
0x15c1   : > { %v10128_v21 = vpop.eup %10127 }
0x15c2   : > { %v5313_v22 = vsel %vm626_vm2, %v10128_v21, 0.0 }
0x15c3   : > { %5314 = vadd.xlane.f32.xlu0 %v5313_v22 }
0x15d0   : > { %5318 = vrot.lane.b32.xlu1 %v11127_v40, %s10413_s8 }
0x15d9   : > { %5153 = vrot.lane.b32.xlu0 %v11127_v40, %s10411_s24 }
0x15dc   : > { %v4822_v23 = vpop.xlane.xlu1 %4821 }
0x15dd   : > { %10129 = vrcp.f32 %v4822_v23 }
0x15ea   : > { %v10130_v24 = vpop.eup %10129 }
0x15eb   : > { %v4824_v25 = vmul.f32 %v10130_v24, %v10122_v6 }
0x15ed   : > { %9660 = vmatmul.mubr.msk.f32.vlgmr.msra.gmra.mxu1 %vm626_vm2, %v4824_v25 }
0x15ee   : > { %9668 = vmatpush3.msra.mxu1 %v4989_v63  ;;  %9669 = vmatprep.mubr.msk.f32.mxu1 %vm10410_vm0, %v10409_v0  ;;  %v8905_v63 = vld [vmem:[#allocation8 + $0x15] ss:$0 sm:$0xff] }
0x15ef   : > { %9677 = vmatprep.subr.mxu1 %v10409_v0 }
0x1644   : > { %v4984_v26 = vpop.xlane.xlu0 %4983 }
0x1645   : > { %10131 = vrcp.f32 %v4984_v26 }
0x1648   : > { %v5150_v29 = vpop.xlane.xlu1 %5149 }
0x1649   : > { %10133 = vrcp.f32 %v5150_v29 }
0x164c   : > { %v5315_v30 = vpop.xlane.xlu0 %5314  ;;  %v5319_v27 = vpop.permute.xlu1 %5318 }
0x164d   : > { %10135 = vrcp.f32 %v5315_v30 }
0x1650   : > { %v5154_v36 = vpop.permute.xlu0 %5153 }
0x1652   : > { %v10132_v31 = vpop.eup %10131 }
0x1653   : > { %v4986_v32 = vmul.f32 %v10132_v31, %v10124_v16 }
0x1655   : > { %9670 = vmatmul.mubr.msk.f32.vlgmr.msra.gmra.mxu1 %vm626_vm2, %v4986_v32 }
0x1656   : > { %v10134_v37 = vpop.eup %10133  ;;  %9678 = vmatpush3.msra.mxu1 %v5154_v36  ;;  %9679 = vmatprep.mubr.msk.f32.mxu1 %vm10410_vm0, %v10409_v0 }
0x1657   : > { %9687 = vmatprep.subr.mxu1 %v10409_v0  ;;  %v5152_v38 = vmul.f32 %v10134_v37, %v10126_v19  ;;  %v5583_v19 = vld [vmem:[#allocation7 + $0x2a8] sm:$0xff] }
0x1659   : > { %9680 = vmatmul.mubr.msk.f32.vlgmr.msra.gmra.mxu1 %vm626_vm2, %v5152_v38 }
0x165a   : > { %v10136_v40 = vpop.eup %10135  ;;  %9688 = vmatpush3.msra.mxu1 %v5319_v27  ;;  %9689 = vmatprep.mubr.msk.f32.mxu1 %vm10410_vm0, %v10409_v0 }
0x165b   : > { %9703 = vmatprep.subr.mxu1 %v10409_v0  ;;  %v5317_v41 = vmul.f32 %v10136_v40, %v10128_v21 }
0x165d   : > { %9690 = vmatmul.mubr.msk.f32.vlgmr.msra.gmra.mxu1 %vm626_vm2, %v5317_v41 }
0x165e   : > { %9704 = vmatpush3.msra.mxu1 %v5499_v42  ;;  %9711 = vmatprep.mubr.msk.f32.mxu1 %vm10410_vm0, %v10409_v0 }
0x165f   : > { %9705 = vmatprep.subr.mxu1 %v10409_v0 }
0x1660   : > { %9706 = vmatpush3.msra.mxu1 %v5498_v45 }
0x1661   : > { %9707 = vmatprep.subr.mxu1 %v10409_v0 }
0x1662   : > { %9708 = vmatpush3.msra.mxu1 %v5497_v46 }
0x1663   : > { %9709 = vmatprep.subr.mxu1 %v10409_v0 }
0x1664   : > { %9710 = vmatpush3.msra.mxu1 %v5496_v18 }
0x1665   : > { %9712 = vmatmul.mubr.msk.f32.vlgmr.msra.gmra.mxu1 %vm386_vm1, %v11181_v49  ;;  %9725 = vmatprep.subr.mxu1 %v10409_v0 }
0x1666   : > { %9726 = vmatpush3.msra.mxu1 %v5668_v50  ;;  %9733 = vmatprep.mubr.msk.f32.mxu1 %vm10410_vm0, %v10409_v0 }
0x1667   : > { %9727 = vmatprep.subr.mxu1 %v10409_v0 }
0x1668   : > { %9728 = vmatpush3.msra.mxu1 %v5667_v51 }
0x1669   : > { %9729 = vmatprep.subr.mxu1 %v10409_v0 }
0x166a   : > { %9730 = vmatpush3.msra.mxu1 %v5666_v52 }
0x166b   : > { %9731 = vmatprep.subr.mxu1 %v10409_v0 }
0x166c   : > { %9732 = vmatpush3.msra.mxu1 %v5665_v28 }
0x166d   : > { %9734 = vmatmul.mubr.msk.f32.vlgmr.msra.gmra.mxu1 %vm386_vm1, %v11181_v49  ;;  %9741 = vmatprep.subr.mxu1 %v10409_v0 }
0x166e   : > { %9743 = vmatprep.mubr.msk.f32.mxu1 %vm10410_vm0, %v10409_v0 }
0x16ad   : > { %v4894_v53 = vpop.f32.mrf.mxu1 }
0x16af   : > { %v9661_v55 = vpop.f32.mrf.mxu1 }
0x1715   : > { %v5060_v59 = vpop.f32.mrf.mxu1 }
0x1716   : > { %5395 = vrot.lane.b32.xlu1 %v5060_v59, %s10415_s29 }
0x1717   : > { %v9671_v60 = vpop.f32.mrf.mxu1 }
0x1719   : > { %v5225_v61 = vpop.f32.mrf.mxu1 }
0x171a   : > { %5399 = vrot.lane.b32.xlu0 %v5225_v61, %s10416_s7 }
0x171b   : > { %v9681_v62 = vpop.f32.mrf.mxu1 }
0x171d   : > { %v5390_v1 = vpop.f32.mrf.mxu1 }
0x171e   : > { %5403 = vrot.lane.b32.xlu1 %v5390_v1, %s10417_s15 }
0x171f   : > { %v9691_v2 = vpop.f32.mrf.mxu1 }
0x1725   : > { %v5577_v4 = vpop.f32.mrf.mxu1 }
0x1726   : > { %v5578_v5 = vadd.f32 %v8903_v3, %v5577_v4 }
0x1727   : > { %v9713_v6 = vpop.f32.mrf.mxu1 }
0x1728   : > { %5907 = vrot.lane.b32.xlu1 %v5578_v5, %s10412_s3 }
0x172c   : > { %6073 = vrot.lane.b32.xlu1 %v5578_v5, %s10411_s24 }
0x172d   : > { %v5743_v8 = vpop.f32.mrf.mxu1 }
0x172e   : > { %v11206_v9 = vadd.f32 %v8907_v7, %v5743_v8 }
0x172f   : > { %v9735_v54 = vpop.f32.mrf.mxu1 }
0x1730   : > { %6238 = vrot.lane.b32.xlu1 %v5578_v5, %s10413_s8  ;;  %9742 = vmatpush3.msra.mxu1 %v11206_v9 }
0x1731   : > { %9751 = vmatprep.subr.mxu1 %v10409_v0 }
0x1788   : > { %v5396_v10 = vpop.permute.xlu1 %5395 }
0x1789   : > { %v5406_v12 = vsel %vm626_vm2, %v4894_v53, %v5396_v10 }
0x178c   : > { %v5400_v11 = vpop.permute.xlu0 %5399 }
0x178d   : > { %v5407_v13 = vsel %vm1296_vm4, %v5406_v12, %v5400_v11 }
0x1790   : > { %v5404_v14 = vpop.permute.xlu1 %5403 }
0x1791   : > { %v5408_v16 = vsel %vm1298_vm5, %v5407_v13, %v5404_v14 }
0x1792   : > { %9701 = vmatmul.mubr.msk.f32.vlgmr.msra.gmra.mxu0 %vm386_vm1, %v5408_v16 }
0x1793   : > { %9715 = vmatpush3.msra.mxu0 %v5585_v15  ;;  %9722 = vmatprep.mubr.msk.f32.mxu0 %vm10410_vm0, %v10409_v0 }
0x1794   : > { %9716 = vmatprep.subr.mxu0 %v10409_v0 }
0x1795   : > { %9717 = vmatpush3.msra.mxu0 %v5584_v17 }
0x1796   : > { %9718 = vmatprep.subr.mxu0 %v10409_v0 }
0x1797   : > { %9719 = vmatpush3.msra.mxu0 %v5583_v19 }
0x1798   : > { %9720 = vmatprep.subr.mxu0 %v10409_v0 }
0x1799   : > { %9721 = vmatpush3.msra.mxu0 %v5582_v20 }
0x179a   : > { %9723 = vmatmul.mubr.msk.f32.vlgmr.msra.gmra.mxu0 %vm386_vm1, %v11181_v49  ;;  %9736 = vmatprep.subr.mxu0 %v10409_v0  ;;  %v5908_v26 = vpop.permute.xlu1 %5907 }
0x179b   : > { %9738 = vmatprep.mubr.msk.f32.mxu0 %vm10410_vm0, %v10409_v0 }
0x179e   : > { %v6074_v31 = vpop.permute.xlu1 %6073 }
0x17a2   : > { %v6239_v36 = vpop.permute.xlu1 %6238 }
0x1852   : > { %v11225_v21 = vpop.f32.mrf.mxu0 }
0x1854   : > { %v9702_v22 = vpop.f32.mrf.mxu0 }
0x185a   : > { %v5660_v23 = vpop.f32.mrf.mxu0 }
0x185b   : > { %v5661_v24 = vadd.f32 %v8905_v63, %v5660_v23 }
0x185c   : > { %v9724_v25 = vpop.f32.mrf.mxu0 }
0x185d   : > { %5909 = vrot.lane.b32.xlu0 %v5661_v24, %s10412_s3  ;;  %9737 = vmatpush3.xpose.msk.msra.mxu0 %vm626_vm2, %v5661_v24 }
0x185e   : > { %9746 = vmatprep.subr.mxu0 %v10409_v0 }
0x1860   : > { %9739 = vmatmul.mubr.msk.f32.vlgmr.msra.gmra.mxu0 %vm626_vm2, %v5578_v5 }
0x1861   : > { %6075 = vrot.lane.b32.xlu0 %v5661_v24, %s10411_s24  ;;  %9748 = vmatprep.mubr.msk.f32.mxu0 %vm10410_vm0, %v10409_v0 }
0x1865   : > { %6240 = vrot.lane.b32.xlu0 %v5661_v24, %s10413_s8 }
0x18cf   : > { %v5910_v29 = vpop.permute.xlu0 %5909 }
0x18d0   : > { %9747 = vmatpush3.xpose.msk.msra.mxu0 %vm626_vm2, %v5910_v29  ;;  %v6508_v29 = vld [vmem:[#allocation7 + $0x318] sm:$0xff] }
0x18d1   : > { %9756 = vmatprep.subr.mxu0 %v10409_v0 }
0x18d3   : > { %v6076_v30 = vpop.permute.xlu0 %6075  ;;  %9749 = vmatmul.mubr.msk.f32.vlgmr.msra.gmra.mxu0 %vm626_vm2, %v5908_v26 }
0x18d4   : > { %9757 = vmatpush3.xpose.msk.msra.mxu0 %vm626_vm2, %v6076_v30  ;;  %9758 = vmatprep.mubr.msk.f32.mxu0 %vm10410_vm0, %v10409_v0  ;;  %v6507_v30 = vld [vmem:[#allocation7 + $0x310] sm:$0xff] }
0x18d5   : > { %9766 = vmatprep.subr.mxu0 %v10409_v0 }
0x18d7   : > { %v6241_v32 = vpop.permute.xlu0 %6240  ;;  %9759 = vmatmul.mubr.msk.f32.vlgmr.msra.gmra.mxu0 %vm626_vm2, %v6074_v31  ;;  %v6506_v31 = vld [vmem:[#allocation7 + $0x308] sm:$0xff] }
0x18d8   : > { %9767 = vmatpush3.xpose.msk.msra.mxu0 %vm626_vm2, %v6241_v32  ;;  %9768 = vmatprep.mubr.msk.f32.mxu0 %vm10410_vm0, %v10409_v0  ;;  %v8901_v32 = vld [vmem:[#allocation8 + $0x13] ss:$0 sm:$0xff] }
0x18d9   : > { %9776 = vmatprep.subr.mxu0 %v10409_v0 }
0x18db   : > { %9769 = vmatmul.mubr.msk.f32.vlgmr.msra.gmra.mxu0 %vm626_vm2, %v6239_v36  ;;  %v6505_v36 = vld [vmem:[#allocation7 + $0x300] sm:$0xff] }
0x18dc   : > { %9784 = vmatprep.mubr.msk.f32.mxu0 %vm10410_vm0, %v10409_v0 }
0x1920   : > { %v5819_v37 = vpop.f32.mrf.mxu0 }
0x1921   : > { %v5820_v38 = vadd.f32 %v5819_v37, %v10705_v39  ;;  %v11286_v37 = vadd.f32 %v8901_v32, %v11225_v21  ;;  %v6420_v21 = vld [vmem:[#allocation7 + $0x2e8] sm:$0xff] }
0x1922   : > { %v9740_v27 = vpop.f32.mrf.mxu0 }
0x1923   : > { %v5823_v40 = vsel %vm626_vm2, %v5820_v38, -inf }
0x1924   : > { %5824 = vmax.xlane.f32.xlu0 %v5823_v40  ;;  %v6422_v40 = vld [vmem:[#allocation7 + $0x2f8] sm:$0xff] }
0x1925   : > { %9777 = vmatpush3.msra.mxu0 %v6422_v40 }
0x1926   : > { %9778 = vmatprep.subr.mxu0 %v10409_v0 }
0x1993   : > { %v5981_v41 = vpop.f32.mrf.mxu0 }
0x1994   : > { %v5982_v42 = vadd.f32 %v5981_v41, %v10705_v39  ;;  %v6421_v41 = vld [vmem:[#allocation7 + $0x2f0] sm:$0xff] }
0x1995   : > { %v9750_v45 = vpop.f32.mrf.mxu0  ;;  %9779 = vmatpush3.msra.mxu0 %v6421_v41 }
0x1996   : > { %v5985_v46 = vsel %vm626_vm2, %v5982_v42, -inf  ;;  %9780 = vmatprep.subr.mxu0 %v10409_v0 }
0x1997   : > { %5986 = vmax.xlane.f32.xlu1 %v5985_v46  ;;  %v6147_v47 = vpop.f32.mrf.mxu0  ;;  %9781 = vmatpush3.msra.mxu0 %v6420_v21 }
0x1998   : > { %v6148_v18 = vadd.f32 %v6147_v47, %v10705_v39  ;;  %9782 = vmatprep.subr.mxu0 %v10409_v0 }
0x1999   : > { %v9760_v49 = vpop.f32.mrf.mxu0 }
0x199a   : > { %v6151_v50 = vsel %vm626_vm2, %v6148_v18, -inf }
0x199b   : > { %6152 = vmax.xlane.f32.xlu0 %v6151_v50  ;;  %v6312_v51 = vpop.f32.mrf.mxu0 }
0x199c   : > { %v6313_v52 = vadd.f32 %v6312_v51, %v10705_v39  ;;  %v6680_v51 = vld [vmem:[#allocation7 + $0x358] sm:$0xff] }
0x199d   : > { %v9770_v28 = vpop.f32.mrf.mxu0 }
0x199e   : > { %v6316_v53 = vsel %vm626_vm2, %v6313_v52, -inf  ;;  %v6679_v28 = vld [vmem:[#allocation7 + $0x350] sm:$0xff] }
0x199f   : > { %6317 = vmax.xlane.f32.xlu0 %v6316_v53 }
0x19a8   : > { %5997 = vrot.lane.b32.xlu1 %v11206_v9, %s10412_s3 }
0x19ad   : > { %v5825_v55 = vpop.xlane.xlu0 %5824 }
0x19ae   : > { %v5826_v56 = vsub.f32 %v5820_v38, %v5825_v55 }
0x19b0   : > { %v5827_v57 = vmul.f32 1.442695, %v5826_v56 }
0x19b2   : > { %10137 = vpow2.f32 %v5827_v57 }
0x19bf   : > { %v10138_v43 = vpop.eup %10137 }
0x19c0   : > { %v5829_v58 = vsel %vm626_vm2, %v10138_v43, 0.0 }
0x19cc   : > { %5830 = vadd.xlane.f32.xlu1 %v5829_v58 }
0x1a20   : > { %v5987_v59 = vpop.xlane.xlu1 %5986 }
0x1a21   : > { %v5988_v60 = vsub.f32 %v5982_v42, %v5987_v59  ;;  %v6419_v42 = vld [vmem:[#allocation7 + $0x2e0] sm:$0xff] }
0x1a22   : > { %9783 = vmatpush3.msra.mxu0 %v6419_v42 }
0x1a23   : > { %v5989_v61 = vmul.f32 1.442695, %v5988_v60  ;;  %9798 = vmatprep.subr.mxu0 %v10409_v0 }
0x1a24   : > { %v6153_v62 = vpop.xlane.xlu0 %6152  ;;  %v5998_v12 = vpop.permute.xlu1 %5997 }
0x1a25   : > { %10139 = vpow2.f32 %v5989_v61  ;;  %v6154_v1 = vsub.f32 %v6148_v18, %v6153_v62  ;;  %v6594_v61 = vld [vmem:[#allocation7 + $0x338] sm:$0xff] }
0x1a27   : > { %v6155_v2 = vmul.f32 1.442695, %v6154_v1  ;;  %v6593_v1 = vld [vmem:[#allocation7 + $0x330] sm:$0xff] }
0x1a28   : > { %v6318_v3 = vpop.xlane.xlu0 %6317 }
0x1a29   : > { %10141 = vpow2.f32 %v6155_v2  ;;  %v6319_v4 = vsub.f32 %v6313_v52, %v6318_v3  ;;  %v8923_v52 = vld [vmem:[#allocation8 + $0x18] ss:$0 sm:$0xff]  ;;  %v6592_v2 = vld [vmem:[#allocation7 + $0x328] sm:$0xff] }
0x1a2a   : > { %v6678_v3 = vld [vmem:[#allocation7 + $0x348] sm:$0xff] }
0x1a2b   : > { %v6320_v5 = vmul.f32 1.442695, %v6319_v4  ;;  %v6591_v4 = vld [vmem:[#allocation7 + $0x320] sm:$0xff] }
0x1a2d   : > { %10143 = vpow2.f32 %v6320_v5  ;;  %v6677_v5 = vld [vmem:[#allocation7 + $0x340] sm:$0xff] }
0x1a32   : > { %v10140_v6 = vpop.eup %10139 }
0x1a33   : > { %v5991_v7 = vsel %vm626_vm2, %v10140_v6, 0.0 }
0x1a34   : > { %5992 = vadd.xlane.f32.xlu0 %v5991_v7 }
0x1a36   : > { %v10142_v8 = vpop.eup %10141 }
0x1a37   : > { %v6157_v54 = vsel %vm626_vm2, %v10142_v8, 0.0 }
0x1a38   : > { %6158 = vadd.xlane.f32.xlu1 %v6157_v54 }
0x1a3a   : > { %v10144_v10 = vpop.eup %10143 }
0x1a3b   : > { %v6322_v11 = vsel %vm626_vm2, %v10144_v10, 0.0 }
0x1a3c   : > { %6323 = vadd.xlane.f32.xlu0 %v6322_v11  ;;  %v8927_v11 = vld [vmem:[#allocation8 + $0x1a] ss:$0 sm:$0xff] }
0x1a49   : > { %6327 = vrot.lane.b32.xlu1 %v11206_v9, %s10413_s8 }
0x1a52   : > { %6162 = vrot.lane.b32.xlu0 %v11206_v9, %s10411_s24 }
0x1a55   : > { %v5831_v13 = vpop.xlane.xlu1 %5830 }
0x1a56   : > { %10145 = vrcp.f32 %v5831_v13 }
0x1a63   : > { %v10146_v14 = vpop.eup %10145 }
0x1a64   : > { %v5833_v15 = vmul.f32 %v10146_v14, %v10138_v43 }
0x1a66   : > { %9744 = vmatmul.mubr.msk.f32.vlgmr.msra.gmra.mxu1 %vm626_vm2, %v5833_v15 }
0x1a67   : > { %9752 = vmatpush3.msra.mxu1 %v5998_v12  ;;  %9753 = vmatprep.mubr.msk.f32.mxu1 %vm10410_vm0, %v10409_v0 }
0x1a68   : > { %9761 = vmatprep.subr.mxu1 %v10409_v0 }
0x1abd   : > { %v5993_v16 = vpop.xlane.xlu0 %5992 }
0x1abe   : > { %10147 = vrcp.f32 %v5993_v16 }
0x1ac1   : > { %v6159_v17 = vpop.xlane.xlu1 %6158 }
0x1ac2   : > { %10149 = vrcp.f32 %v6159_v17 }
0x1ac5   : > { %v6324_v19 = vpop.xlane.xlu0 %6323  ;;  %v6328_v24 = vpop.permute.xlu1 %6327 }
0x1ac6   : > { %10151 = vrcp.f32 %v6324_v19 }
0x1ac9   : > { %v6163_v22 = vpop.permute.xlu0 %6162 }
0x1acb   : > { %v10148_v20 = vpop.eup %10147 }
0x1acc   : > { %v5995_v9 = vmul.f32 %v10148_v20, %v10140_v6  ;;  %v8921_v6 = vld [vmem:[#allocation8 + $0x17] ss:$0 sm:$0xff] }
0x1ace   : > { %9754 = vmatmul.mubr.msk.f32.vlgmr.msra.gmra.mxu1 %vm626_vm2, %v5995_v9 }
0x1acf   : > { %v10150_v63 = vpop.eup %10149  ;;  %9762 = vmatpush3.msra.mxu1 %v6163_v22  ;;  %9763 = vmatprep.mubr.msk.f32.mxu1 %vm10410_vm0, %v10409_v0 }
0x1ad0   : > { %9771 = vmatprep.subr.mxu1 %v10409_v0  ;;  %v6161_v23 = vmul.f32 %v10150_v63, %v10142_v8 }
0x1ad2   : > { %9764 = vmatmul.mubr.msk.f32.vlgmr.msra.gmra.mxu1 %vm626_vm2, %v6161_v23 }
0x1ad3   : > { %v10152_v25 = vpop.eup %10151  ;;  %9772 = vmatpush3.msra.mxu1 %v6328_v24  ;;  %9773 = vmatprep.mubr.msk.f32.mxu1 %vm10410_vm0, %v10409_v0 }
0x1ad4   : > { %9787 = vmatprep.subr.mxu1 %v10409_v0  ;;  %v6326_v26 = vmul.f32 %v10152_v25, %v10144_v10  ;;  %v8925_v10 = vld [vmem:[#allocation8 + $0x19] ss:$0 sm:$0xff] }
0x1ad6   : > { %9774 = vmatmul.mubr.msk.f32.vlgmr.msra.gmra.mxu1 %vm626_vm2, %v6326_v26 }
0x1ad7   : > { %9788 = vmatpush3.msra.mxu1 %v6508_v29  ;;  %9795 = vmatprep.mubr.msk.f32.mxu1 %vm10410_vm0, %v10409_v0 }
0x1ad8   : > { %9789 = vmatprep.subr.mxu1 %v10409_v0 }
0x1ad9   : > { %9790 = vmatpush3.msra.mxu1 %v6507_v30 }
0x1ada   : > { %9791 = vmatprep.subr.mxu1 %v10409_v0 }
0x1adb   : > { %9792 = vmatpush3.msra.mxu1 %v6506_v31 }
0x1adc   : > { %9793 = vmatprep.subr.mxu1 %v10409_v0 }
0x1add   : > { %9794 = vmatpush3.msra.mxu1 %v6505_v36 }
0x1ade   : > { %9796 = vmatmul.mubr.msk.f32.vlgmr.msra.gmra.mxu1 %vm386_vm1, %v11286_v37  ;;  %9809 = vmatprep.subr.mxu1 %v10409_v0 }
0x1adf   : > { %9817 = vmatprep.mubr.msk.f32.mxu1 %vm10410_vm0, %v10409_v0  ;;  %9810 = vmatpush3.msra.mxu1 %v6680_v51 }
0x1ae0   : > { %9811 = vmatprep.subr.mxu1 %v10409_v0 }
0x1ae1   : > { %9812 = vmatpush3.msra.mxu1 %v6679_v28 }
0x1ae2   : > { %9813 = vmatprep.subr.mxu1 %v10409_v0 }
0x1ae3   : > { %9814 = vmatpush3.msra.mxu1 %v6678_v3 }
0x1ae4   : > { %9815 = vmatprep.subr.mxu1 %v10409_v0 }
0x1ae5   : > { %9816 = vmatpush3.msra.mxu1 %v6677_v5 }
0x1ae6   : > { %9825 = vmatprep.subr.mxu1 %v10409_v0 }
0x1b26   : > { %v5903_v38 = vpop.f32.mrf.mxu1 }
0x1b28   : > { %v9745_v27 = vpop.f32.mrf.mxu1 }
0x1b8e   : > { %v6069_v45 = vpop.f32.mrf.mxu1 }
0x1b8f   : > { %6404 = vrot.lane.b32.xlu1 %v6069_v45, %s10415_s29 }
0x1b90   : > { %v9755_v46 = vpop.f32.mrf.mxu1 }
0x1b92   : > { %v6234_v47 = vpop.f32.mrf.mxu1 }
0x1b93   : > { %6408 = vrot.lane.b32.xlu0 %v6234_v47, %s10416_s7 }
0x1b94   : > { %v9765_v18 = vpop.f32.mrf.mxu1 }
0x1b96   : > { %v6399_v49 = vpop.f32.mrf.mxu1 }
0x1b97   : > { %6412 = vrot.lane.b32.xlu1 %v6399_v49, %s10417_s15 }
0x1b98   : > { %v9775_v50 = vpop.f32.mrf.mxu1 }
0x1b9e   : > { %v6586_v53 = vpop.f32.mrf.mxu1 }
0x1b9f   : > { %v6587_v55 = vadd.f32 %v8923_v52, %v6586_v53 }
0x1ba0   : > { %v9797_v56 = vpop.f32.mrf.mxu1 }
0x1ba1   : > { %6919 = vrot.lane.b32.xlu1 %v6587_v55, %s10412_s3 }
0x1ba5   : > { %7085 = vrot.lane.b32.xlu1 %v6587_v55, %s10411_s24 }
0x1ba9   : > { %7250 = vrot.lane.b32.xlu1 %v6587_v55, %s10413_s8 }
0x1c01   : > { %v6405_v57 = vpop.permute.xlu1 %6404 }
0x1c02   : > { %v6415_v58 = vsel %vm626_vm2, %v5903_v38, %v6405_v57 }
0x1c05   : > { %v6409_v43 = vpop.permute.xlu0 %6408 }
0x1c06   : > { %v6416_v59 = vsel %vm1296_vm4, %v6415_v58, %v6409_v43 }
0x1c09   : > { %v6413_v60 = vpop.permute.xlu1 %6412 }
0x1c0a   : > { %v6417_v62 = vsel %vm1298_vm5, %v6416_v59, %v6413_v60 }
0x1c0b   : > { %9785 = vmatmul.mubr.msk.f32.vlgmr.msra.gmra.mxu0 %vm386_vm1, %v6417_v62 }
0x1c0c   : > { %9799 = vmatpush3.msra.mxu0 %v6594_v61  ;;  %9806 = vmatprep.mubr.msk.f32.mxu0 %vm10410_vm0, %v10409_v0 }
0x1c0d   : > { %9800 = vmatprep.subr.mxu0 %v10409_v0 }
0x1c0e   : > { %9801 = vmatpush3.msra.mxu0 %v6593_v1 }
0x1c0f   : > { %9802 = vmatprep.subr.mxu0 %v10409_v0 }
0x1c10   : > { %9803 = vmatpush3.msra.mxu0 %v6592_v2 }
0x1c11   : > { %9804 = vmatprep.subr.mxu0 %v10409_v0 }
0x1c12   : > { %9805 = vmatpush3.msra.mxu0 %v6591_v4 }
0x1c13   : > { %9820 = vmatprep.subr.mxu0 %v10409_v0  ;;  %v6920_v19 = vpop.permute.xlu1 %6919 }
0x1c17   : > { %v7086_v22 = vpop.permute.xlu1 %7085 }
0x1c1b   : > { %v7251_v23 = vpop.permute.xlu1 %7250 }
0x1ccb   : > { %v6500_v7 = vpop.f32.mrf.mxu0 }
0x1ccc   : > { %v11318_v8 = vadd.f32 %v8921_v6, %v6500_v7 }
0x1ccd   : > { %v9786_v54 = vpop.f32.mrf.mxu0 }
0x1cce   : > { %9807 = vmatmul.mubr.msk.f32.vlgmr.msra.gmra.mxu0 %vm386_vm1, %v11318_v8  ;;  %9818 = vmatmul.mubr.msk.f32.vlgmr.msra.gmra.mxu1 %vm386_vm1, %v11318_v8 }
0x1ccf   : > { %9822 = vmatprep.mubr.msk.f32.mxu0 %vm10410_vm0, %v10409_v0  ;;  %9827 = vmatprep.mubr.msk.f32.mxu1 %vm10410_vm0, %v10409_v0 }
0x1d8e   : > { %v6672_v12 = vpop.f32.mrf.mxu0  ;;  %v6755_v13 = vpop.f32.mrf.mxu1 }
0x1d8f   : > { %v6673_v14 = vadd.f32 %v8925_v10, %v6672_v12  ;;  %v11328_v15 = vadd.f32 %v8927_v11, %v6755_v13 }
0x1d90   : > { %v9808_v16 = vpop.f32.mrf.mxu0  ;;  %v9819_v17 = vpop.f32.mrf.mxu1 }
0x1d91   : > { %9826 = vmatpush3.msra.mxu1 %v11328_v15  ;;  %6921 = vrot.lane.b32.xlu0 %v6673_v14, %s10412_s3 }
0x1d92   : > { %9821 = vmatpush3.xpose.msk.msra.mxu0 %vm626_vm2, %v6673_v14  ;;  %9835 = vmatprep.subr.mxu1 %v10409_v0 }
0x1d93   : > { %9830 = vmatprep.subr.mxu0 %v10409_v0 }
0x1d95   : > { %9823 = vmatmul.mubr.msk.f32.vlgmr.msra.gmra.mxu0 %vm626_vm2, %v6587_v55  ;;  %7087 = vrot.lane.b32.xlu0 %v6673_v14, %s10411_s24 }
0x1d96   : > { %9832 = vmatprep.mubr.msk.f32.mxu0 %vm10410_vm0, %v10409_v0 }
0x1d99   : > { %7252 = vrot.lane.b32.xlu0 %v6673_v14, %s10413_s8 }
0x1e03   : > { %v6922_v20 = vpop.permute.xlu0 %6921 }
0x1e04   : > { %9831 = vmatpush3.xpose.msk.msra.mxu0 %vm626_vm2, %v6922_v20 }
0x1e05   : > { %9840 = vmatprep.subr.mxu0 %v10409_v0 }
0x1e07   : > { %v7088_v9 = vpop.permute.xlu0 %7087  ;;  %9833 = vmatmul.mubr.msk.f32.vlgmr.msra.gmra.mxu0 %vm626_vm2, %v6920_v19 }
0x1e08   : > { %9841 = vmatpush3.xpose.msk.msra.mxu0 %vm626_vm2, %v7088_v9  ;;  %9842 = vmatprep.mubr.msk.f32.mxu0 %vm10410_vm0, %v10409_v0  ;;  %v7520_v9 = vld [vmem:[#allocation7 + $0x398] sm:$0xff] }
0x1e09   : > { %9850 = vmatprep.subr.mxu0 %v10409_v0 }
0x1e0b   : > { %v7253_v63 = vpop.permute.xlu0 %7252  ;;  %9843 = vmatmul.mubr.msk.f32.vlgmr.msra.gmra.mxu0 %vm626_vm2, %v7086_v22  ;;  %v7519_v22 = vld [vmem:[#allocation7 + $0x390] sm:$0xff] }
0x1e0c   : > { %9851 = vmatpush3.xpose.msk.msra.mxu0 %vm626_vm2, %v7253_v63  ;;  %9852 = vmatprep.mubr.msk.f32.mxu0 %vm10410_vm0, %v10409_v0  ;;  %v7518_v63 = vld [vmem:[#allocation7 + $0x388] sm:$0xff] }
0x1e0d   : > { %9860 = vmatprep.subr.mxu0 %v10409_v0 }
0x1e0f   : > { %9853 = vmatmul.mubr.msk.f32.vlgmr.msra.gmra.mxu0 %vm626_vm2, %v7251_v23  ;;  %v7517_v23 = vld [vmem:[#allocation7 + $0x380] sm:$0xff] }
0x1e10   : > { %9868 = vmatprep.mubr.msk.f32.mxu0 %vm10410_vm0, %v10409_v0 }
0x1e55   : > { %v6831_v24 = vpop.f32.mrf.mxu0 }
0x1e56   : > { %v6832_v25 = vadd.f32 %v6831_v24, %v10705_v39  ;;  %v7686_v24 = vld [vmem:[#allocation7 + $0x3d8] sm:$0xff] }
0x1e57   : > { %v9824_v26 = vpop.f32.mrf.mxu0 }
0x1e58   : > { %v6835_v29 = vsel %vm626_vm2, %v6832_v25, -inf  ;;  %v7684_v26 = vld [vmem:[#allocation7 + $0x3c8] sm:$0xff] }
0x1e59   : > { %6836 = vmax.xlane.f32.xlu0 %v6835_v29  ;;  %v7683_v29 = vld [vmem:[#allocation7 + $0x3c0] sm:$0xff] }
0x1ec7   : > { %v6993_v30 = vpop.f32.mrf.mxu0 }
0x1ec8   : > { %v6994_v31 = vadd.f32 %v6993_v30, %v10705_v39 }
0x1ec9   : > { %v9834_v32 = vpop.f32.mrf.mxu0 }
0x1eca   : > { %v6997_v36 = vsel %vm626_vm2, %v6994_v31, -inf  ;;  %v7433_v32 = vld [vmem:[#allocation7 + $0x370] sm:$0xff] }
0x1ecb   : > { %6998 = vmax.xlane.f32.xlu1 %v6997_v36  ;;  %v7159_v38 = vpop.f32.mrf.mxu0  ;;  %v7432_v36 = vld [vmem:[#allocation7 + $0x368] sm:$0xff] }
0x1ecc   : > { %v7160_v27 = vadd.f32 %v7159_v38, %v10705_v39  ;;  %v7431_v38 = vld [vmem:[#allocation7 + $0x360] sm:$0xff] }
0x1ecd   : > { %v9844_v40 = vpop.f32.mrf.mxu0 }
0x1ece   : > { %v7163_v41 = vsel %vm626_vm2, %v7160_v27, -inf }
0x1ecf   : > { %7164 = vmax.xlane.f32.xlu0 %v7163_v41  ;;  %v7324_v21 = vpop.f32.mrf.mxu0 }
0x1ed0   : > { %v7325_v42 = vadd.f32 %v7324_v21, %v10705_v39 }
0x1ed1   : > { %v9854_v45 = vpop.f32.mrf.mxu0 }
0x1ed2   : > { %v7328_v46 = vsel %vm626_vm2, %v7325_v42, -inf }
0x1ed3   : > { %7329 = vmax.xlane.f32.xlu0 %v7328_v46  ;;  %v8943_v46 = vld [vmem:[#allocation8 + $0x1c] ss:$0 sm:$0xff] }
0x1edc   : > { %7009 = vrot.lane.b32.xlu1 %v11328_v15, %s10412_s3 }
0x1ee2   : > { %v6837_v47 = vpop.xlane.xlu0 %6836 }
0x1ee3   : > { %v6838_v18 = vsub.f32 %v6832_v25, %v6837_v47  ;;  %v7685_v25 = vld [vmem:[#allocation7 + $0x3d0] sm:$0xff] }
0x1ee5   : > { %v6839_v49 = vmul.f32 1.442695, %v6838_v18 }
0x1ee7   : > { %10153 = vpow2.f32 %v6839_v49 }
0x1ef4   : > { %v10154_v50 = vpop.eup %10153 }
0x1ef5   : > { %v6841_v51 = vsel %vm626_vm2, %v10154_v50, 0.0 }
0x1f00   : > { %6842 = vadd.xlane.f32.xlu1 %v6841_v51 }
0x1f54   : > { %v6999_v52 = vpop.xlane.xlu1 %6998 }
0x1f55   : > { %v7000_v28 = vsub.f32 %v6994_v31, %v6999_v52  ;;  %v7434_v31 = vld [vmem:[#allocation7 + $0x378] sm:$0xff] }
0x1f56   : > { %9861 = vmatpush3.msra.mxu0 %v7434_v31 }
0x1f57   : > { %v7001_v53 = vmul.f32 1.442695, %v7000_v28  ;;  %9862 = vmatprep.subr.mxu0 %v10409_v0 }
0x1f58   : > { %v7165_v55 = vpop.xlane.xlu0 %7164  ;;  %v7010_v4 = vpop.permute.xlu1 %7009  ;;  %9863 = vmatpush3.msra.mxu0 %v7433_v32 }
0x1f59   : > { %10155 = vpow2.f32 %v7001_v53  ;;  %v7166_v56 = vsub.f32 %v7160_v27, %v7165_v55  ;;  %9864 = vmatprep.subr.mxu0 %v10409_v0 }
0x1f5a   : > { %9865 = vmatpush3.msra.mxu0 %v7432_v36 }
0x1f5b   : > { %v7167_v57 = vmul.f32 1.442695, %v7166_v56  ;;  %9866 = vmatprep.subr.mxu0 %v10409_v0 }
0x1f5c   : > { %v7330_v43 = vpop.xlane.xlu0 %7329  ;;  %9867 = vmatpush3.msra.mxu0 %v7431_v38 }
0x1f5d   : > { %10157 = vpow2.f32 %v7167_v57  ;;  %v7331_v58 = vsub.f32 %v7325_v42, %v7330_v43  ;;  %9882 = vmatprep.subr.mxu0 %v10409_v0 }
0x1f5f   : > { %v7332_v59 = vmul.f32 1.442695, %v7331_v58  ;;  %v7603_v58 = vld [vmem:[#allocation7 + $0x3b8] sm:$0xff] }
0x1f61   : > { %10159 = vpow2.f32 %v7332_v59 }
0x1f66   : > { %v10156_v60 = vpop.eup %10155 }
0x1f67   : > { %v7003_v61 = vsel %vm626_vm2, %v10156_v60, 0.0 }
0x1f68   : > { %7004 = vadd.xlane.f32.xlu0 %v7003_v61  ;;  %v7601_v61 = vld [vmem:[#allocation7 + $0x3a8] sm:$0xff] }
0x1f6a   : > { %v10158_v62 = vpop.eup %10157 }
0x1f6b   : > { %v7169_v1 = vsel %vm626_vm2, %v10158_v62, 0.0 }
0x1f6c   : > { %7170 = vadd.xlane.f32.xlu1 %v7169_v1 }
0x1f6e   : > { %v10160_v2 = vpop.eup %10159 }
0x1f6f   : > { %v7334_v3 = vsel %vm626_vm2, %v10160_v2, 0.0 }
0x1f70   : > { %7335 = vadd.xlane.f32.xlu0 %v7334_v3  ;;  %v8945_v3 = vld [vmem:[#allocation8 + $0x1d] ss:$0 sm:$0xff] }
0x1f7d   : > { %7339 = vrot.lane.b32.xlu1 %v11328_v15, %s10413_s8 }
0x1f86   : > { %7174 = vrot.lane.b32.xlu0 %v11328_v15, %s10411_s24 }
0x1f89   : > { %v6843_v5 = vpop.xlane.xlu1 %6842 }
0x1f8a   : > { %10161 = vrcp.f32 %v6843_v5 }
0x1f97   : > { %v10162_v6 = vpop.eup %10161 }
0x1f98   : > { %v6845_v7 = vmul.f32 %v10162_v6, %v10154_v50  ;;  %v8947_v50 = vld [vmem:[#allocation8 + $0x1e] ss:$0 sm:$0xff] }
0x1f9a   : > { %9828 = vmatmul.mubr.msk.f32.vlgmr.msra.gmra.mxu1 %vm626_vm2, %v6845_v7 }
0x1f9b   : > { %9836 = vmatpush3.msra.mxu1 %v7010_v4  ;;  %9837 = vmatprep.mubr.msk.f32.mxu1 %vm10410_vm0, %v10409_v0 }
0x1f9c   : > { %9845 = vmatprep.subr.mxu1 %v10409_v0 }
0x1ff1   : > { %v7005_v54 = vpop.xlane.xlu0 %7004 }
0x1ff2   : > { %10163 = vrcp.f32 %v7005_v54 }
0x1ff5   : > { %v7171_v10 = vpop.xlane.xlu1 %7170 }
0x1ff6   : > { %10165 = vrcp.f32 %v7171_v10 }
0x1ff9   : > { %v7336_v11 = vpop.xlane.xlu0 %7335  ;;  %v7340_v17 = vpop.permute.xlu1 %7339 }
0x1ffa   : > { %10167 = vrcp.f32 %v7336_v11 }
0x1ffd   : > { %v7175_v14 = vpop.permute.xlu0 %7174 }
0x1fff   : > { %v10164_v12 = vpop.eup %10163 }
0x2000   : > { %v7007_v13 = vmul.f32 %v10164_v12, %v10156_v60  ;;  %v7602_v60 = vld [vmem:[#allocation7 + $0x3b0] sm:$0xff] }
0x2002   : > { %9838 = vmatmul.mubr.msk.f32.vlgmr.msra.gmra.mxu1 %vm626_vm2, %v7007_v13 }
0x2003   : > { %v10166_v15 = vpop.eup %10165  ;;  %9846 = vmatpush3.msra.mxu1 %v7175_v14  ;;  %9847 = vmatprep.mubr.msk.f32.mxu1 %vm10410_vm0, %v10409_v0 }
0x2004   : > { %9855 = vmatprep.subr.mxu1 %v10409_v0  ;;  %v7173_v16 = vmul.f32 %v10166_v15, %v10158_v62  ;;  %v7600_v62 = vld [vmem:[#allocation7 + $0x3a0] sm:$0xff] }
0x2006   : > { %9848 = vmatmul.mubr.msk.f32.vlgmr.msra.gmra.mxu1 %vm626_vm2, %v7173_v16 }
0x2007   : > { %v10168_v19 = vpop.eup %10167  ;;  %9856 = vmatpush3.msra.mxu1 %v7340_v17  ;;  %9857 = vmatprep.mubr.msk.f32.mxu1 %vm10410_vm0, %v10409_v0 }
0x2008   : > { %9871 = vmatprep.subr.mxu1 %v10409_v0  ;;  %v7338_v20 = vmul.f32 %v10168_v19, %v10160_v2 }
0x200a   : > { %9858 = vmatmul.mubr.msk.f32.vlgmr.msra.gmra.mxu1 %vm626_vm2, %v7338_v20 }
0x200b   : > { %9872 = vmatpush3.msra.mxu1 %v7520_v9  ;;  %9879 = vmatprep.mubr.msk.f32.mxu1 %vm10410_vm0, %v10409_v0 }
0x200c   : > { %9873 = vmatprep.subr.mxu1 %v10409_v0 }
0x200d   : > { %9874 = vmatpush3.msra.mxu1 %v7519_v22 }
0x200e   : > { %9875 = vmatprep.subr.mxu1 %v10409_v0 }
0x200f   : > { %9876 = vmatpush3.msra.mxu1 %v7518_v63 }
0x2010   : > { %9877 = vmatprep.subr.mxu1 %v10409_v0 }
0x2011   : > { %9878 = vmatpush3.msra.mxu1 %v7517_v23 }
0x2012   : > { %9880 = vmatmul.mubr.msk.f32.vlgmr.msra.gmra.mxu1 %vm386_vm1, %v11318_v8  ;;  %9893 = vmatprep.subr.mxu1 %v10409_v0 }
0x2013   : > { %9894 = vmatpush3.msra.mxu1 %v7686_v24  ;;  %9901 = vmatprep.mubr.msk.f32.mxu1 %vm10410_vm0, %v10409_v0 }
0x2014   : > { %9895 = vmatprep.subr.mxu1 %v10409_v0 }
0x2015   : > { %9896 = vmatpush3.msra.mxu1 %v7685_v25 }
0x2016   : > { %9897 = vmatprep.subr.mxu1 %v10409_v0 }
0x2017   : > { %9898 = vmatpush3.msra.mxu1 %v7684_v26 }
0x2018   : > { %9899 = vmatprep.subr.mxu1 %v10409_v0 }
0x2019   : > { %9900 = vmatpush3.msra.mxu1 %v7683_v29 }
0x201a   : > { %9902 = vmatmul.mubr.msk.f32.vlgmr.msra.gmra.mxu1 %vm386_vm1, %v11286_v37  ;;  %9909 = vmatprep.subr.mxu1 %v10409_v0 }
0x201b   : > { %9911 = vmatprep.mubr.msk.f32.mxu1 %vm10410_vm0, %v10409_v0 }
0x205a   : > { %v6915_v8 = vpop.f32.mrf.mxu1 }
0x205c   : > { %v9829_v30 = vpop.f32.mrf.mxu1 }
0x20c2   : > { %v7081_v27 = vpop.f32.mrf.mxu1 }
0x20c3   : > { %7416 = vrot.lane.b32.xlu1 %v7081_v27, %s10415_s29 }
0x20c4   : > { %v9839_v40 = vpop.f32.mrf.mxu1 }
0x20c6   : > { %v7246_v41 = vpop.f32.mrf.mxu1 }
0x20c7   : > { %7420 = vrot.lane.b32.xlu0 %v7246_v41, %s10416_s7 }
0x20c8   : > { %v9849_v21 = vpop.f32.mrf.mxu1 }
0x20ca   : > { %v7411_v42 = vpop.f32.mrf.mxu1 }
0x20cb   : > { %7424 = vrot.lane.b32.xlu1 %v7411_v42, %s10417_s15 }
0x20cc   : > { %v9859_v45 = vpop.f32.mrf.mxu1 }
0x20d2   : > { %v7595_v47 = vpop.f32.mrf.mxu1 }
0x20d3   : > { %v7596_v18 = vadd.f32 %v8943_v46, %v7595_v47 }
0x20d4   : > { %v9881_v49 = vpop.f32.mrf.mxu1 }
0x20d5   : > { %7925 = vrot.lane.b32.xlu1 %v7596_v18, %s10412_s3 }
0x20d9   : > { %8091 = vrot.lane.b32.xlu1 %v7596_v18, %s10411_s24 }
0x20da   : > { %v7761_v51 = vpop.f32.mrf.mxu1 }
0x20db   : > { %v11413_v52 = vadd.f32 %v8947_v50, %v7761_v51 }
0x20dc   : > { %v9903_v28 = vpop.f32.mrf.mxu1 }
0x20dd   : > { %8256 = vrot.lane.b32.xlu1 %v7596_v18, %s10413_s8  ;;  %9910 = vmatpush3.msra.mxu1 %v11413_v52 }
0x20de   : > { %9919 = vmatprep.subr.mxu1 %v10409_v0 }
0x2135   : > { %v7417_v53 = vpop.permute.xlu1 %7416 }
0x2136   : > { %v7427_v56 = vsel %vm626_vm2, %v6915_v8, %v7417_v53 }
0x2139   : > { %v7421_v55 = vpop.permute.xlu0 %7420 }
0x213a   : > { %v7428_v57 = vsel %vm1296_vm4, %v7427_v56, %v7421_v55 }
0x213d   : > { %v7425_v43 = vpop.permute.xlu1 %7424 }
0x213e   : > { %v7429_v59 = vsel %vm1298_vm5, %v7428_v57, %v7425_v43 }
0x213f   : > { %9869 = vmatmul.mubr.msk.f32.vlgmr.msra.gmra.mxu0 %vm386_vm1, %v7429_v59 }
0x2140   : > { %9883 = vmatpush3.msra.mxu0 %v7603_v58  ;;  %9890 = vmatprep.mubr.msk.f32.mxu0 %vm10410_vm0, %v10409_v0 }
0x2141   : > { %9884 = vmatprep.subr.mxu0 %v10409_v0 }
0x2142   : > { %9885 = vmatpush3.msra.mxu0 %v7602_v60 }
0x2143   : > { %9886 = vmatprep.subr.mxu0 %v10409_v0 }
0x2144   : > { %9887 = vmatpush3.msra.mxu0 %v7601_v61 }
0x2145   : > { %9888 = vmatprep.subr.mxu0 %v10409_v0 }
0x2146   : > { %9889 = vmatpush3.msra.mxu0 %v7600_v62 }
0x2147   : > { %9891 = vmatmul.mubr.msk.f32.vlgmr.msra.gmra.mxu0 %vm386_vm1, %v11286_v37  ;;  %9904 = vmatprep.subr.mxu0 %v10409_v0  ;;  %v7926_v37 = vpop.permute.xlu1 %7925 }
0x2148   : > { %9906 = vmatprep.mubr.msk.f32.mxu0 %vm10410_vm0, %v10409_v0 }
0x214b   : > { %v8092_v10 = vpop.permute.xlu1 %8091 }
0x214f   : > { %v8257_v12 = vpop.permute.xlu1 %8256 }
0x21ff   : > { %v11432_v1 = vpop.f32.mrf.mxu0 }
0x2200   : > { %v7513_v48 = vadd.f32 %v8941_v44, %v11432_v1 }
0x2201   : > { %v9870_v2 = vpop.f32.mrf.mxu0 }
0x2207   : > { %v7678_v4 = vpop.f32.mrf.mxu0 }
0x2208   : > { %v7679_v5 = vadd.f32 %v8945_v3, %v7678_v4 }
0x2209   : > { %v9892_v6 = vpop.f32.mrf.mxu0 }
0x220a   : > { %7927 = vrot.lane.b32.xlu0 %v7679_v5, %s10412_s3  ;;  %9905 = vmatpush3.xpose.msk.msra.mxu0 %vm626_vm2, %v7679_v5 }
0x220b   : > { %9914 = vmatprep.subr.mxu0 %v10409_v0 }
0x220d   : > { %9907 = vmatmul.mubr.msk.f32.vlgmr.msra.gmra.mxu0 %vm626_vm2, %v7596_v18 }
0x220e   : > { %8093 = vrot.lane.b32.xlu0 %v7679_v5, %s10411_s24  ;;  %9916 = vmatprep.mubr.msk.f32.mxu0 %vm10410_vm0, %v10409_v0 }
0x2212   : > { %8258 = vrot.lane.b32.xlu0 %v7679_v5, %s10413_s8 }
0x227c   : > { %v7928_v7 = vpop.permute.xlu0 %7927 }
0x227d   : > { %9915 = vmatpush3.xpose.msk.msra.mxu0 %vm626_vm2, %v7928_v7 }
0x227e   : > { %9924 = vmatprep.subr.mxu0 %v10409_v0 }
0x2280   : > { %v8094_v54 = vpop.permute.xlu0 %8093  ;;  %9917 = vmatmul.mubr.msk.f32.vlgmr.msra.gmra.mxu0 %vm626_vm2, %v7926_v37 }
0x2281   : > { %9925 = vmatpush3.xpose.msk.msra.mxu0 %vm626_vm2, %v8094_v54  ;;  %9926 = vmatprep.mubr.msk.f32.mxu0 %vm10410_vm0, %v10409_v0  ;;  %v8439_v54 = vld [vmem:[#allocation7 + $0x3f0] sm:$0xff] }
0x2282   : > { %9934 = vmatprep.subr.mxu0 %v10409_v0 }
0x2284   : > { %v8259_v11 = vpop.permute.xlu0 %8258  ;;  %9927 = vmatmul.mubr.msk.f32.vlgmr.msra.gmra.mxu0 %vm626_vm2, %v8092_v10  ;;  %v8438_v10 = vld [vmem:[#allocation7 + $0x3e8] sm:$0xff] }
0x2285   : > { %9935 = vmatpush3.xpose.msk.msra.mxu0 %vm626_vm2, %v8259_v11  ;;  %9936 = vmatprep.mubr.msk.f32.mxu0 %vm10410_vm0, %v10409_v0 }
0x2286   : > { %9944 = vmatprep.subr.mxu0 %v10409_v0 }
0x2288   : > { %9937 = vmatmul.mubr.msk.f32.vlgmr.msra.gmra.mxu0 %vm626_vm2, %v8257_v12 }
0x2289   : > { %9952 = vmatprep.mubr.msk.f32.mxu0 %vm10410_vm0, %v10409_v0  ;;  %9945 = vmatpush3.msra.mxu0 %v8440_v33 }
0x228a   : > { %9946 = vmatprep.subr.mxu0 %v10409_v0 }
0x228b   : > { %9947 = vmatpush3.msra.mxu0 %v8439_v54 }
0x228c   : > { %9948 = vmatprep.subr.mxu0 %v10409_v0 }
0x228d   : > { %9949 = vmatpush3.msra.mxu0 %v8438_v10 }
0x228e   : > { %9950 = vmatprep.subr.mxu0 %v10409_v0 }
0x228f   : > { %9951 = vmatpush3.msra.mxu0 %v8437_v35 }
0x22cd   : > { %v7837_v13 = vpop.f32.mrf.mxu0 }
0x22ce   : > { %v7838_v14 = vadd.f32 %v7837_v13, %v10705_v39 }
0x22cf   : > { %v9908_v15 = vpop.f32.mrf.mxu0 }
0x22d0   : > { %v7841_v16 = vsel %vm626_vm2, %v7838_v14, -inf }
0x22d1   : > { %7842 = vmax.xlane.f32.xlu0 %v7841_v16 }
0x2340   : > { %v7999_v17 = vpop.f32.mrf.mxu0 }
0x2341   : > { %v8000_v19 = vadd.f32 %v7999_v17, %v10705_v39 }
0x2342   : > { %v9918_v20 = vpop.f32.mrf.mxu0 }
0x2343   : > { %v8003_v9 = vsel %vm626_vm2, %v8000_v19, -inf }
0x2344   : > { %8004 = vmax.xlane.f32.xlu1 %v8003_v9  ;;  %v8165_v22 = vpop.f32.mrf.mxu0 }
0x2345   : > { %v8166_v63 = vadd.f32 %v8165_v22, %v10705_v39 }
0x2346   : > { %v9928_v23 = vpop.f32.mrf.mxu0 }
0x2347   : > { %v8169_v24 = vsel %vm626_vm2, %v8166_v63, -inf }
0x2348   : > { %8170 = vmax.xlane.f32.xlu0 %v8169_v24  ;;  %v8330_v25 = vpop.f32.mrf.mxu0 }
0x2349   : > { %v8331_v26 = vadd.f32 %v8330_v25, %v10705_v39 }
0x234a   : > { %v9938_v29 = vpop.f32.mrf.mxu0 }
0x234b   : > { %v8334_v8 = vsel %vm626_vm2, %v8331_v26, -inf }
0x234c   : > { %8335 = vmax.xlane.f32.xlu0 %v8334_v8 }
0x235a   : > { %v7843_v30 = vpop.xlane.xlu0 %7842 }
0x235b   : > { %v7844_v31 = vsub.f32 %v7838_v14, %v7843_v30 }
0x235d   : > { %v7845_v32 = vmul.f32 1.442695, %v7844_v31 }
0x235f   : > { %10169 = vpow2.f32 %v7845_v32 }
0x2362   : > { %8180 = vrot.lane.b32.xlu0 %v11413_v52, %s10411_s24  ;;  %s10299_s24 = scalar_lea.vmem %s10298_s16, 256 }
0x2363   : > { %p10301_p1 = scmp.lt.s32.totalorder %s10299_s24, %s10293_s26 }
0x2365   : > { %p10302_p7 = por %p10301_p1, %p10300_p5 }
0x2367   : > { %p10303_p4 = pnand %p10302_p7, %p10296_p13 }
0x236c   : > { %v10170_v36 = vpop.eup %10169 }
0x236d   : > { %v7847_v38 = vsel %vm626_vm2, %v10170_v36, 0.0 }
0x236e   : > { %7848 = vadd.xlane.f32.xlu1 %v7847_v38 }
0x237f   : > { %8015 = vrot.lane.b32.xlu1 %v11413_v52, %s10412_s3 }
0x23cd   : > { %v8005_v27 = vpop.xlane.xlu1 %8004 }
0x23ce   : > { %v8006_v39 = vsub.f32 %v8000_v19, %v8005_v27 }
0x23d0   : > { %v8007_v40 = vmul.f32 1.442695, %v8006_v39 }
0x23d1   : > { %v8171_v41 = vpop.xlane.xlu0 %8170 }
0x23d2   : > { %10171 = vpow2.f32 %v8007_v40  ;;  %v8172_v21 = vsub.f32 %v8166_v63, %v8171_v41 }
0x23d4   : > { %v8173_v42 = vmul.f32 1.442695, %v8172_v21 }
0x23d5   : > { %v8336_v45 = vpop.xlane.xlu0 %8335 }
0x23d6   : > { %10173 = vpow2.f32 %v8173_v42  ;;  %v8337_v46 = vsub.f32 %v8331_v26, %v8336_v45 }
0x23d8   : > { %v8338_v47 = vmul.f32 1.442695, %v8337_v46 }
0x23d9   : > { %v8181_v58 = vpop.permute.xlu0 %8180 }
0x23da   : > { %10175 = vpow2.f32 %v8338_v47 }
0x23df   : > { %v10172_v18 = vpop.eup %10171 }
0x23e0   : > { %v8009_v49 = vsel %vm626_vm2, %v10172_v18, 0.0 }
0x23e1   : > { %8010 = vadd.xlane.f32.xlu0 %v8009_v49 }
0x23e3   : > { %v10174_v50 = vpop.eup %10173 }
0x23e4   : > { %v8175_v51 = vsel %vm626_vm2, %v10174_v50, 0.0 }
0x23e5   : > { %8176 = vadd.xlane.f32.xlu0 %v8175_v51 }
0x23e7   : > { %v10176_v28 = vpop.eup %10175 }
0x23e8   : > { %v8340_v53 = vsel %vm626_vm2, %v10176_v28, 0.0 }
0x23e9   : > { %8341 = vadd.xlane.f32.xlu1 %v8340_v53 }
0x23f7   : > { %v7849_v55 = vpop.xlane.xlu1 %7848 }
0x23f8   : > { %10177 = vrcp.f32 %v7849_v55 }
0x23fb   : > { %8345 = vrot.lane.b32.xlu0 %v11413_v52, %s10413_s8  ;;  %v8016_v43 = vpop.permute.xlu1 %8015 }
0x2405   : > { %v10178_v56 = vpop.eup %10177 }
0x2406   : > { %v7851_v57 = vmul.f32 %v10178_v56, %v10170_v36 }
0x2408   : > { %9912 = vmatmul.mubr.msk.f32.vlgmr.msra.gmra.mxu1 %vm626_vm2, %v7851_v57 }
0x2409   : > { %9920 = vmatpush3.msra.mxu1 %v8016_v43  ;;  %9921 = vmatprep.mubr.msk.f32.mxu1 %vm10410_vm0, %v10409_v0 }
0x240a   : > { %9929 = vmatprep.subr.mxu1 %v10409_v0 }
0x246a   : > { %v8011_v59 = vpop.xlane.xlu0 %8010 }
0x246b   : > { %10179 = vrcp.f32 %v8011_v59 }
0x246e   : > { %v8177_v60 = vpop.xlane.xlu0 %8176 }
0x246f   : > { %10181 = vrcp.f32 %v8177_v60 }
0x2472   : > { %v8342_v61 = vpop.xlane.xlu1 %8341  ;;  %v8346_v4 = vpop.permute.xlu0 %8345 }
0x2473   : > { %10183 = vrcp.f32 %v8342_v61 }
0x2478   : > { %v10180_v62 = vpop.eup %10179 }
0x2479   : > { %v8013_v52 = vmul.f32 %v10180_v62, %v10172_v18 }
0x247b   : > { %9922 = vmatmul.mubr.msk.f32.vlgmr.msra.gmra.mxu1 %vm626_vm2, %v8013_v52 }
0x247c   : > { %v10182_v2 = vpop.eup %10181  ;;  %9930 = vmatpush3.msra.mxu1 %v8181_v58  ;;  %9931 = vmatprep.mubr.msk.f32.mxu1 %vm10410_vm0, %v10409_v0 }
0x247d   : > { %9939 = vmatprep.subr.mxu1 %v10409_v0  ;;  %v8179_v3 = vmul.f32 %v10182_v2, %v10174_v50 }
0x247f   : > { %9932 = vmatmul.mubr.msk.f32.vlgmr.msra.gmra.mxu1 %vm626_vm2, %v8179_v3 }
0x2480   : > { %v10184_v5 = vpop.eup %10183  ;;  %9940 = vmatpush3.msra.mxu1 %v8346_v4  ;;  %9941 = vmatprep.mubr.msk.f32.mxu1 %vm10410_vm0, %v10409_v0 }
0x2481   : > { %9955 = vmatprep.subr.mxu1 %v10409_v0  ;;  %v8344_v6 = vmul.f32 %v10184_v5, %v10176_v28 }
0x2483   : > { %9942 = vmatmul.mubr.msk.f32.vlgmr.msra.gmra.mxu1 %vm626_vm2, %v8344_v6 }
0x2484   : > { %9956 = vmatpush3.msk.msra.mxu1 %vm364_vm9, %v10418_v34  ;;  %9963 = vmatprep.mubr.msk.f32.mxu1 %vm10410_vm0, %v10409_v0 }
0x2485   : > { %9957 = vmatprep.subr.mxu1 %v10409_v0 }
0x2486   : > { %9958 = vmatpush3.msk.msra.mxu1 %vm355_vm10, %v10418_v34 }
0x2487   : > { %9959 = vmatprep.subr.mxu1 %v10409_v0 }
0x2488   : > { %9960 = vmatpush3.msk.msra.mxu1 %vm354_vm11, %v10418_v34 }
0x2489   : > { %9961 = vmatprep.subr.mxu1 %v10409_v0 }
0x248a   : > { %9962 = vmatpush3.msk.msra.mxu1 %vm353_vm12, %v10418_v34 }
0x248b   : > { %9964 = vmatmul.mubr.msk.f32.vlgmr.msra.gmra.mxu1 %vm386_vm1, %v7513_v48 }
0x24c8   : > { %v7921_v37 = vpop.f32.mrf.mxu1 }
0x24ca   : > { %v9913_v7 = vpop.f32.mrf.mxu1 }
0x253b   : > { %v8087_v34 = vpop.f32.mrf.mxu1 }
0x253c   : > { %8422 = vrot.lane.b32.xlu0 %v8087_v34, %s10415_s29 }
0x253d   : > { %v9923_v1 = vpop.f32.mrf.mxu1 }
0x253f   : > { %v8252_v11 = vpop.f32.mrf.mxu1 }
0x2540   : > { %8426 = vrot.lane.b32.xlu0 %v8252_v11, %s10416_s7 }
0x2541   : > { %v9933_v12 = vpop.f32.mrf.mxu1 }
0x2543   : > { %v8417_v13 = vpop.f32.mrf.mxu1 }
0x2544   : > { %8430 = vrot.lane.b32.xlu0 %v8417_v13, %s10417_s15 }
0x2545   : > { %v9943_v14 = vpop.f32.mrf.mxu1 }
0x254b   : > { %v8591_v15 = vpop.f32.mrf.mxu1 }
0x254c   : > { %8595 = vst.msk [vmem:[%s309_s9] sm:$0xff] %vm386_vm1, %v8591_v15 }
0x254d   : > { %v9965_v0 = vpop.f32.mrf.mxu1 }
0x25ae   : > { %v8423_v16 = vpop.permute.xlu0 %8422 }
0x25af   : > { %v8433_v19 = vsel %vm626_vm2, %v7921_v37, %v8423_v16 }
0x25b2   : > { %v8427_v17 = vpop.permute.xlu0 %8426 }
0x25b3   : > { %v8434_v20 = vsel %vm1296_vm4, %v8433_v19, %v8427_v17 }
0x25b6   : > { %v8431_v9 = vpop.permute.xlu0 %8430 }
0x25b7   : > { %v8435_v22 = vsel %vm1298_vm5, %v8434_v20, %v8431_v9 }
0x25b8   : > { %9953 = vmatmul.mubr.msk.f32.vlgmr.msra.gmra.mxu0 %vm386_vm1, %v8435_v22 }
0x25b9   : > { %10306 = shalt.err (!%p10303_p4)
}
0x25ba   : > { %s10307_s3 = scalar_lea.hbm %s8614_s23, 128  ;;  %s10311_s7 = scalar_lea.hbm %s11583_s4, 256 }
0x25bb   : > { %p10308_p10 = scmp.ne.s32.totalorder %s8614_s23, %s10307_s3  ;;  %p10312_p11 = scmp.lt.s32.totalorder %s8614_s23, %s11583_s4 }
0x25bc   : > { %p10313_p2 = scmp.lt.s32.totalorder %s10311_s7, %s10307_s3 }
0x25bd   : > { %p10309_p0 = pnand %p10308_p10, %p11606_p3 }
0x25be   : > { %p10314_p6 = por %p10313_p2, %p10312_p11 }
0x25bf   : > { %p10310_p8 = pneg %p10309_p0 }
0x25c1   : > { %p10315_p12 = pnand %p10314_p6, %p10310_p8 }
0x25c3   : > { %10318 = shalt.err (!%p10315_p12)
}
0x25c4   : > { %9978 = dma.vmem_to_hbm [thread:$0]  (%p11606_p3), %s8617_s11, 128, %s8614_s23, %s8598_s14   ;;  %v8961_v63 = vld [vmem:[#allocation8 + $0x1f] ss:$0 sm:$0xff] }
0x25c5   : > { %s316_s10 = scalar_lea.vmem [#allocation11], %s10614_s2  ;;  %s11541_s16 = scalar_lea.hbm %s11584_s5, %s8970_s6 }
0x25c6   : > { %s8629_s12 = sshll.u32 %s316_s10, 4  ;;  %s8603_s24 = scalar_lea.sflag [#allocation12], %s10611_s27  ;;  %s8630_s12 = int_to_ptr.vmem [resolvable:$true] %s8629_s12 }
0x25c7   : > { %s10319_s3 = scalar_lea.vmem %s8630_s12, 128  ;;  %s10420_s2 = smov [#allocation11]  }
0x25c8   : > { %p10320_p9 = scmp.ne.s32.totalorder %s8630_s12, %s10319_s3  ;;  %s10323_s23 = sshll.u32 %s10420_s2, 4  ;;  %s10324_s23 = int_to_ptr.vmem [resolvable:$false] %s10323_s23 }
0x25c9   : > { %s10325_s11 = scalar_lea.vmem %s10324_s23, 256  ;;  %p10326_p1 = scmp.lt.s32.totalorder %s8630_s12, %s10324_s23 }
0x25ca   : > { %p10321_p13 = pnand %p10320_p9, %p11606_p3  ;;  %p10327_p7 = scmp.lt.s32.totalorder %s10325_s11, %s10319_s3 }
0x25cc   : > { %p10322_p5 = pneg %p10321_p13  ;;  %p10328_p4 = por %p10327_p7, %p10326_p1 }
0x25ce   : > { %p10329_p10 = pnand %p10328_p4, %p10322_p5 }
0x2678   : > { %v8518_v23 = vpop.f32.mrf.mxu0 }
0x2679   : > { %v8519_v24 = vadd.f32 %v8961_v63, %v8518_v23 }
0x267a   : > { %v9954_v25 = vpop.f32.mrf.mxu0 }
0x267b   : > { %8596 = vst.msk [vmem:[%s316_s10] sm:$0xff] %vm386_vm1, %v8519_v24 }
0x267c   : > { %10332 = shalt.err (!%p10329_p10)
}
0x267d   : > { %s10333_s22 = scalar_lea.hbm %s11541_s16, 128  ;;  %s10337_s14 = scalar_lea.hbm %s11584_s5, 256 }
0x267e   : > { %p10334_p0 = scmp.ne.s32.totalorder %s11541_s16, %s10333_s22  ;;  %p10338_p2 = scmp.lt.s32.totalorder %s11541_s16, %s11584_s5 }
0x267f   : > { %p10339_p6 = scmp.lt.s32.totalorder %s10337_s14, %s10333_s22 }
0x2680   : > { %p10335_p8 = pnand %p10334_p0, %p11606_p3 }
0x2681   : > { %p10340_p12 = por %p10339_p6, %p10338_p2 }
0x2682   : > { %p10336_p11 = pneg %p10335_p8 }
0x2684   : > { %p10341_p9 = pnand %p10340_p12, %p10336_p11 }
0x2686   : > { %10344 = shalt.err (!%p10341_p9)
}
0x2687   : > { %9979 = dma.vmem_to_hbm [thread:$0]  (%p11606_p3), %s8630_s12, 128, %s11541_s16, %s8603_s24  }
0x2688 PF: > { %s8641_s7 = sand.u32 1, %s10387_s18   ;;  %p11607_p13 = scmp.ne.s32.totalorder %s11592_s25, 0 }
0x2689   : > { %p11608_p5 = scmp.ge.s32.totalorder %s10399_s21, 2  ;;  %s8642_s15 = scalar_lea.sflag [#allocation4], %s8641_s7 }
0x268b   : > { %p9997_p1 = pnand %p11608_p5, %p11607_p13 }
0x268d   : > { %p9998_p7 = pneg %p9997_p1 }
0x268f   : > { %10378 = dma.done.wait (%p9998_p7), %s8642_s15, 128  }
0x2690   : > { %10380 = vsyncadd (%p9998_p7), %s8642_s15, 4294967168  ;;  %s8651_s9 = scalar_lea.sflag [#allocation12], %s8641_s7 }
0x2691   : > { %10382 = dma.done.wait (%p9998_p7), %s8651_s9, 128  }
0x2692   : > { %10384 = vsyncadd (%p9998_p7), %s8651_s9, 4294967168  ;;  %p26_p3 = scmp.ge.s32.totalorder %s10523_s17, 4   ;;  %s11609_s18 = smov %s10391_s19 }
0x2693   : > { %s11610_s19 = smov %s10395_s20  ;;  %s11611_s20 = smov %s10532_s28 }
0x2694   : > { %s11612_s21 = smov %s10523_s17  ;;  %28 = sbr.rel (!%p26_p3) target bundleno = 13 (0xd), region = 181 }
0x2699   :  { %8656 = vsyncpa [#allocation3], 1 }
0x269a   :  { %8658 = vsyncpa [#allocation3 + $0x1], 1 }
0x269b   :  { %8659 = vsyncpa [#allocation6], 1 }
0x269c   :  { %8661 = vsyncpa [#allocation6 + $0x1], 1 }
0x269d   :  { %8662 = vsyncpa [#allocation9], 1 }
0x269e   :  { %8663 = vsyncpa [#allocation4], 1 }
0x269f   :  { %8665 = vsyncpa [#allocation4 + $0x1], 1 }
0x26a0   :  { %8666 = vsyncpa [#allocation12], 1 }
0x26a1   :  { %8668 = vsyncpa [#allocation12 + $0x1], 1 }

</bundles_post_ra>
